<compile_context>
chip_gen: v7x
topology: tpu7x:2x2x1
jax: 0.10.0
libtpu: 0.0.40
codegen_flags: <defaults>
</compile_context>

<pallas_src>
import functools

import numpy as np
import jax
import jax.numpy as jnp
from jax.experimental import pallas as pl
from jax.experimental.pallas import tpu as pltpu

NEG_SLOPE = 0.2
BN_EPS = 1e-5
KSIZE = 4          # Conv2d kernel_size=4
PAD = 1            # Conv2d padding=1


# --------------------------------------------------------------------------------------
# Fused whole-network kernel
# --------------------------------------------------------------------------------------
def _fused_discriminator_kernel(slopes, compute_dtype, x_ref, *refs):
    """Entire Discriminator forward for ONE batch element, entirely in VMEM.

    x_ref : (1, Hin*Win, Cin)  flattened NHWC input for this batch element.
    refs  : [S_0, W_0, shift_0, S_1, W_1, shift_1, ..., out_ref] where, per layer l:
      S_l     : (16, Mout_l, Min_l)  0/1 per-tap row-selection ("im2col") matrices
      W_l     : (16, Cin_l, Cout_l)  per-tap conv weights with BN scale folded in
      shift_l : (1, Cout_l)          conv bias + BN shift folded
    out_ref : (1, Mout_last, Cout_last)
    """
    out_ref = refs[-1]
    a = x_ref[0]                                           # (Min_0, Cin_0)
    for l, slope in enumerate(slopes):
        s_ref = refs[3 * l]                                # (16, Mout, Min)
        w_ref = refs[3 * l + 1]                            # (16, Cin, Cout)
        b_ref = refs[3 * l + 2]                            # (1, Cout)
        n_taps, m_out, _ = s_ref.shape
        c_out = w_ref.shape[2]

        a = a.astype(compute_dtype)
        acc = jnp.zeros((m_out, c_out), jnp.float32)       # f32 accumulator
        for t in range(n_taps):                            # 16 shifted dots, accumulated
            # Gather the tap-shifted input rows (im2col column block t) on the MXU.
            rows = jnp.dot(s_ref[t], a, preferred_element_type=jnp.float32)
            acc = acc + jnp.dot(rows.astype(compute_dtype), w_ref[t],
                                preferred_element_type=jnp.float32)
        y = acc + b_ref[...]                               # conv bias + BN shift (folded)
        # LeakyReLU; statically skipped for the final layer (slope == 1.0).
        a = y if slope == 1.0 else jnp.where(y >= 0.0, y, slope * y)
    out_ref[0] = a.astype(out_ref.dtype)


# --------------------------------------------------------------------------------------
# Host-side (static) helpers
# --------------------------------------------------------------------------------------
def _conv_out_hw(h_in, w_in, stride):
    h_out = (h_in + 2 * PAD - KSIZE) // stride + 1
    w_out = (w_in + 2 * PAD - KSIZE) // stride + 1
    return h_out, w_out


def _make_tap_selectors(h_in, w_in, stride):
    """(16, Ho*Wo, Hin*Win) 0/1 matrices: S[t] @ flat_activation == im2col block t.

    Out-of-bounds taps (the zero padding) simply have all-zero rows, so padding is
    handled with no explicit padded buffer at all.  Purely shape-dependent -> numpy.
    """
    h_out, w_out = _conv_out_hw(h_in, w_in, stride)
    sel = np.zeros((KSIZE * KSIZE, h_out * w_out, h_in * w_in), np.float32)
    for di in range(KSIZE):
        for dj in range(KSIZE):
            t = di * KSIZE + dj
            for oh in range(h_out):
                ih = stride * oh + di - PAD
                if ih < 0 or ih >= h_in:
                    continue
                for ow in range(w_out):
                    iw = stride * ow + dj - PAD
                    if iw < 0 or iw >= w_in:
                        continue
                    sel[t, oh * w_out + ow, ih * w_in + iw] = 1.0
    return sel, h_out, w_out


# --------------------------------------------------------------------------------------
# Forward pass (single fused pallas_call)
# --------------------------------------------------------------------------------------
def discriminator_forward(params, x_nchw, compute_dtype=jnp.float32):
    n, c_in0, h, w = x_nchw.shape
    # NCHW -> flattened NHWC rows (N, H*W, C); pure layout plumbing, no FLOPs.
    x = jnp.transpose(x_nchw, (0, 2, 3, 1)).reshape(n, h * w, c_in0).astype(compute_dtype)

    inputs = [x]
    in_specs = [pl.BlockSpec((1, h * w, c_in0), lambda b: (b, 0, 0))]
    slopes = []

    h_cur, w_cur = h, w
    for p in params:
        sel_np, h_out, w_out = _make_tap_selectors(h_cur, w_cur, p["stride"])
        wt = p["w"]                                        # (Cout, Cin, 4, 4) -- PyTorch OIHW
        c_out_l, c_in_l = wt.shape[0], wt.shape[1]
        # OIHW -> (taps=kh*kw, Cin, Cout), BN scale folded into the weights.
        w_taps = (jnp.transpose(wt, (2, 3, 1, 0)).reshape(KSIZE * KSIZE, c_in_l, c_out_l)
                  * p["scale"][None, None, :]).astype(compute_dtype)
        shift = p["shift"].reshape(1, c_out_l).astype(jnp.float32)
        sel = jnp.asarray(sel_np, compute_dtype)

        inputs += [sel, w_taps, shift]
        # Constant index_maps -> fetched once, resident in VMEM for the whole grid.
        in_specs += [
            pl.BlockSpec(sel.shape, lambda b: (0, 0, 0)),
            pl.BlockSpec(w_taps.shape, lambda b: (0, 0, 0)),
            pl.BlockSpec(shift.shape, lambda b: (0, 0)),
        ]
        slopes.append(float(p["slope"]))
        h_cur, w_cur = h_out, w_out

    c_out_f = params[-1]["w"].shape[0]
    m_out_f = h_cur * w_cur

    out = pl.pallas_call(
        functools.partial(_fused_discriminator_kernel, tuple(slopes), compute_dtype),
        out_shape=jax.ShapeDtypeStruct((n, m_out_f, c_out_f), jnp.float32),
        grid_spec=pl.GridSpec(
            grid=(n,),                                      # >= 2 steps -> v7x megacore
            in_specs=in_specs,
            out_specs=pl.BlockSpec((1, m_out_f, c_out_f), lambda b: (b, 0, 0)),
        ),
        compiler_params=pltpu.CompilerParams(dimension_semantics=("parallel",)),
    )(*inputs)

    # (N, Ho*Wo, 1) -> NCHW to match PyTorch.
    return jnp.transpose(out.reshape(n, h_cur, w_cur, c_out_f), (0, 3, 1, 2))


# --------------------------------------------------------------------------------------
# Parameters (deterministic, matching Discriminator(layers=layer_cfg) in eval mode)
# --------------------------------------------------------------------------------------
def init_discriminator_params(key, layer_cfg):
    params = []
    in_c = 3
    n_blocks = len(layer_cfg)
    for idx, (out_c, _dropout) in enumerate(layer_cfg):
        key, kw, kb = jax.random.split(key, 3)
        wgt = jax.random.normal(kw, (out_c, in_c, KSIZE, KSIZE), jnp.float32) * 0.05
        b = jax.random.normal(kb, (out_c,), jnp.float32) * 0.05
        stride = 1 if idx == n_blocks - 1 else 2
        normalize = idx != 0
        if normalize:
            # BatchNorm2d default init, eval mode: gamma=1, beta=0, mean=0, var=1.
            gamma = jnp.ones((out_c,), jnp.float32)
            beta = jnp.zeros((out_c,), jnp.float32)
            mean = jnp.zeros((out_c,), jnp.float32)
            var = jnp.ones((out_c,), jnp.float32)
            scale = gamma / jnp.sqrt(var + BN_EPS)
            shift = (b - mean) * scale + beta
        else:
            scale = jnp.ones((out_c,), jnp.float32)
            shift = b
        params.append(dict(w=wgt, scale=scale, shift=shift, stride=stride, slope=NEG_SLOPE))
        in_c = out_c
    # Final Conv2d(in_c -> 1, k=4, stride=1, pad=1): no BN, no activation.
    key, kw, kb = jax.random.split(key, 3)
    wgt = jax.random.normal(kw, (1, in_c, KSIZE, KSIZE), jnp.float32) * 0.05
    b = jax.random.normal(kb, (1,), jnp.float32) * 0.05
    params.append(dict(w=wgt, scale=jnp.ones((1,), jnp.float32), shift=b, stride=1, slope=1.0))
    return params


# --------------------------------------------------------------------------------------
# Pure-JAX reference (lax conv) for correctness checking
# --------------------------------------------------------------------------------------
def reference_forward(params, x_nchw):
    x = jnp.transpose(x_nchw, (0, 2, 3, 1))
    for p in params:
        wgt = jnp.transpose(p["w"], (2, 3, 1, 0))          # OIHW -> HWIO
        y = jax.lax.conv_general_dilated(
            x, wgt, (p["stride"], p["stride"]), [(PAD, PAD), (PAD, PAD)],
            dimension_numbers=("NHWC", "HWIO", "NHWC"))
        y = y * p["scale"] + p["shift"]
        x = jnp.where(y >= 0.0, y, p["slope"] * y)
    return jnp.transpose(x, (0, 3, 1, 2))


if __name__ == "__main__":
    key = jax.random.PRNGKey(0)
    kparam, kx = jax.random.split(key)

    # Discriminator(layers=[(8, 0.0), (16, 0.25), (32, 0.0)]) at small spatial size.
    layer_cfg = [(8, 0.0), (16, 0.25), (32, 0.0)]
    params = init_discriminator_params(kparam, layer_cfg)

    x = jax.random.normal(kx, (2, 3, 16, 16), jnp.float32)   # NCHW, like PyTorch

    out = discriminator_forward(params, x)                   # f32 default keeps 1e-4 check
    out = jax.block_until_ready(out)

    ref = reference_forward(params, x)
    assert out.shape == (2, 1, 2, 2), out.shape
    assert jnp.allclose(out, ref, atol=1e-4, rtol=1e-4), \
        float(jnp.max(jnp.abs(out - ref)))
    print("KERNEL_OK")
</pallas_src>

<mosaic_0001>
module attributes {stable_mosaic.version = 11 : i64} {
  func.func @_fused_discriminator_kernel(%arg0: i32, %arg1: memref<1x256x3xf32, #tpu.memory_space<vmem>>, %arg2: memref<16x64x256xf32, #tpu.memory_space<vmem>>, %arg3: memref<16x3x8xf32, #tpu.memory_space<vmem>>, %arg4: memref<1x8xf32, #tpu.memory_space<vmem>>, %arg5: memref<16x16x64xf32, #tpu.memory_space<vmem>>, %arg6: memref<16x8x16xf32, #tpu.memory_space<vmem>>, %arg7: memref<1x16xf32, #tpu.memory_space<vmem>>, %arg8: memref<16x9x16xf32, #tpu.memory_space<vmem>>, %arg9: memref<16x16x32xf32, #tpu.memory_space<vmem>>, %arg10: memref<1x32xf32, #tpu.memory_space<vmem>>, %arg11: memref<16x4x9xf32, #tpu.memory_space<vmem>>, %arg12: memref<16x32x1xf32, #tpu.memory_space<vmem>>, %arg13: memref<1x1xf32, #tpu.memory_space<vmem>>, %arg14: memref<1x4x1xf32, #tpu.memory_space<vmem>>) attributes {dimension_semantics = [#tpu.dimension_semantics<parallel>], iteration_bounds = array<i64: 2>, scalar_prefetch = 0 : i64, scratch_operands = 0 : i64, tpu.core_type = #tpu.core_type<tc>, window_params = [{transform_indices = @transform_0, window_bounds = array<i64: 1, 256, 3>}, {pipeline_mode = #tpu.pipeline_mode<synchronous>, transform_indices = @transform_1, window_bounds = array<i64: 16, 64, 256>}, {pipeline_mode = #tpu.pipeline_mode<synchronous>, transform_indices = @transform_2, window_bounds = array<i64: 16, 3, 8>}, {pipeline_mode = #tpu.pipeline_mode<synchronous>, transform_indices = @transform_3, window_bounds = array<i64: 1, 8>}, {pipeline_mode = #tpu.pipeline_mode<synchronous>, transform_indices = @transform_4, window_bounds = array<i64: 16, 16, 64>}, {pipeline_mode = #tpu.pipeline_mode<synchronous>, transform_indices = @transform_5, window_bounds = array<i64: 16, 8, 16>}, {pipeline_mode = #tpu.pipeline_mode<synchronous>, transform_indices = @transform_6, window_bounds = array<i64: 1, 16>}, {pipeline_mode = #tpu.pipeline_mode<synchronous>, transform_indices = @transform_7, window_bounds = array<i64: 16, 9, 16>}, {pipeline_mode = #tpu.pipeline_mode<synchronous>, transform_indices = @transform_8, window_bounds = array<i64: 16, 16, 32>}, {pipeline_mode = #tpu.pipeline_mode<synchronous>, transform_indices = @transform_9, window_bounds = array<i64: 1, 32>}, {pipeline_mode = #tpu.pipeline_mode<synchronous>, transform_indices = @transform_10, window_bounds = array<i64: 16, 4, 9>}, {pipeline_mode = #tpu.pipeline_mode<synchronous>, transform_indices = @transform_11, window_bounds = array<i64: 16, 32, 1>}, {pipeline_mode = #tpu.pipeline_mode<synchronous>, transform_indices = @transform_12, window_bounds = array<i64: 1, 1>}, {transform_indices = @transform_13, window_bounds = array<i64: 1, 4, 1>}]} {
    %c0 = arith.constant 0 : index
    %c0_0 = arith.constant 0 : index
    %c0_1 = arith.constant 0 : index
    %0 = vector.load %arg1[%c0, %c0_0, %c0_1] : memref<1x256x3xf32, #tpu.memory_space<vmem>>, vector<1x256x3xf32>
    %1 = vector.shape_cast %0 : vector<1x256x3xf32> to vector<256x3xf32>
    %cst = arith.constant 0.000000e+00 : f32
    %2 = vector.broadcast %cst : f32 to vector<64x8xf32>
    %c0_2 = arith.constant 0 : index
    %c0_3 = arith.constant 0 : index
    %c0_4 = arith.constant 0 : index
    %3 = vector.load %arg2[%c0_2, %c0_3, %c0_4] : memref<16x64x256xf32, #tpu.memory_space<vmem>>, vector<1x64x256xf32>
    %4 = vector.shape_cast %3 : vector<1x64x256xf32> to vector<64x256xf32>
    %cst_5 = arith.constant dense<0.000000e+00> : vector<64x3xf32>
    %5 = tpu.matmul %4, %1, %cst_5 {dimension_numbers = #tpu.dot_dimension_numbers<[1], [0], [0], [1], [0, 0, 1, 1], [], []>} : vector<64x256xf32>, vector<256x3xf32>, vector<64x3xf32> -> vector<64x3xf32>
    %c0_6 = arith.constant 0 : index
    %c0_7 = arith.constant 0 : index
    %c0_8 = arith.constant 0 : index
    %6 = vector.load %arg3[%c0_6, %c0_7, %c0_8] : memref<16x3x8xf32, #tpu.memory_space<vmem>>, vector<1x3x8xf32>
    %7 = vector.shape_cast %6 : vector<1x3x8xf32> to vector<3x8xf32>
    %cst_9 = arith.constant dense<0.000000e+00> : vector<64x8xf32>
    %8 = tpu.matmul %5, %7, %cst_9 {dimension_numbers = #tpu.dot_dimension_numbers<[1], [0], [0], [1], [0, 0, 1, 1], [], []>} : vector<64x3xf32>, vector<3x8xf32>, vector<64x8xf32> -> vector<64x8xf32>
    %9 = arith.addf %2, %8 : vector<64x8xf32>
    %c1 = arith.constant 1 : index
    %c0_10 = arith.constant 0 : index
    %c0_11 = arith.constant 0 : index
    %10 = vector.load %arg2[%c1, %c0_10, %c0_11] : memref<16x64x256xf32, #tpu.memory_space<vmem>>, vector<1x64x256xf32>
    %11 = vector.shape_cast %10 : vector<1x64x256xf32> to vector<64x256xf32>
    %cst_12 = arith.constant dense<0.000000e+00> : vector<64x3xf32>
    %12 = tpu.matmul %11, %1, %cst_12 {dimension_numbers = #tpu.dot_dimension_numbers<[1], [0], [0], [1], [0, 0, 1, 1], [], []>} : vector<64x256xf32>, vector<256x3xf32>, vector<64x3xf32> -> vector<64x3xf32>
    %c1_13 = arith.constant 1 : index
    %c0_14 = arith.constant 0 : index
    %c0_15 = arith.constant 0 : index
    %13 = vector.load %arg3[%c1_13, %c0_14, %c0_15] : memref<16x3x8xf32, #tpu.memory_space<vmem>>, vector<1x3x8xf32>
    %14 = vector.shape_cast %13 : vector<1x3x8xf32> to vector<3x8xf32>
    %cst_16 = arith.constant dense<0.000000e+00> : vector<64x8xf32>
    %15 = tpu.matmul %12, %14, %cst_16 {dimension_numbers = #tpu.dot_dimension_numbers<[1], [0], [0], [1], [0, 0, 1, 1], [], []>} : vector<64x3xf32>, vector<3x8xf32>, vector<64x8xf32> -> vector<64x8xf32>
    %16 = arith.addf %9, %15 : vector<64x8xf32>
    %c2 = arith.constant 2 : index
    %c0_17 = arith.constant 0 : index
    %c0_18 = arith.constant 0 : index
    %17 = vector.load %arg2[%c2, %c0_17, %c0_18] : memref<16x64x256xf32, #tpu.memory_space<vmem>>, vector<1x64x256xf32>
    %18 = vector.shape_cast %17 : vector<1x64x256xf32> to vector<64x256xf32>
    %cst_19 = arith.constant dense<0.000000e+00> : vector<64x3xf32>
    %19 = tpu.matmul %18, %1, %cst_19 {dimension_numbers = #tpu.dot_dimension_numbers<[1], [0], [0], [1], [0, 0, 1, 1], [], []>} : vector<64x256xf32>, vector<256x3xf32>, vector<64x3xf32> -> vector<64x3xf32>
    %c2_20 = arith.constant 2 : index
    %c0_21 = arith.constant 0 : index
    %c0_22 = arith.constant 0 : index
    %20 = vector.load %arg3[%c2_20, %c0_21, %c0_22] : memref<16x3x8xf32, #tpu.memory_space<vmem>>, vector<1x3x8xf32>
    %21 = vector.shape_cast %20 : vector<1x3x8xf32> to vector<3x8xf32>
    %cst_23 = arith.constant dense<0.000000e+00> : vector<64x8xf32>
    %22 = tpu.matmul %19, %21, %cst_23 {dimension_numbers = #tpu.dot_dimension_numbers<[1], [0], [0], [1], [0, 0, 1, 1], [], []>} : vector<64x3xf32>, vector<3x8xf32>, vector<64x8xf32> -> vector<64x8xf32>
    %23 = arith.addf %16, %22 : vector<64x8xf32>
    %c3 = arith.constant 3 : index
    %c0_24 = arith.constant 0 : index
    %c0_25 = arith.constant 0 : index
    %24 = vector.load %arg2[%c3, %c0_24, %c0_25] : memref<16x64x256xf32, #tpu.memory_space<vmem>>, vector<1x64x256xf32>
    %25 = vector.shape_cast %24 : vector<1x64x256xf32> to vector<64x256xf32>
    %cst_26 = arith.constant dense<0.000000e+00> : vector<64x3xf32>
    %26 = tpu.matmul %25, %1, %cst_26 {dimension_numbers = #tpu.dot_dimension_numbers<[1], [0], [0], [1], [0, 0, 1, 1], [], []>} : vector<64x256xf32>, vector<256x3xf32>, vector<64x3xf32> -> vector<64x3xf32>
    %c3_27 = arith.constant 3 : index
    %c0_28 = arith.constant 0 : index
    %c0_29 = arith.constant 0 : index
    %27 = vector.load %arg3[%c3_27, %c0_28, %c0_29] : memref<16x3x8xf32, #tpu.memory_space<vmem>>, vector<1x3x8xf32>
    %28 = vector.shape_cast %27 : vector<1x3x8xf32> to vector<3x8xf32>
    %cst_30 = arith.constant dense<0.000000e+00> : vector<64x8xf32>
    %29 = tpu.matmul %26, %28, %cst_30 {dimension_numbers = #tpu.dot_dimension_numbers<[1], [0], [0], [1], [0, 0, 1, 1], [], []>} : vector<64x3xf32>, vector<3x8xf32>, vector<64x8xf32> -> vector<64x8xf32>
    %30 = arith.addf %23, %29 : vector<64x8xf32>
    %c4 = arith.constant 4 : index
    %c0_31 = arith.constant 0 : index
    %c0_32 = arith.constant 0 : index
    %31 = vector.load %arg2[%c4, %c0_31, %c0_32] : memref<16x64x256xf32, #tpu.memory_space<vmem>>, vector<1x64x256xf32>
    %32 = vector.shape_cast %31 : vector<1x64x256xf32> to vector<64x256xf32>
    %cst_33 = arith.constant dense<0.000000e+00> : vector<64x3xf32>
    %33 = tpu.matmul %32, %1, %cst_33 {dimension_numbers = #tpu.dot_dimension_numbers<[1], [0], [0], [1], [0, 0, 1, 1], [], []>} : vector<64x256xf32>, vector<256x3xf32>, vector<64x3xf32> -> vector<64x3xf32>
    %c4_34 = arith.constant 4 : index
    %c0_35 = arith.constant 0 : index
    %c0_36 = arith.constant 0 : index
    %34 = vector.load %arg3[%c4_34, %c0_35, %c0_36] : memref<16x3x8xf32, #tpu.memory_space<vmem>>, vector<1x3x8xf32>
    %35 = vector.shape_cast %34 : vector<1x3x8xf32> to vector<3x8xf32>
    %cst_37 = arith.constant dense<0.000000e+00> : vector<64x8xf32>
    %36 = tpu.matmul %33, %35, %cst_37 {dimension_numbers = #tpu.dot_dimension_numbers<[1], [0], [0], [1], [0, 0, 1, 1], [], []>} : vector<64x3xf32>, vector<3x8xf32>, vector<64x8xf32> -> vector<64x8xf32>
    %37 = arith.addf %30, %36 : vector<64x8xf32>
    %c5 = arith.constant 5 : index
    %c0_38 = arith.constant 0 : index
    %c0_39 = arith.constant 0 : index
    %38 = vector.load %arg2[%c5, %c0_38, %c0_39] : memref<16x64x256xf32, #tpu.memory_space<vmem>>, vector<1x64x256xf32>
    %39 = vector.shape_cast %38 : vector<1x64x256xf32> to vector<64x256xf32>
    %cst_40 = arith.constant dense<0.000000e+00> : vector<64x3xf32>
    %40 = tpu.matmul %39, %1, %cst_40 {dimension_numbers = #tpu.dot_dimension_numbers<[1], [0], [0], [1], [0, 0, 1, 1], [], []>} : vector<64x256xf32>, vector<256x3xf32>, vector<64x3xf32> -> vector<64x3xf32>
    %c5_41 = arith.constant 5 : index
    %c0_42 = arith.constant 0 : index
    %c0_43 = arith.constant 0 : index
    %41 = vector.load %arg3[%c5_41, %c0_42, %c0_43] : memref<16x3x8xf32, #tpu.memory_space<vmem>>, vector<1x3x8xf32>
    %42 = vector.shape_cast %41 : vector<1x3x8xf32> to vector<3x8xf32>
    %cst_44 = arith.constant dense<0.000000e+00> : vector<64x8xf32>
    %43 = tpu.matmul %40, %42, %cst_44 {dimension_numbers = #tpu.dot_dimension_numbers<[1], [0], [0], [1], [0, 0, 1, 1], [], []>} : vector<64x3xf32>, vector<3x8xf32>, vector<64x8xf32> -> vector<64x8xf32>
    %44 = arith.addf %37, %43 : vector<64x8xf32>
    %c6 = arith.constant 6 : index
    %c0_45 = arith.constant 0 : index
    %c0_46 = arith.constant 0 : index
    %45 = vector.load %arg2[%c6, %c0_45, %c0_46] : memref<16x64x256xf32, #tpu.memory_space<vmem>>, vector<1x64x256xf32>
    %46 = vector.shape_cast %45 : vector<1x64x256xf32> to vector<64x256xf32>
    %cst_47 = arith.constant dense<0.000000e+00> : vector<64x3xf32>
    %47 = tpu.matmul %46, %1, %cst_47 {dimension_numbers = #tpu.dot_dimension_numbers<[1], [0], [0], [1], [0, 0, 1, 1], [], []>} : vector<64x256xf32>, vector<256x3xf32>, vector<64x3xf32> -> vector<64x3xf32>
    %c6_48 = arith.constant 6 : index
    %c0_49 = arith.constant 0 : index
    %c0_50 = arith.constant 0 : index
    %48 = vector.load %arg3[%c6_48, %c0_49, %c0_50] : memref<16x3x8xf32, #tpu.memory_space<vmem>>, vector<1x3x8xf32>
    %49 = vector.shape_cast %48 : vector<1x3x8xf32> to vector<3x8xf32>
    %cst_51 = arith.constant dense<0.000000e+00> : vector<64x8xf32>
    %50 = tpu.matmul %47, %49, %cst_51 {dimension_numbers = #tpu.dot_dimension_numbers<[1], [0], [0], [1], [0, 0, 1, 1], [], []>} : vector<64x3xf32>, vector<3x8xf32>, vector<64x8xf32> -> vector<64x8xf32>
    %51 = arith.addf %44, %50 : vector<64x8xf32>
    %c7 = arith.constant 7 : index
    %c0_52 = arith.constant 0 : index
    %c0_53 = arith.constant 0 : index
    %52 = vector.load %arg2[%c7, %c0_52, %c0_53] : memref<16x64x256xf32, #tpu.memory_space<vmem>>, vector<1x64x256xf32>
    %53 = vector.shape_cast %52 : vector<1x64x256xf32> to vector<64x256xf32>
    %cst_54 = arith.constant dense<0.000000e+00> : vector<64x3xf32>
    %54 = tpu.matmul %53, %1, %cst_54 {dimension_numbers = #tpu.dot_dimension_numbers<[1], [0], [0], [1], [0, 0, 1, 1], [], []>} : vector<64x256xf32>, vector<256x3xf32>, vector<64x3xf32> -> vector<64x3xf32>
    %c7_55 = arith.constant 7 : index
    %c0_56 = arith.constant 0 : index
    %c0_57 = arith.constant 0 : index
    %55 = vector.load %arg3[%c7_55, %c0_56, %c0_57] : memref<16x3x8xf32, #tpu.memory_space<vmem>>, vector<1x3x8xf32>
    %56 = vector.shape_cast %55 : vector<1x3x8xf32> to vector<3x8xf32>
    %cst_58 = arith.constant dense<0.000000e+00> : vector<64x8xf32>
    %57 = tpu.matmul %54, %56, %cst_58 {dimension_numbers = #tpu.dot_dimension_numbers<[1], [0], [0], [1], [0, 0, 1, 1], [], []>} : vector<64x3xf32>, vector<3x8xf32>, vector<64x8xf32> -> vector<64x8xf32>
    %58 = arith.addf %51, %57 : vector<64x8xf32>
    %c8 = arith.constant 8 : index
    %c0_59 = arith.constant 0 : index
    %c0_60 = arith.constant 0 : index
    %59 = vector.load %arg2[%c8, %c0_59, %c0_60] : memref<16x64x256xf32, #tpu.memory_space<vmem>>, vector<1x64x256xf32>
    %60 = vector.shape_cast %59 : vector<1x64x256xf32> to vector<64x256xf32>
    %cst_61 = arith.constant dense<0.000000e+00> : vector<64x3xf32>
    %61 = tpu.matmul %60, %1, %cst_61 {dimension_numbers = #tpu.dot_dimension_numbers<[1], [0], [0], [1], [0, 0, 1, 1], [], []>} : vector<64x256xf32>, vector<256x3xf32>, vector<64x3xf32> -> vector<64x3xf32>
    %c8_62 = arith.constant 8 : index
    %c0_63 = arith.constant 0 : index
    %c0_64 = arith.constant 0 : index
    %62 = vector.load %arg3[%c8_62, %c0_63, %c0_64] : memref<16x3x8xf32, #tpu.memory_space<vmem>>, vector<1x3x8xf32>
    %63 = vector.shape_cast %62 : vector<1x3x8xf32> to vector<3x8xf32>
    %cst_65 = arith.constant dense<0.000000e+00> : vector<64x8xf32>
    %64 = tpu.matmul %61, %63, %cst_65 {dimension_numbers = #tpu.dot_dimension_numbers<[1], [0], [0], [1], [0, 0, 1, 1], [], []>} : vector<64x3xf32>, vector<3x8xf32>, vector<64x8xf32> -> vector<64x8xf32>
    %65 = arith.addf %58, %64 : vector<64x8xf32>
    %c9 = arith.constant 9 : index
    %c0_66 = arith.constant 0 : index
    %c0_67 = arith.constant 0 : index
    %66 = vector.load %arg2[%c9, %c0_66, %c0_67] : memref<16x64x256xf32, #tpu.memory_space<vmem>>, vector<1x64x256xf32>
    %67 = vector.shape_cast %66 : vector<1x64x256xf32> to vector<64x256xf32>
    %cst_68 = arith.constant dense<0.000000e+00> : vector<64x3xf32>
    %68 = tpu.matmul %67, %1, %cst_68 {dimension_numbers = #tpu.dot_dimension_numbers<[1], [0], [0], [1], [0, 0, 1, 1], [], []>} : vector<64x256xf32>, vector<256x3xf32>, vector<64x3xf32> -> vector<64x3xf32>
    %c9_69 = arith.constant 9 : index
    %c0_70 = arith.constant 0 : index
    %c0_71 = arith.constant 0 : index
    %69 = vector.load %arg3[%c9_69, %c0_70, %c0_71] : memref<16x3x8xf32, #tpu.memory_space<vmem>>, vector<1x3x8xf32>
    %70 = vector.shape_cast %69 : vector<1x3x8xf32> to vector<3x8xf32>
    %cst_72 = arith.constant dense<0.000000e+00> : vector<64x8xf32>
    %71 = tpu.matmul %68, %70, %cst_72 {dimension_numbers = #tpu.dot_dimension_numbers<[1], [0], [0], [1], [0, 0, 1, 1], [], []>} : vector<64x3xf32>, vector<3x8xf32>, vector<64x8xf32> -> vector<64x8xf32>
    %72 = arith.addf %65, %71 : vector<64x8xf32>
    %c10 = arith.constant 10 : index
    %c0_73 = arith.constant 0 : index
    %c0_74 = arith.constant 0 : index
    %73 = vector.load %arg2[%c10, %c0_73, %c0_74] : memref<16x64x256xf32, #tpu.memory_space<vmem>>, vector<1x64x256xf32>
    %74 = vector.shape_cast %73 : vector<1x64x256xf32> to vector<64x256xf32>
    %cst_75 = arith.constant dense<0.000000e+00> : vector<64x3xf32>
    %75 = tpu.matmul %74, %1, %cst_75 {dimension_numbers = #tpu.dot_dimension_numbers<[1], [0], [0], [1], [0, 0, 1, 1], [], []>} : vector<64x256xf32>, vector<256x3xf32>, vector<64x3xf32> -> vector<64x3xf32>
    %c10_76 = arith.constant 10 : index
    %c0_77 = arith.constant 0 : index
    %c0_78 = arith.constant 0 : index
    %76 = vector.load %arg3[%c10_76, %c0_77, %c0_78] : memref<16x3x8xf32, #tpu.memory_space<vmem>>, vector<1x3x8xf32>
    %77 = vector.shape_cast %76 : vector<1x3x8xf32> to vector<3x8xf32>
    %cst_79 = arith.constant dense<0.000000e+00> : vector<64x8xf32>
    %78 = tpu.matmul %75, %77, %cst_79 {dimension_numbers = #tpu.dot_dimension_numbers<[1], [0], [0], [1], [0, 0, 1, 1], [], []>} : vector<64x3xf32>, vector<3x8xf32>, vector<64x8xf32> -> vector<64x8xf32>
    %79 = arith.addf %72, %78 : vector<64x8xf32>
    %c11 = arith.constant 11 : index
    %c0_80 = arith.constant 0 : index
    %c0_81 = arith.constant 0 : index
    %80 = vector.load %arg2[%c11, %c0_80, %c0_81] : memref<16x64x256xf32, #tpu.memory_space<vmem>>, vector<1x64x256xf32>
    %81 = vector.shape_cast %80 : vector<1x64x256xf32> to vector<64x256xf32>
    %cst_82 = arith.constant dense<0.000000e+00> : vector<64x3xf32>
    %82 = tpu.matmul %81, %1, %cst_82 {dimension_numbers = #tpu.dot_dimension_numbers<[1], [0], [0], [1], [0, 0, 1, 1], [], []>} : vector<64x256xf32>, vector<256x3xf32>, vector<64x3xf32> -> vector<64x3xf32>
    %c11_83 = arith.constant 11 : index
    %c0_84 = arith.constant 0 : index
    %c0_85 = arith.constant 0 : index
    %83 = vector.load %arg3[%c11_83, %c0_84, %c0_85] : memref<16x3x8xf32, #tpu.memory_space<vmem>>, vector<1x3x8xf32>
    %84 = vector.shape_cast %83 : vector<1x3x8xf32> to vector<3x8xf32>
    %cst_86 = arith.constant dense<0.000000e+00> : vector<64x8xf32>
    %85 = tpu.matmul %82, %84, %cst_86 {dimension_numbers = #tpu.dot_dimension_numbers<[1], [0], [0], [1], [0, 0, 1, 1], [], []>} : vector<64x3xf32>, vector<3x8xf32>, vector<64x8xf32> -> vector<64x8xf32>
    %86 = arith.addf %79, %85 : vector<64x8xf32>
    %c12 = arith.constant 12 : index
    %c0_87 = arith.constant 0 : index
    %c0_88 = arith.constant 0 : index
    %87 = vector.load %arg2[%c12, %c0_87, %c0_88] : memref<16x64x256xf32, #tpu.memory_space<vmem>>, vector<1x64x256xf32>
    %88 = vector.shape_cast %87 : vector<1x64x256xf32> to vector<64x256xf32>
    %cst_89 = arith.constant dense<0.000000e+00> : vector<64x3xf32>
    %89 = tpu.matmul %88, %1, %cst_89 {dimension_numbers = #tpu.dot_dimension_numbers<[1], [0], [0], [1], [0, 0, 1, 1], [], []>} : vector<64x256xf32>, vector<256x3xf32>, vector<64x3xf32> -> vector<64x3xf32>
    %c12_90 = arith.constant 12 : index
    %c0_91 = arith.constant 0 : index
    %c0_92 = arith.constant 0 : index
    %90 = vector.load %arg3[%c12_90, %c0_91, %c0_92] : memref<16x3x8xf32, #tpu.memory_space<vmem>>, vector<1x3x8xf32>
    %91 = vector.shape_cast %90 : vector<1x3x8xf32> to vector<3x8xf32>
    %cst_93 = arith.constant dense<0.000000e+00> : vector<64x8xf32>
    %92 = tpu.matmul %89, %91, %cst_93 {dimension_numbers = #tpu.dot_dimension_numbers<[1], [0], [0], [1], [0, 0, 1, 1], [], []>} : vector<64x3xf32>, vector<3x8xf32>, vector<64x8xf32> -> vector<64x8xf32>
    %93 = arith.addf %86, %92 : vector<64x8xf32>
    %c13 = arith.constant 13 : index
    %c0_94 = arith.constant 0 : index
    %c0_95 = arith.constant 0 : index
    %94 = vector.load %arg2[%c13, %c0_94, %c0_95] : memref<16x64x256xf32, #tpu.memory_space<vmem>>, vector<1x64x256xf32>
    %95 = vector.shape_cast %94 : vector<1x64x256xf32> to vector<64x256xf32>
    %cst_96 = arith.constant dense<0.000000e+00> : vector<64x3xf32>
    %96 = tpu.matmul %95, %1, %cst_96 {dimension_numbers = #tpu.dot_dimension_numbers<[1], [0], [0], [1], [0, 0, 1, 1], [], []>} : vector<64x256xf32>, vector<256x3xf32>, vector<64x3xf32> -> vector<64x3xf32>
    %c13_97 = arith.constant 13 : index
    %c0_98 = arith.constant 0 : index
    %c0_99 = arith.constant 0 : index
    %97 = vector.load %arg3[%c13_97, %c0_98, %c0_99] : memref<16x3x8xf32, #tpu.memory_space<vmem>>, vector<1x3x8xf32>
    %98 = vector.shape_cast %97 : vector<1x3x8xf32> to vector<3x8xf32>
    %cst_100 = arith.constant dense<0.000000e+00> : vector<64x8xf32>
    %99 = tpu.matmul %96, %98, %cst_100 {dimension_numbers = #tpu.dot_dimension_numbers<[1], [0], [0], [1], [0, 0, 1, 1], [], []>} : vector<64x3xf32>, vector<3x8xf32>, vector<64x8xf32> -> vector<64x8xf32>
    %100 = arith.addf %93, %99 : vector<64x8xf32>
    %c14 = arith.constant 14 : index
    %c0_101 = arith.constant 0 : index
    %c0_102 = arith.constant 0 : index
    %101 = vector.load %arg2[%c14, %c0_101, %c0_102] : memref<16x64x256xf32, #tpu.memory_space<vmem>>, vector<1x64x256xf32>
    %102 = vector.shape_cast %101 : vector<1x64x256xf32> to vector<64x256xf32>
    %cst_103 = arith.constant dense<0.000000e+00> : vector<64x3xf32>
    %103 = tpu.matmul %102, %1, %cst_103 {dimension_numbers = #tpu.dot_dimension_numbers<[1], [0], [0], [1], [0, 0, 1, 1], [], []>} : vector<64x256xf32>, vector<256x3xf32>, vector<64x3xf32> -> vector<64x3xf32>
    %c14_104 = arith.constant 14 : index
    %c0_105 = arith.constant 0 : index
    %c0_106 = arith.constant 0 : index
    %104 = vector.load %arg3[%c14_104, %c0_105, %c0_106] : memref<16x3x8xf32, #tpu.memory_space<vmem>>, vector<1x3x8xf32>
    %105 = vector.shape_cast %104 : vector<1x3x8xf32> to vector<3x8xf32>
    %cst_107 = arith.constant dense<0.000000e+00> : vector<64x8xf32>
    %106 = tpu.matmul %103, %105, %cst_107 {dimension_numbers = #tpu.dot_dimension_numbers<[1], [0], [0], [1], [0, 0, 1, 1], [], []>} : vector<64x3xf32>, vector<3x8xf32>, vector<64x8xf32> -> vector<64x8xf32>
    %107 = arith.addf %100, %106 : vector<64x8xf32>
    %c15 = arith.constant 15 : index
    %c0_108 = arith.constant 0 : index
    %c0_109 = arith.constant 0 : index
    %108 = vector.load %arg2[%c15, %c0_108, %c0_109] : memref<16x64x256xf32, #tpu.memory_space<vmem>>, vector<1x64x256xf32>
    %109 = vector.shape_cast %108 : vector<1x64x256xf32> to vector<64x256xf32>
    %cst_110 = arith.constant dense<0.000000e+00> : vector<64x3xf32>
    %110 = tpu.matmul %109, %1, %cst_110 {dimension_numbers = #tpu.dot_dimension_numbers<[1], [0], [0], [1], [0, 0, 1, 1], [], []>} : vector<64x256xf32>, vector<256x3xf32>, vector<64x3xf32> -> vector<64x3xf32>
    %c15_111 = arith.constant 15 : index
    %c0_112 = arith.constant 0 : index
    %c0_113 = arith.constant 0 : index
    %111 = vector.load %arg3[%c15_111, %c0_112, %c0_113] : memref<16x3x8xf32, #tpu.memory_space<vmem>>, vector<1x3x8xf32>
    %112 = vector.shape_cast %111 : vector<1x3x8xf32> to vector<3x8xf32>
    %cst_114 = arith.constant dense<0.000000e+00> : vector<64x8xf32>
    %113 = tpu.matmul %110, %112, %cst_114 {dimension_numbers = #tpu.dot_dimension_numbers<[1], [0], [0], [1], [0, 0, 1, 1], [], []>} : vector<64x3xf32>, vector<3x8xf32>, vector<64x8xf32> -> vector<64x8xf32>
    %114 = arith.addf %107, %113 : vector<64x8xf32>
    %c0_115 = arith.constant 0 : index
    %c0_116 = arith.constant 0 : index
    %115 = vector.load %arg4[%c0_115, %c0_116] : memref<1x8xf32, #tpu.memory_space<vmem>>, vector<1x8xf32>
    %116 = vector.broadcast %115 : vector<1x8xf32> to vector<64x8xf32>
    %117 = arith.addf %114, %116 : vector<64x8xf32>
    %cst_117 = arith.constant 0.000000e+00 : f32
    %118 = vector.broadcast %cst_117 : f32 to vector<64x8xf32>
    %119 = arith.cmpf oge, %117, %118 : vector<64x8xf32>
    %cst_118 = arith.constant 2.000000e-01 : f32
    %120 = vector.broadcast %cst_118 : f32 to vector<64x8xf32>
    %121 = arith.mulf %120, %117 : vector<64x8xf32>
    %122 = arith.select %119, %117, %121 : vector<64x8xi1>, vector<64x8xf32>
    %cst_119 = arith.constant 0.000000e+00 : f32
    %123 = vector.broadcast %cst_119 : f32 to vector<16x16xf32>
    %c0_120 = arith.constant 0 : index
    %c0_121 = arith.constant 0 : index
    %c0_122 = arith.constant 0 : index
    %124 = vector.load %arg5[%c0_120, %c0_121, %c0_122] : memref<16x16x64xf32, #tpu.memory_space<vmem>>, vector<1x16x64xf32>
    %125 = vector.shape_cast %124 : vector<1x16x64xf32> to vector<16x64xf32>
    %cst_123 = arith.constant dense<0.000000e+00> : vector<16x8xf32>
    %126 = tpu.matmul %125, %122, %cst_123 {dimension_numbers = #tpu.dot_dimension_numbers<[1], [0], [0], [1], [0, 0, 1, 1], [], []>} : vector<16x64xf32>, vector<64x8xf32>, vector<16x8xf32> -> vector<16x8xf32>
    %c0_124 = arith.constant 0 : index
    %c0_125 = arith.constant 0 : index
    %c0_126 = arith.constant 0 : index
    %127 = vector.load %arg6[%c0_124, %c0_125, %c0_126] : memref<16x8x16xf32, #tpu.memory_space<vmem>>, vector<1x8x16xf32>
    %128 = vector.shape_cast %127 : vector<1x8x16xf32> to vector<8x16xf32>
    %cst_127 = arith.constant dense<0.000000e+00> : vector<16x16xf32>
    %129 = tpu.matmul %126, %128, %cst_127 {dimension_numbers = #tpu.dot_dimension_numbers<[1], [0], [0], [1], [0, 0, 1, 1], [], []>} : vector<16x8xf32>, vector<8x16xf32>, vector<16x16xf32> -> vector<16x16xf32>
    %130 = arith.addf %123, %129 : vector<16x16xf32>
    %c1_128 = arith.constant 1 : index
    %c0_129 = arith.constant 0 : index
    %c0_130 = arith.constant 0 : index
    %131 = vector.load %arg5[%c1_128, %c0_129, %c0_130] : memref<16x16x64xf32, #tpu.memory_space<vmem>>, vector<1x16x64xf32>
    %132 = vector.shape_cast %131 : vector<1x16x64xf32> to vector<16x64xf32>
    %cst_131 = arith.constant dense<0.000000e+00> : vector<16x8xf32>
    %133 = tpu.matmul %132, %122, %cst_131 {dimension_numbers = #tpu.dot_dimension_numbers<[1], [0], [0], [1], [0, 0, 1, 1], [], []>} : vector<16x64xf32>, vector<64x8xf32>, vector<16x8xf32> -> vector<16x8xf32>
    %c1_132 = arith.constant 1 : index
    %c0_133 = arith.constant 0 : index
    %c0_134 = arith.constant 0 : index
    %134 = vector.load %arg6[%c1_132, %c0_133, %c0_134] : memref<16x8x16xf32, #tpu.memory_space<vmem>>, vector<1x8x16xf32>
    %135 = vector.shape_cast %134 : vector<1x8x16xf32> to vector<8x16xf32>
    %cst_135 = arith.constant dense<0.000000e+00> : vector<16x16xf32>
    %136 = tpu.matmul %133, %135, %cst_135 {dimension_numbers = #tpu.dot_dimension_numbers<[1], [0], [0], [1], [0, 0, 1, 1], [], []>} : vector<16x8xf32>, vector<8x16xf32>, vector<16x16xf32> -> vector<16x16xf32>
    %137 = arith.addf %130, %136 : vector<16x16xf32>
    %c2_136 = arith.constant 2 : index
    %c0_137 = arith.constant 0 : index
    %c0_138 = arith.constant 0 : index
    %138 = vector.load %arg5[%c2_136, %c0_137, %c0_138] : memref<16x16x64xf32, #tpu.memory_space<vmem>>, vector<1x16x64xf32>
    %139 = vector.shape_cast %138 : vector<1x16x64xf32> to vector<16x64xf32>
    %cst_139 = arith.constant dense<0.000000e+00> : vector<16x8xf32>
    %140 = tpu.matmul %139, %122, %cst_139 {dimension_numbers = #tpu.dot_dimension_numbers<[1], [0], [0], [1], [0, 0, 1, 1], [], []>} : vector<16x64xf32>, vector<64x8xf32>, vector<16x8xf32> -> vector<16x8xf32>
    %c2_140 = arith.constant 2 : index
    %c0_141 = arith.constant 0 : index
    %c0_142 = arith.constant 0 : index
    %141 = vector.load %arg6[%c2_140, %c0_141, %c0_142] : memref<16x8x16xf32, #tpu.memory_space<vmem>>, vector<1x8x16xf32>
    %142 = vector.shape_cast %141 : vector<1x8x16xf32> to vector<8x16xf32>
    %cst_143 = arith.constant dense<0.000000e+00> : vector<16x16xf32>
    %143 = tpu.matmul %140, %142, %cst_143 {dimension_numbers = #tpu.dot_dimension_numbers<[1], [0], [0], [1], [0, 0, 1, 1], [], []>} : vector<16x8xf32>, vector<8x16xf32>, vector<16x16xf32> -> vector<16x16xf32>
    %144 = arith.addf %137, %143 : vector<16x16xf32>
    %c3_144 = arith.constant 3 : index
    %c0_145 = arith.constant 0 : index
    %c0_146 = arith.constant 0 : index
    %145 = vector.load %arg5[%c3_144, %c0_145, %c0_146] : memref<16x16x64xf32, #tpu.memory_space<vmem>>, vector<1x16x64xf32>
    %146 = vector.shape_cast %145 : vector<1x16x64xf32> to vector<16x64xf32>
    %cst_147 = arith.constant dense<0.000000e+00> : vector<16x8xf32>
    %147 = tpu.matmul %146, %122, %cst_147 {dimension_numbers = #tpu.dot_dimension_numbers<[1], [0], [0], [1], [0, 0, 1, 1], [], []>} : vector<16x64xf32>, vector<64x8xf32>, vector<16x8xf32> -> vector<16x8xf32>
    %c3_148 = arith.constant 3 : index
    %c0_149 = arith.constant 0 : index
    %c0_150 = arith.constant 0 : index
    %148 = vector.load %arg6[%c3_148, %c0_149, %c0_150] : memref<16x8x16xf32, #tpu.memory_space<vmem>>, vector<1x8x16xf32>
    %149 = vector.shape_cast %148 : vector<1x8x16xf32> to vector<8x16xf32>
    %cst_151 = arith.constant dense<0.000000e+00> : vector<16x16xf32>
    %150 = tpu.matmul %147, %149, %cst_151 {dimension_numbers = #tpu.dot_dimension_numbers<[1], [0], [0], [1], [0, 0, 1, 1], [], []>} : vector<16x8xf32>, vector<8x16xf32>, vector<16x16xf32> -> vector<16x16xf32>
    %151 = arith.addf %144, %150 : vector<16x16xf32>
    %c4_152 = arith.constant 4 : index
    %c0_153 = arith.constant 0 : index
    %c0_154 = arith.constant 0 : index
    %152 = vector.load %arg5[%c4_152, %c0_153, %c0_154] : memref<16x16x64xf32, #tpu.memory_space<vmem>>, vector<1x16x64xf32>
    %153 = vector.shape_cast %152 : vector<1x16x64xf32> to vector<16x64xf32>
    %cst_155 = arith.constant dense<0.000000e+00> : vector<16x8xf32>
    %154 = tpu.matmul %153, %122, %cst_155 {dimension_numbers = #tpu.dot_dimension_numbers<[1], [0], [0], [1], [0, 0, 1, 1], [], []>} : vector<16x64xf32>, vector<64x8xf32>, vector<16x8xf32> -> vector<16x8xf32>
    %c4_156 = arith.constant 4 : index
    %c0_157 = arith.constant 0 : index
    %c0_158 = arith.constant 0 : index
    %155 = vector.load %arg6[%c4_156, %c0_157, %c0_158] : memref<16x8x16xf32, #tpu.memory_space<vmem>>, vector<1x8x16xf32>
    %156 = vector.shape_cast %155 : vector<1x8x16xf32> to vector<8x16xf32>
    %cst_159 = arith.constant dense<0.000000e+00> : vector<16x16xf32>
    %157 = tpu.matmul %154, %156, %cst_159 {dimension_numbers = #tpu.dot_dimension_numbers<[1], [0], [0], [1], [0, 0, 1, 1], [], []>} : vector<16x8xf32>, vector<8x16xf32>, vector<16x16xf32> -> vector<16x16xf32>
    %158 = arith.addf %151, %157 : vector<16x16xf32>
    %c5_160 = arith.constant 5 : index
    %c0_161 = arith.constant 0 : index
    %c0_162 = arith.constant 0 : index
    %159 = vector.load %arg5[%c5_160, %c0_161, %c0_162] : memref<16x16x64xf32, #tpu.memory_space<vmem>>, vector<1x16x64xf32>
    %160 = vector.shape_cast %159 : vector<1x16x64xf32> to vector<16x64xf32>
    %cst_163 = arith.constant dense<0.000000e+00> : vector<16x8xf32>
    %161 = tpu.matmul %160, %122, %cst_163 {dimension_numbers = #tpu.dot_dimension_numbers<[1], [0], [0], [1], [0, 0, 1, 1], [], []>} : vector<16x64xf32>, vector<64x8xf32>, vector<16x8xf32> -> vector<16x8xf32>
    %c5_164 = arith.constant 5 : index
    %c0_165 = arith.constant 0 : index
    %c0_166 = arith.constant 0 : index
    %162 = vector.load %arg6[%c5_164, %c0_165, %c0_166] : memref<16x8x16xf32, #tpu.memory_space<vmem>>, vector<1x8x16xf32>
    %163 = vector.shape_cast %162 : vector<1x8x16xf32> to vector<8x16xf32>
    %cst_167 = arith.constant dense<0.000000e+00> : vector<16x16xf32>
    %164 = tpu.matmul %161, %163, %cst_167 {dimension_numbers = #tpu.dot_dimension_numbers<[1], [0], [0], [1], [0, 0, 1, 1], [], []>} : vector<16x8xf32>, vector<8x16xf32>, vector<16x16xf32> -> vector<16x16xf32>
    %165 = arith.addf %158, %164 : vector<16x16xf32>
    %c6_168 = arith.constant 6 : index
    %c0_169 = arith.constant 0 : index
    %c0_170 = arith.constant 0 : index
    %166 = vector.load %arg5[%c6_168, %c0_169, %c0_170] : memref<16x16x64xf32, #tpu.memory_space<vmem>>, vector<1x16x64xf32>
    %167 = vector.shape_cast %166 : vector<1x16x64xf32> to vector<16x64xf32>
    %cst_171 = arith.constant dense<0.000000e+00> : vector<16x8xf32>
    %168 = tpu.matmul %167, %122, %cst_171 {dimension_numbers = #tpu.dot_dimension_numbers<[1], [0], [0], [1], [0, 0, 1, 1], [], []>} : vector<16x64xf32>, vector<64x8xf32>, vector<16x8xf32> -> vector<16x8xf32>
    %c6_172 = arith.constant 6 : index
    %c0_173 = arith.constant 0 : index
    %c0_174 = arith.constant 0 : index
    %169 = vector.load %arg6[%c6_172, %c0_173, %c0_174] : memref<16x8x16xf32, #tpu.memory_space<vmem>>, vector<1x8x16xf32>
    %170 = vector.shape_cast %169 : vector<1x8x16xf32> to vector<8x16xf32>
    %cst_175 = arith.constant dense<0.000000e+00> : vector<16x16xf32>
    %171 = tpu.matmul %168, %170, %cst_175 {dimension_numbers = #tpu.dot_dimension_numbers<[1], [0], [0], [1], [0, 0, 1, 1], [], []>} : vector<16x8xf32>, vector<8x16xf32>, vector<16x16xf32> -> vector<16x16xf32>
    %172 = arith.addf %165, %171 : vector<16x16xf32>
    %c7_176 = arith.constant 7 : index
    %c0_177 = arith.constant 0 : index
    %c0_178 = arith.constant 0 : index
    %173 = vector.load %arg5[%c7_176, %c0_177, %c0_178] : memref<16x16x64xf32, #tpu.memory_space<vmem>>, vector<1x16x64xf32>
    %174 = vector.shape_cast %173 : vector<1x16x64xf32> to vector<16x64xf32>
    %cst_179 = arith.constant dense<0.000000e+00> : vector<16x8xf32>
    %175 = tpu.matmul %174, %122, %cst_179 {dimension_numbers = #tpu.dot_dimension_numbers<[1], [0], [0], [1], [0, 0, 1, 1], [], []>} : vector<16x64xf32>, vector<64x8xf32>, vector<16x8xf32> -> vector<16x8xf32>
    %c7_180 = arith.constant 7 : index
    %c0_181 = arith.constant 0 : index
    %c0_182 = arith.constant 0 : index
    %176 = vector.load %arg6[%c7_180, %c0_181, %c0_182] : memref<16x8x16xf32, #tpu.memory_space<vmem>>, vector<1x8x16xf32>
    %177 = vector.shape_cast %176 : vector<1x8x16xf32> to vector<8x16xf32>
    %cst_183 = arith.constant dense<0.000000e+00> : vector<16x16xf32>
    %178 = tpu.matmul %175, %177, %cst_183 {dimension_numbers = #tpu.dot_dimension_numbers<[1], [0], [0], [1], [0, 0, 1, 1], [], []>} : vector<16x8xf32>, vector<8x16xf32>, vector<16x16xf32> -> vector<16x16xf32>
    %179 = arith.addf %172, %178 : vector<16x16xf32>
    %c8_184 = arith.constant 8 : index
    %c0_185 = arith.constant 0 : index
    %c0_186 = arith.constant 0 : index
    %180 = vector.load %arg5[%c8_184, %c0_185, %c0_186] : memref<16x16x64xf32, #tpu.memory_space<vmem>>, vector<1x16x64xf32>
    %181 = vector.shape_cast %180 : vector<1x16x64xf32> to vector<16x64xf32>
    %cst_187 = arith.constant dense<0.000000e+00> : vector<16x8xf32>
    %182 = tpu.matmul %181, %122, %cst_187 {dimension_numbers = #tpu.dot_dimension_numbers<[1], [0], [0], [1], [0, 0, 1, 1], [], []>} : vector<16x64xf32>, vector<64x8xf32>, vector<16x8xf32> -> vector<16x8xf32>
    %c8_188 = arith.constant 8 : index
    %c0_189 = arith.constant 0 : index
    %c0_190 = arith.constant 0 : index
    %183 = vector.load %arg6[%c8_188, %c0_189, %c0_190] : memref<16x8x16xf32, #tpu.memory_space<vmem>>, vector<1x8x16xf32>
    %184 = vector.shape_cast %183 : vector<1x8x16xf32> to vector<8x16xf32>
    %cst_191 = arith.constant dense<0.000000e+00> : vector<16x16xf32>
    %185 = tpu.matmul %182, %184, %cst_191 {dimension_numbers = #tpu.dot_dimension_numbers<[1], [0], [0], [1], [0, 0, 1, 1], [], []>} : vector<16x8xf32>, vector<8x16xf32>, vector<16x16xf32> -> vector<16x16xf32>
    %186 = arith.addf %179, %185 : vector<16x16xf32>
    %c9_192 = arith.constant 9 : index
    %c0_193 = arith.constant 0 : index
    %c0_194 = arith.constant 0 : index
    %187 = vector.load %arg5[%c9_192, %c0_193, %c0_194] : memref<16x16x64xf32, #tpu.memory_space<vmem>>, vector<1x16x64xf32>
    %188 = vector.shape_cast %187 : vector<1x16x64xf32> to vector<16x64xf32>
    %cst_195 = arith.constant dense<0.000000e+00> : vector<16x8xf32>
    %189 = tpu.matmul %188, %122, %cst_195 {dimension_numbers = #tpu.dot_dimension_numbers<[1], [0], [0], [1], [0, 0, 1, 1], [], []>} : vector<16x64xf32>, vector<64x8xf32>, vector<16x8xf32> -> vector<16x8xf32>
    %c9_196 = arith.constant 9 : index
    %c0_197 = arith.constant 0 : index
    %c0_198 = arith.constant 0 : index
    %190 = vector.load %arg6[%c9_196, %c0_197, %c0_198] : memref<16x8x16xf32, #tpu.memory_space<vmem>>, vector<1x8x16xf32>
    %191 = vector.shape_cast %190 : vector<1x8x16xf32> to vector<8x16xf32>
    %cst_199 = arith.constant dense<0.000000e+00> : vector<16x16xf32>
    %192 = tpu.matmul %189, %191, %cst_199 {dimension_numbers = #tpu.dot_dimension_numbers<[1], [0], [0], [1], [0, 0, 1, 1], [], []>} : vector<16x8xf32>, vector<8x16xf32>, vector<16x16xf32> -> vector<16x16xf32>
    %193 = arith.addf %186, %192 : vector<16x16xf32>
    %c10_200 = arith.constant 10 : index
    %c0_201 = arith.constant 0 : index
    %c0_202 = arith.constant 0 : index
    %194 = vector.load %arg5[%c10_200, %c0_201, %c0_202] : memref<16x16x64xf32, #tpu.memory_space<vmem>>, vector<1x16x64xf32>
    %195 = vector.shape_cast %194 : vector<1x16x64xf32> to vector<16x64xf32>
    %cst_203 = arith.constant dense<0.000000e+00> : vector<16x8xf32>
    %196 = tpu.matmul %195, %122, %cst_203 {dimension_numbers = #tpu.dot_dimension_numbers<[1], [0], [0], [1], [0, 0, 1, 1], [], []>} : vector<16x64xf32>, vector<64x8xf32>, vector<16x8xf32> -> vector<16x8xf32>
    %c10_204 = arith.constant 10 : index
    %c0_205 = arith.constant 0 : index
    %c0_206 = arith.constant 0 : index
    %197 = vector.load %arg6[%c10_204, %c0_205, %c0_206] : memref<16x8x16xf32, #tpu.memory_space<vmem>>, vector<1x8x16xf32>
    %198 = vector.shape_cast %197 : vector<1x8x16xf32> to vector<8x16xf32>
    %cst_207 = arith.constant dense<0.000000e+00> : vector<16x16xf32>
    %199 = tpu.matmul %196, %198, %cst_207 {dimension_numbers = #tpu.dot_dimension_numbers<[1], [0], [0], [1], [0, 0, 1, 1], [], []>} : vector<16x8xf32>, vector<8x16xf32>, vector<16x16xf32> -> vector<16x16xf32>
    %200 = arith.addf %193, %199 : vector<16x16xf32>
    %c11_208 = arith.constant 11 : index
    %c0_209 = arith.constant 0 : index
    %c0_210 = arith.constant 0 : index
    %201 = vector.load %arg5[%c11_208, %c0_209, %c0_210] : memref<16x16x64xf32, #tpu.memory_space<vmem>>, vector<1x16x64xf32>
    %202 = vector.shape_cast %201 : vector<1x16x64xf32> to vector<16x64xf32>
    %cst_211 = arith.constant dense<0.000000e+00> : vector<16x8xf32>
    %203 = tpu.matmul %202, %122, %cst_211 {dimension_numbers = #tpu.dot_dimension_numbers<[1], [0], [0], [1], [0, 0, 1, 1], [], []>} : vector<16x64xf32>, vector<64x8xf32>, vector<16x8xf32> -> vector<16x8xf32>
    %c11_212 = arith.constant 11 : index
    %c0_213 = arith.constant 0 : index
    %c0_214 = arith.constant 0 : index
    %204 = vector.load %arg6[%c11_212, %c0_213, %c0_214] : memref<16x8x16xf32, #tpu.memory_space<vmem>>, vector<1x8x16xf32>
    %205 = vector.shape_cast %204 : vector<1x8x16xf32> to vector<8x16xf32>
    %cst_215 = arith.constant dense<0.000000e+00> : vector<16x16xf32>
    %206 = tpu.matmul %203, %205, %cst_215 {dimension_numbers = #tpu.dot_dimension_numbers<[1], [0], [0], [1], [0, 0, 1, 1], [], []>} : vector<16x8xf32>, vector<8x16xf32>, vector<16x16xf32> -> vector<16x16xf32>
    %207 = arith.addf %200, %206 : vector<16x16xf32>
    %c12_216 = arith.constant 12 : index
    %c0_217 = arith.constant 0 : index
    %c0_218 = arith.constant 0 : index
    %208 = vector.load %arg5[%c12_216, %c0_217, %c0_218] : memref<16x16x64xf32, #tpu.memory_space<vmem>>, vector<1x16x64xf32>
    %209 = vector.shape_cast %208 : vector<1x16x64xf32> to vector<16x64xf32>
    %cst_219 = arith.constant dense<0.000000e+00> : vector<16x8xf32>
    %210 = tpu.matmul %209, %122, %cst_219 {dimension_numbers = #tpu.dot_dimension_numbers<[1], [0], [0], [1], [0, 0, 1, 1], [], []>} : vector<16x64xf32>, vector<64x8xf32>, vector<16x8xf32> -> vector<16x8xf32>
    %c12_220 = arith.constant 12 : index
    %c0_221 = arith.constant 0 : index
    %c0_222 = arith.constant 0 : index
    %211 = vector.load %arg6[%c12_220, %c0_221, %c0_222] : memref<16x8x16xf32, #tpu.memory_space<vmem>>, vector<1x8x16xf32>
    %212 = vector.shape_cast %211 : vector<1x8x16xf32> to vector<8x16xf32>
    %cst_223 = arith.constant dense<0.000000e+00> : vector<16x16xf32>
    %213 = tpu.matmul %210, %212, %cst_223 {dimension_numbers = #tpu.dot_dimension_numbers<[1], [0], [0], [1], [0, 0, 1, 1], [], []>} : vector<16x8xf32>, vector<8x16xf32>, vector<16x16xf32> -> vector<16x16xf32>
    %214 = arith.addf %207, %213 : vector<16x16xf32>
    %c13_224 = arith.constant 13 : index
    %c0_225 = arith.constant 0 : index
    %c0_226 = arith.constant 0 : index
    %215 = vector.load %arg5[%c13_224, %c0_225, %c0_226] : memref<16x16x64xf32, #tpu.memory_space<vmem>>, vector<1x16x64xf32>
    %216 = vector.shape_cast %215 : vector<1x16x64xf32> to vector<16x64xf32>
    %cst_227 = arith.constant dense<0.000000e+00> : vector<16x8xf32>
    %217 = tpu.matmul %216, %122, %cst_227 {dimension_numbers = #tpu.dot_dimension_numbers<[1], [0], [0], [1], [0, 0, 1, 1], [], []>} : vector<16x64xf32>, vector<64x8xf32>, vector<16x8xf32> -> vector<16x8xf32>
    %c13_228 = arith.constant 13 : index
    %c0_229 = arith.constant 0 : index
    %c0_230 = arith.constant 0 : index
    %218 = vector.load %arg6[%c13_228, %c0_229, %c0_230] : memref<16x8x16xf32, #tpu.memory_space<vmem>>, vector<1x8x16xf32>
    %219 = vector.shape_cast %218 : vector<1x8x16xf32> to vector<8x16xf32>
    %cst_231 = arith.constant dense<0.000000e+00> : vector<16x16xf32>
    %220 = tpu.matmul %217, %219, %cst_231 {dimension_numbers = #tpu.dot_dimension_numbers<[1], [0], [0], [1], [0, 0, 1, 1], [], []>} : vector<16x8xf32>, vector<8x16xf32>, vector<16x16xf32> -> vector<16x16xf32>
    %221 = arith.addf %214, %220 : vector<16x16xf32>
    %c14_232 = arith.constant 14 : index
    %c0_233 = arith.constant 0 : index
    %c0_234 = arith.constant 0 : index
    %222 = vector.load %arg5[%c14_232, %c0_233, %c0_234] : memref<16x16x64xf32, #tpu.memory_space<vmem>>, vector<1x16x64xf32>
    %223 = vector.shape_cast %222 : vector<1x16x64xf32> to vector<16x64xf32>
    %cst_235 = arith.constant dense<0.000000e+00> : vector<16x8xf32>
    %224 = tpu.matmul %223, %122, %cst_235 {dimension_numbers = #tpu.dot_dimension_numbers<[1], [0], [0], [1], [0, 0, 1, 1], [], []>} : vector<16x64xf32>, vector<64x8xf32>, vector<16x8xf32> -> vector<16x8xf32>
    %c14_236 = arith.constant 14 : index
    %c0_237 = arith.constant 0 : index
    %c0_238 = arith.constant 0 : index
    %225 = vector.load %arg6[%c14_236, %c0_237, %c0_238] : memref<16x8x16xf32, #tpu.memory_space<vmem>>, vector<1x8x16xf32>
    %226 = vector.shape_cast %225 : vector<1x8x16xf32> to vector<8x16xf32>
    %cst_239 = arith.constant dense<0.000000e+00> : vector<16x16xf32>
    %227 = tpu.matmul %224, %226, %cst_239 {dimension_numbers = #tpu.dot_dimension_numbers<[1], [0], [0], [1], [0, 0, 1, 1], [], []>} : vector<16x8xf32>, vector<8x16xf32>, vector<16x16xf32> -> vector<16x16xf32>
    %228 = arith.addf %221, %227 : vector<16x16xf32>
    %c15_240 = arith.constant 15 : index
    %c0_241 = arith.constant 0 : index
    %c0_242 = arith.constant 0 : index
    %229 = vector.load %arg5[%c15_240, %c0_241, %c0_242] : memref<16x16x64xf32, #tpu.memory_space<vmem>>, vector<1x16x64xf32>
    %230 = vector.shape_cast %229 : vector<1x16x64xf32> to vector<16x64xf32>
    %cst_243 = arith.constant dense<0.000000e+00> : vector<16x8xf32>
    %231 = tpu.matmul %230, %122, %cst_243 {dimension_numbers = #tpu.dot_dimension_numbers<[1], [0], [0], [1], [0, 0, 1, 1], [], []>} : vector<16x64xf32>, vector<64x8xf32>, vector<16x8xf32> -> vector<16x8xf32>
    %c15_244 = arith.constant 15 : index
    %c0_245 = arith.constant 0 : index
    %c0_246 = arith.constant 0 : index
    %232 = vector.load %arg6[%c15_244, %c0_245, %c0_246] : memref<16x8x16xf32, #tpu.memory_space<vmem>>, vector<1x8x16xf32>
    %233 = vector.shape_cast %232 : vector<1x8x16xf32> to vector<8x16xf32>
    %cst_247 = arith.constant dense<0.000000e+00> : vector<16x16xf32>
    %234 = tpu.matmul %231, %233, %cst_247 {dimension_numbers = #tpu.dot_dimension_numbers<[1], [0], [0], [1], [0, 0, 1, 1], [], []>} : vector<16x8xf32>, vector<8x16xf32>, vector<16x16xf32> -> vector<16x16xf32>
    %235 = arith.addf %228, %234 : vector<16x16xf32>
    %c0_248 = arith.constant 0 : index
    %c0_249 = arith.constant 0 : index
    %236 = vector.load %arg7[%c0_248, %c0_249] : memref<1x16xf32, #tpu.memory_space<vmem>>, vector<1x16xf32>
    %237 = vector.broadcast %236 : vector<1x16xf32> to vector<16x16xf32>
    %238 = arith.addf %235, %237 : vector<16x16xf32>
    %cst_250 = arith.constant 0.000000e+00 : f32
    %239 = vector.broadcast %cst_250 : f32 to vector<16x16xf32>
    %240 = arith.cmpf oge, %238, %239 : vector<16x16xf32>
    %cst_251 = arith.constant 2.000000e-01 : f32
    %241 = vector.broadcast %cst_251 : f32 to vector<16x16xf32>
    %242 = arith.mulf %241, %238 : vector<16x16xf32>
    %243 = arith.select %240, %238, %242 : vector<16x16xi1>, vector<16x16xf32>
    %cst_252 = arith.constant 0.000000e+00 : f32
    %244 = vector.broadcast %cst_252 : f32 to vector<9x32xf32>
    %c0_253 = arith.constant 0 : index
    %c0_254 = arith.constant 0 : index
    %c0_255 = arith.constant 0 : index
    %245 = vector.load %arg8[%c0_253, %c0_254, %c0_255] : memref<16x9x16xf32, #tpu.memory_space<vmem>>, vector<1x9x16xf32>
    %246 = vector.shape_cast %245 : vector<1x9x16xf32> to vector<9x16xf32>
    %cst_256 = arith.constant dense<0.000000e+00> : vector<9x16xf32>
    %247 = tpu.matmul %246, %243, %cst_256 {dimension_numbers = #tpu.dot_dimension_numbers<[1], [0], [0], [1], [0, 0, 1, 1], [], []>} : vector<9x16xf32>, vector<16x16xf32>, vector<9x16xf32> -> vector<9x16xf32>
    %c0_257 = arith.constant 0 : index
    %c0_258 = arith.constant 0 : index
    %c0_259 = arith.constant 0 : index
    %248 = vector.load %arg9[%c0_257, %c0_258, %c0_259] : memref<16x16x32xf32, #tpu.memory_space<vmem>>, vector<1x16x32xf32>
    %249 = vector.shape_cast %248 : vector<1x16x32xf32> to vector<16x32xf32>
    %cst_260 = arith.constant dense<0.000000e+00> : vector<9x32xf32>
    %250 = tpu.matmul %247, %249, %cst_260 {dimension_numbers = #tpu.dot_dimension_numbers<[1], [0], [0], [1], [0, 0, 1, 1], [], []>} : vector<9x16xf32>, vector<16x32xf32>, vector<9x32xf32> -> vector<9x32xf32>
    %251 = arith.addf %244, %250 : vector<9x32xf32>
    %c1_261 = arith.constant 1 : index
    %c0_262 = arith.constant 0 : index
    %c0_263 = arith.constant 0 : index
    %252 = vector.load %arg8[%c1_261, %c0_262, %c0_263] : memref<16x9x16xf32, #tpu.memory_space<vmem>>, vector<1x9x16xf32>
    %253 = vector.shape_cast %252 : vector<1x9x16xf32> to vector<9x16xf32>
    %cst_264 = arith.constant dense<0.000000e+00> : vector<9x16xf32>
    %254 = tpu.matmul %253, %243, %cst_264 {dimension_numbers = #tpu.dot_dimension_numbers<[1], [0], [0], [1], [0, 0, 1, 1], [], []>} : vector<9x16xf32>, vector<16x16xf32>, vector<9x16xf32> -> vector<9x16xf32>
    %c1_265 = arith.constant 1 : index
    %c0_266 = arith.constant 0 : index
    %c0_267 = arith.constant 0 : index
    %255 = vector.load %arg9[%c1_265, %c0_266, %c0_267] : memref<16x16x32xf32, #tpu.memory_space<vmem>>, vector<1x16x32xf32>
    %256 = vector.shape_cast %255 : vector<1x16x32xf32> to vector<16x32xf32>
    %cst_268 = arith.constant dense<0.000000e+00> : vector<9x32xf32>
    %257 = tpu.matmul %254, %256, %cst_268 {dimension_numbers = #tpu.dot_dimension_numbers<[1], [0], [0], [1], [0, 0, 1, 1], [], []>} : vector<9x16xf32>, vector<16x32xf32>, vector<9x32xf32> -> vector<9x32xf32>
    %258 = arith.addf %251, %257 : vector<9x32xf32>
    %c2_269 = arith.constant 2 : index
    %c0_270 = arith.constant 0 : index
    %c0_271 = arith.constant 0 : index
    %259 = vector.load %arg8[%c2_269, %c0_270, %c0_271] : memref<16x9x16xf32, #tpu.memory_space<vmem>>, vector<1x9x16xf32>
    %260 = vector.shape_cast %259 : vector<1x9x16xf32> to vector<9x16xf32>
    %cst_272 = arith.constant dense<0.000000e+00> : vector<9x16xf32>
    %261 = tpu.matmul %260, %243, %cst_272 {dimension_numbers = #tpu.dot_dimension_numbers<[1], [0], [0], [1], [0, 0, 1, 1], [], []>} : vector<9x16xf32>, vector<16x16xf32>, vector<9x16xf32> -> vector<9x16xf32>
    %c2_273 = arith.constant 2 : index
    %c0_274 = arith.constant 0 : index
    %c0_275 = arith.constant 0 : index
    %262 = vector.load %arg9[%c2_273, %c0_274, %c0_275] : memref<16x16x32xf32, #tpu.memory_space<vmem>>, vector<1x16x32xf32>
    %263 = vector.shape_cast %262 : vector<1x16x32xf32> to vector<16x32xf32>
    %cst_276 = arith.constant dense<0.000000e+00> : vector<9x32xf32>
    %264 = tpu.matmul %261, %263, %cst_276 {dimension_numbers = #tpu.dot_dimension_numbers<[1], [0], [0], [1], [0, 0, 1, 1], [], []>} : vector<9x16xf32>, vector<16x32xf32>, vector<9x32xf32> -> vector<9x32xf32>
    %265 = arith.addf %258, %264 : vector<9x32xf32>
    %c3_277 = arith.constant 3 : index
    %c0_278 = arith.constant 0 : index
    %c0_279 = arith.constant 0 : index
    %266 = vector.load %arg8[%c3_277, %c0_278, %c0_279] : memref<16x9x16xf32, #tpu.memory_space<vmem>>, vector<1x9x16xf32>
    %267 = vector.shape_cast %266 : vector<1x9x16xf32> to vector<9x16xf32>
    %cst_280 = arith.constant dense<0.000000e+00> : vector<9x16xf32>
    %268 = tpu.matmul %267, %243, %cst_280 {dimension_numbers = #tpu.dot_dimension_numbers<[1], [0], [0], [1], [0, 0, 1, 1], [], []>} : vector<9x16xf32>, vector<16x16xf32>, vector<9x16xf32> -> vector<9x16xf32>
    %c3_281 = arith.constant 3 : index
    %c0_282 = arith.constant 0 : index
    %c0_283 = arith.constant 0 : index
    %269 = vector.load %arg9[%c3_281, %c0_282, %c0_283] : memref<16x16x32xf32, #tpu.memory_space<vmem>>, vector<1x16x32xf32>
    %270 = vector.shape_cast %269 : vector<1x16x32xf32> to vector<16x32xf32>
    %cst_284 = arith.constant dense<0.000000e+00> : vector<9x32xf32>
    %271 = tpu.matmul %268, %270, %cst_284 {dimension_numbers = #tpu.dot_dimension_numbers<[1], [0], [0], [1], [0, 0, 1, 1], [], []>} : vector<9x16xf32>, vector<16x32xf32>, vector<9x32xf32> -> vector<9x32xf32>
    %272 = arith.addf %265, %271 : vector<9x32xf32>
    %c4_285 = arith.constant 4 : index
    %c0_286 = arith.constant 0 : index
    %c0_287 = arith.constant 0 : index
    %273 = vector.load %arg8[%c4_285, %c0_286, %c0_287] : memref<16x9x16xf32, #tpu.memory_space<vmem>>, vector<1x9x16xf32>
    %274 = vector.shape_cast %273 : vector<1x9x16xf32> to vector<9x16xf32>
    %cst_288 = arith.constant dense<0.000000e+00> : vector<9x16xf32>
    %275 = tpu.matmul %274, %243, %cst_288 {dimension_numbers = #tpu.dot_dimension_numbers<[1], [0], [0], [1], [0, 0, 1, 1], [], []>} : vector<9x16xf32>, vector<16x16xf32>, vector<9x16xf32> -> vector<9x16xf32>
    %c4_289 = arith.constant 4 : index
    %c0_290 = arith.constant 0 : index
    %c0_291 = arith.constant 0 : index
    %276 = vector.load %arg9[%c4_289, %c0_290, %c0_291] : memref<16x16x32xf32, #tpu.memory_space<vmem>>, vector<1x16x32xf32>
    %277 = vector.shape_cast %276 : vector<1x16x32xf32> to vector<16x32xf32>
    %cst_292 = arith.constant dense<0.000000e+00> : vector<9x32xf32>
    %278 = tpu.matmul %275, %277, %cst_292 {dimension_numbers = #tpu.dot_dimension_numbers<[1], [0], [0], [1], [0, 0, 1, 1], [], []>} : vector<9x16xf32>, vector<16x32xf32>, vector<9x32xf32> -> vector<9x32xf32>
    %279 = arith.addf %272, %278 : vector<9x32xf32>
    %c5_293 = arith.constant 5 : index
    %c0_294 = arith.constant 0 : index
    %c0_295 = arith.constant 0 : index
    %280 = vector.load %arg8[%c5_293, %c0_294, %c0_295] : memref<16x9x16xf32, #tpu.memory_space<vmem>>, vector<1x9x16xf32>
    %281 = vector.shape_cast %280 : vector<1x9x16xf32> to vector<9x16xf32>
    %cst_296 = arith.constant dense<0.000000e+00> : vector<9x16xf32>
    %282 = tpu.matmul %281, %243, %cst_296 {dimension_numbers = #tpu.dot_dimension_numbers<[1], [0], [0], [1], [0, 0, 1, 1], [], []>} : vector<9x16xf32>, vector<16x16xf32>, vector<9x16xf32> -> vector<9x16xf32>
    %c5_297 = arith.constant 5 : index
    %c0_298 = arith.constant 0 : index
    %c0_299 = arith.constant 0 : index
    %283 = vector.load %arg9[%c5_297, %c0_298, %c0_299] : memref<16x16x32xf32, #tpu.memory_space<vmem>>, vector<1x16x32xf32>
    %284 = vector.shape_cast %283 : vector<1x16x32xf32> to vector<16x32xf32>
    %cst_300 = arith.constant dense<0.000000e+00> : vector<9x32xf32>
    %285 = tpu.matmul %282, %284, %cst_300 {dimension_numbers = #tpu.dot_dimension_numbers<[1], [0], [0], [1], [0, 0, 1, 1], [], []>} : vector<9x16xf32>, vector<16x32xf32>, vector<9x32xf32> -> vector<9x32xf32>
    %286 = arith.addf %279, %285 : vector<9x32xf32>
    %c6_301 = arith.constant 6 : index
    %c0_302 = arith.constant 0 : index
    %c0_303 = arith.constant 0 : index
    %287 = vector.load %arg8[%c6_301, %c0_302, %c0_303] : memref<16x9x16xf32, #tpu.memory_space<vmem>>, vector<1x9x16xf32>
    %288 = vector.shape_cast %287 : vector<1x9x16xf32> to vector<9x16xf32>
    %cst_304 = arith.constant dense<0.000000e+00> : vector<9x16xf32>
    %289 = tpu.matmul %288, %243, %cst_304 {dimension_numbers = #tpu.dot_dimension_numbers<[1], [0], [0], [1], [0, 0, 1, 1], [], []>} : vector<9x16xf32>, vector<16x16xf32>, vector<9x16xf32> -> vector<9x16xf32>
    %c6_305 = arith.constant 6 : index
    %c0_306 = arith.constant 0 : index
    %c0_307 = arith.constant 0 : index
    %290 = vector.load %arg9[%c6_305, %c0_306, %c0_307] : memref<16x16x32xf32, #tpu.memory_space<vmem>>, vector<1x16x32xf32>
    %291 = vector.shape_cast %290 : vector<1x16x32xf32> to vector<16x32xf32>
    %cst_308 = arith.constant dense<0.000000e+00> : vector<9x32xf32>
    %292 = tpu.matmul %289, %291, %cst_308 {dimension_numbers = #tpu.dot_dimension_numbers<[1], [0], [0], [1], [0, 0, 1, 1], [], []>} : vector<9x16xf32>, vector<16x32xf32>, vector<9x32xf32> -> vector<9x32xf32>
    %293 = arith.addf %286, %292 : vector<9x32xf32>
    %c7_309 = arith.constant 7 : index
    %c0_310 = arith.constant 0 : index
    %c0_311 = arith.constant 0 : index
    %294 = vector.load %arg8[%c7_309, %c0_310, %c0_311] : memref<16x9x16xf32, #tpu.memory_space<vmem>>, vector<1x9x16xf32>
    %295 = vector.shape_cast %294 : vector<1x9x16xf32> to vector<9x16xf32>
    %cst_312 = arith.constant dense<0.000000e+00> : vector<9x16xf32>
    %296 = tpu.matmul %295, %243, %cst_312 {dimension_numbers = #tpu.dot_dimension_numbers<[1], [0], [0], [1], [0, 0, 1, 1], [], []>} : vector<9x16xf32>, vector<16x16xf32>, vector<9x16xf32> -> vector<9x16xf32>
    %c7_313 = arith.constant 7 : index
    %c0_314 = arith.constant 0 : index
    %c0_315 = arith.constant 0 : index
    %297 = vector.load %arg9[%c7_313, %c0_314, %c0_315] : memref<16x16x32xf32, #tpu.memory_space<vmem>>, vector<1x16x32xf32>
    %298 = vector.shape_cast %297 : vector<1x16x32xf32> to vector<16x32xf32>
    %cst_316 = arith.constant dense<0.000000e+00> : vector<9x32xf32>
    %299 = tpu.matmul %296, %298, %cst_316 {dimension_numbers = #tpu.dot_dimension_numbers<[1], [0], [0], [1], [0, 0, 1, 1], [], []>} : vector<9x16xf32>, vector<16x32xf32>, vector<9x32xf32> -> vector<9x32xf32>
    %300 = arith.addf %293, %299 : vector<9x32xf32>
    %c8_317 = arith.constant 8 : index
    %c0_318 = arith.constant 0 : index
    %c0_319 = arith.constant 0 : index
    %301 = vector.load %arg8[%c8_317, %c0_318, %c0_319] : memref<16x9x16xf32, #tpu.memory_space<vmem>>, vector<1x9x16xf32>
    %302 = vector.shape_cast %301 : vector<1x9x16xf32> to vector<9x16xf32>
    %cst_320 = arith.constant dense<0.000000e+00> : vector<9x16xf32>
    %303 = tpu.matmul %302, %243, %cst_320 {dimension_numbers = #tpu.dot_dimension_numbers<[1], [0], [0], [1], [0, 0, 1, 1], [], []>} : vector<9x16xf32>, vector<16x16xf32>, vector<9x16xf32> -> vector<9x16xf32>
    %c8_321 = arith.constant 8 : index
    %c0_322 = arith.constant 0 : index
    %c0_323 = arith.constant 0 : index
    %304 = vector.load %arg9[%c8_321, %c0_322, %c0_323] : memref<16x16x32xf32, #tpu.memory_space<vmem>>, vector<1x16x32xf32>
    %305 = vector.shape_cast %304 : vector<1x16x32xf32> to vector<16x32xf32>
    %cst_324 = arith.constant dense<0.000000e+00> : vector<9x32xf32>
    %306 = tpu.matmul %303, %305, %cst_324 {dimension_numbers = #tpu.dot_dimension_numbers<[1], [0], [0], [1], [0, 0, 1, 1], [], []>} : vector<9x16xf32>, vector<16x32xf32>, vector<9x32xf32> -> vector<9x32xf32>
    %307 = arith.addf %300, %306 : vector<9x32xf32>
    %c9_325 = arith.constant 9 : index
    %c0_326 = arith.constant 0 : index
    %c0_327 = arith.constant 0 : index
    %308 = vector.load %arg8[%c9_325, %c0_326, %c0_327] : memref<16x9x16xf32, #tpu.memory_space<vmem>>, vector<1x9x16xf32>
    %309 = vector.shape_cast %308 : vector<1x9x16xf32> to vector<9x16xf32>
    %cst_328 = arith.constant dense<0.000000e+00> : vector<9x16xf32>
    %310 = tpu.matmul %309, %243, %cst_328 {dimension_numbers = #tpu.dot_dimension_numbers<[1], [0], [0], [1], [0, 0, 1, 1], [], []>} : vector<9x16xf32>, vector<16x16xf32>, vector<9x16xf32> -> vector<9x16xf32>
    %c9_329 = arith.constant 9 : index
    %c0_330 = arith.constant 0 : index
    %c0_331 = arith.constant 0 : index
    %311 = vector.load %arg9[%c9_329, %c0_330, %c0_331] : memref<16x16x32xf32, #tpu.memory_space<vmem>>, vector<1x16x32xf32>
    %312 = vector.shape_cast %311 : vector<1x16x32xf32> to vector<16x32xf32>
    %cst_332 = arith.constant dense<0.000000e+00> : vector<9x32xf32>
    %313 = tpu.matmul %310, %312, %cst_332 {dimension_numbers = #tpu.dot_dimension_numbers<[1], [0], [0], [1], [0, 0, 1, 1], [], []>} : vector<9x16xf32>, vector<16x32xf32>, vector<9x32xf32> -> vector<9x32xf32>
    %314 = arith.addf %307, %313 : vector<9x32xf32>
    %c10_333 = arith.constant 10 : index
    %c0_334 = arith.constant 0 : index
    %c0_335 = arith.constant 0 : index
    %315 = vector.load %arg8[%c10_333, %c0_334, %c0_335] : memref<16x9x16xf32, #tpu.memory_space<vmem>>, vector<1x9x16xf32>
    %316 = vector.shape_cast %315 : vector<1x9x16xf32> to vector<9x16xf32>
    %cst_336 = arith.constant dense<0.000000e+00> : vector<9x16xf32>
    %317 = tpu.matmul %316, %243, %cst_336 {dimension_numbers = #tpu.dot_dimension_numbers<[1], [0], [0], [1], [0, 0, 1, 1], [], []>} : vector<9x16xf32>, vector<16x16xf32>, vector<9x16xf32> -> vector<9x16xf32>
    %c10_337 = arith.constant 10 : index
    %c0_338 = arith.constant 0 : index
    %c0_339 = arith.constant 0 : index
    %318 = vector.load %arg9[%c10_337, %c0_338, %c0_339] : memref<16x16x32xf32, #tpu.memory_space<vmem>>, vector<1x16x32xf32>
    %319 = vector.shape_cast %318 : vector<1x16x32xf32> to vector<16x32xf32>
    %cst_340 = arith.constant dense<0.000000e+00> : vector<9x32xf32>
    %320 = tpu.matmul %317, %319, %cst_340 {dimension_numbers = #tpu.dot_dimension_numbers<[1], [0], [0], [1], [0, 0, 1, 1], [], []>} : vector<9x16xf32>, vector<16x32xf32>, vector<9x32xf32> -> vector<9x32xf32>
    %321 = arith.addf %314, %320 : vector<9x32xf32>
    %c11_341 = arith.constant 11 : index
    %c0_342 = arith.constant 0 : index
    %c0_343 = arith.constant 0 : index
    %322 = vector.load %arg8[%c11_341, %c0_342, %c0_343] : memref<16x9x16xf32, #tpu.memory_space<vmem>>, vector<1x9x16xf32>
    %323 = vector.shape_cast %322 : vector<1x9x16xf32> to vector<9x16xf32>
    %cst_344 = arith.constant dense<0.000000e+00> : vector<9x16xf32>
    %324 = tpu.matmul %323, %243, %cst_344 {dimension_numbers = #tpu.dot_dimension_numbers<[1], [0], [0], [1], [0, 0, 1, 1], [], []>} : vector<9x16xf32>, vector<16x16xf32>, vector<9x16xf32> -> vector<9x16xf32>
    %c11_345 = arith.constant 11 : index
    %c0_346 = arith.constant 0 : index
    %c0_347 = arith.constant 0 : index
    %325 = vector.load %arg9[%c11_345, %c0_346, %c0_347] : memref<16x16x32xf32, #tpu.memory_space<vmem>>, vector<1x16x32xf32>
    %326 = vector.shape_cast %325 : vector<1x16x32xf32> to vector<16x32xf32>
    %cst_348 = arith.constant dense<0.000000e+00> : vector<9x32xf32>
    %327 = tpu.matmul %324, %326, %cst_348 {dimension_numbers = #tpu.dot_dimension_numbers<[1], [0], [0], [1], [0, 0, 1, 1], [], []>} : vector<9x16xf32>, vector<16x32xf32>, vector<9x32xf32> -> vector<9x32xf32>
    %328 = arith.addf %321, %327 : vector<9x32xf32>
    %c12_349 = arith.constant 12 : index
    %c0_350 = arith.constant 0 : index
    %c0_351 = arith.constant 0 : index
    %329 = vector.load %arg8[%c12_349, %c0_350, %c0_351] : memref<16x9x16xf32, #tpu.memory_space<vmem>>, vector<1x9x16xf32>
    %330 = vector.shape_cast %329 : vector<1x9x16xf32> to vector<9x16xf32>
    %cst_352 = arith.constant dense<0.000000e+00> : vector<9x16xf32>
    %331 = tpu.matmul %330, %243, %cst_352 {dimension_numbers = #tpu.dot_dimension_numbers<[1], [0], [0], [1], [0, 0, 1, 1], [], []>} : vector<9x16xf32>, vector<16x16xf32>, vector<9x16xf32> -> vector<9x16xf32>
    %c12_353 = arith.constant 12 : index
    %c0_354 = arith.constant 0 : index
    %c0_355 = arith.constant 0 : index
    %332 = vector.load %arg9[%c12_353, %c0_354, %c0_355] : memref<16x16x32xf32, #tpu.memory_space<vmem>>, vector<1x16x32xf32>
    %333 = vector.shape_cast %332 : vector<1x16x32xf32> to vector<16x32xf32>
    %cst_356 = arith.constant dense<0.000000e+00> : vector<9x32xf32>
    %334 = tpu.matmul %331, %333, %cst_356 {dimension_numbers = #tpu.dot_dimension_numbers<[1], [0], [0], [1], [0, 0, 1, 1], [], []>} : vector<9x16xf32>, vector<16x32xf32>, vector<9x32xf32> -> vector<9x32xf32>
    %335 = arith.addf %328, %334 : vector<9x32xf32>
    %c13_357 = arith.constant 13 : index
    %c0_358 = arith.constant 0 : index
    %c0_359 = arith.constant 0 : index
    %336 = vector.load %arg8[%c13_357, %c0_358, %c0_359] : memref<16x9x16xf32, #tpu.memory_space<vmem>>, vector<1x9x16xf32>
    %337 = vector.shape_cast %336 : vector<1x9x16xf32> to vector<9x16xf32>
    %cst_360 = arith.constant dense<0.000000e+00> : vector<9x16xf32>
    %338 = tpu.matmul %337, %243, %cst_360 {dimension_numbers = #tpu.dot_dimension_numbers<[1], [0], [0], [1], [0, 0, 1, 1], [], []>} : vector<9x16xf32>, vector<16x16xf32>, vector<9x16xf32> -> vector<9x16xf32>
    %c13_361 = arith.constant 13 : index
    %c0_362 = arith.constant 0 : index
    %c0_363 = arith.constant 0 : index
    %339 = vector.load %arg9[%c13_361, %c0_362, %c0_363] : memref<16x16x32xf32, #tpu.memory_space<vmem>>, vector<1x16x32xf32>
    %340 = vector.shape_cast %339 : vector<1x16x32xf32> to vector<16x32xf32>
    %cst_364 = arith.constant dense<0.000000e+00> : vector<9x32xf32>
    %341 = tpu.matmul %338, %340, %cst_364 {dimension_numbers = #tpu.dot_dimension_numbers<[1], [0], [0], [1], [0, 0, 1, 1], [], []>} : vector<9x16xf32>, vector<16x32xf32>, vector<9x32xf32> -> vector<9x32xf32>
    %342 = arith.addf %335, %341 : vector<9x32xf32>
    %c14_365 = arith.constant 14 : index
    %c0_366 = arith.constant 0 : index
    %c0_367 = arith.constant 0 : index
    %343 = vector.load %arg8[%c14_365, %c0_366, %c0_367] : memref<16x9x16xf32, #tpu.memory_space<vmem>>, vector<1x9x16xf32>
    %344 = vector.shape_cast %343 : vector<1x9x16xf32> to vector<9x16xf32>
    %cst_368 = arith.constant dense<0.000000e+00> : vector<9x16xf32>
    %345 = tpu.matmul %344, %243, %cst_368 {dimension_numbers = #tpu.dot_dimension_numbers<[1], [0], [0], [1], [0, 0, 1, 1], [], []>} : vector<9x16xf32>, vector<16x16xf32>, vector<9x16xf32> -> vector<9x16xf32>
    %c14_369 = arith.constant 14 : index
    %c0_370 = arith.constant 0 : index
    %c0_371 = arith.constant 0 : index
    %346 = vector.load %arg9[%c14_369, %c0_370, %c0_371] : memref<16x16x32xf32, #tpu.memory_space<vmem>>, vector<1x16x32xf32>
    %347 = vector.shape_cast %346 : vector<1x16x32xf32> to vector<16x32xf32>
    %cst_372 = arith.constant dense<0.000000e+00> : vector<9x32xf32>
    %348 = tpu.matmul %345, %347, %cst_372 {dimension_numbers = #tpu.dot_dimension_numbers<[1], [0], [0], [1], [0, 0, 1, 1], [], []>} : vector<9x16xf32>, vector<16x32xf32>, vector<9x32xf32> -> vector<9x32xf32>
    %349 = arith.addf %342, %348 : vector<9x32xf32>
    %c15_373 = arith.constant 15 : index
    %c0_374 = arith.constant 0 : index
    %c0_375 = arith.constant 0 : index
    %350 = vector.load %arg8[%c15_373, %c0_374, %c0_375] : memref<16x9x16xf32, #tpu.memory_space<vmem>>, vector<1x9x16xf32>
    %351 = vector.shape_cast %350 : vector<1x9x16xf32> to vector<9x16xf32>
    %cst_376 = arith.constant dense<0.000000e+00> : vector<9x16xf32>
    %352 = tpu.matmul %351, %243, %cst_376 {dimension_numbers = #tpu.dot_dimension_numbers<[1], [0], [0], [1], [0, 0, 1, 1], [], []>} : vector<9x16xf32>, vector<16x16xf32>, vector<9x16xf32> -> vector<9x16xf32>
    %c15_377 = arith.constant 15 : index
    %c0_378 = arith.constant 0 : index
    %c0_379 = arith.constant 0 : index
    %353 = vector.load %arg9[%c15_377, %c0_378, %c0_379] : memref<16x16x32xf32, #tpu.memory_space<vmem>>, vector<1x16x32xf32>
    %354 = vector.shape_cast %353 : vector<1x16x32xf32> to vector<16x32xf32>
    %cst_380 = arith.constant dense<0.000000e+00> : vector<9x32xf32>
    %355 = tpu.matmul %352, %354, %cst_380 {dimension_numbers = #tpu.dot_dimension_numbers<[1], [0], [0], [1], [0, 0, 1, 1], [], []>} : vector<9x16xf32>, vector<16x32xf32>, vector<9x32xf32> -> vector<9x32xf32>
    %356 = arith.addf %349, %355 : vector<9x32xf32>
    %c0_381 = arith.constant 0 : index
    %c0_382 = arith.constant 0 : index
    %357 = vector.load %arg10[%c0_381, %c0_382] : memref<1x32xf32, #tpu.memory_space<vmem>>, vector<1x32xf32>
    %358 = vector.broadcast %357 : vector<1x32xf32> to vector<9x32xf32>
    %359 = arith.addf %356, %358 : vector<9x32xf32>
    %cst_383 = arith.constant 0.000000e+00 : f32
    %360 = vector.broadcast %cst_383 : f32 to vector<9x32xf32>
    %361 = arith.cmpf oge, %359, %360 : vector<9x32xf32>
    %cst_384 = arith.constant 2.000000e-01 : f32
    %362 = vector.broadcast %cst_384 : f32 to vector<9x32xf32>
    %363 = arith.mulf %362, %359 : vector<9x32xf32>
    %364 = arith.select %361, %359, %363 : vector<9x32xi1>, vector<9x32xf32>
    %cst_385 = arith.constant 0.000000e+00 : f32
    %365 = vector.broadcast %cst_385 : f32 to vector<4x1xf32>
    %c0_386 = arith.constant 0 : index
    %c0_387 = arith.constant 0 : index
    %c0_388 = arith.constant 0 : index
    %366 = vector.load %arg11[%c0_386, %c0_387, %c0_388] : memref<16x4x9xf32, #tpu.memory_space<vmem>>, vector<1x4x9xf32>
    %367 = vector.shape_cast %366 : vector<1x4x9xf32> to vector<4x9xf32>
    %cst_389 = arith.constant dense<0.000000e+00> : vector<4x32xf32>
    %368 = tpu.matmul %367, %364, %cst_389 {dimension_numbers = #tpu.dot_dimension_numbers<[1], [0], [0], [1], [0, 0, 1, 1], [], []>} : vector<4x9xf32>, vector<9x32xf32>, vector<4x32xf32> -> vector<4x32xf32>
    %c0_390 = arith.constant 0 : index
    %c0_391 = arith.constant 0 : index
    %c0_392 = arith.constant 0 : index
    %369 = vector.load %arg12[%c0_390, %c0_391, %c0_392] : memref<16x32x1xf32, #tpu.memory_space<vmem>>, vector<1x32x1xf32>
    %370 = vector.shape_cast %369 : vector<1x32x1xf32> to vector<32x1xf32>
    %cst_393 = arith.constant dense<0.000000e+00> : vector<4x1xf32>
    %371 = tpu.matmul %368, %370, %cst_393 {dimension_numbers = #tpu.dot_dimension_numbers<[1], [0], [0], [1], [0, 0, 1, 1], [], []>} : vector<4x32xf32>, vector<32x1xf32>, vector<4x1xf32> -> vector<4x1xf32>
    %372 = arith.addf %365, %371 : vector<4x1xf32>
    %c1_394 = arith.constant 1 : index
    %c0_395 = arith.constant 0 : index
    %c0_396 = arith.constant 0 : index
    %373 = vector.load %arg11[%c1_394, %c0_395, %c0_396] : memref<16x4x9xf32, #tpu.memory_space<vmem>>, vector<1x4x9xf32>
    %374 = vector.shape_cast %373 : vector<1x4x9xf32> to vector<4x9xf32>
    %cst_397 = arith.constant dense<0.000000e+00> : vector<4x32xf32>
    %375 = tpu.matmul %374, %364, %cst_397 {dimension_numbers = #tpu.dot_dimension_numbers<[1], [0], [0], [1], [0, 0, 1, 1], [], []>} : vector<4x9xf32>, vector<9x32xf32>, vector<4x32xf32> -> vector<4x32xf32>
    %c1_398 = arith.constant 1 : index
    %c0_399 = arith.constant 0 : index
    %c0_400 = arith.constant 0 : index
    %376 = vector.load %arg12[%c1_398, %c0_399, %c0_400] : memref<16x32x1xf32, #tpu.memory_space<vmem>>, vector<1x32x1xf32>
    %377 = vector.shape_cast %376 : vector<1x32x1xf32> to vector<32x1xf32>
    %cst_401 = arith.constant dense<0.000000e+00> : vector<4x1xf32>
    %378 = tpu.matmul %375, %377, %cst_401 {dimension_numbers = #tpu.dot_dimension_numbers<[1], [0], [0], [1], [0, 0, 1, 1], [], []>} : vector<4x32xf32>, vector<32x1xf32>, vector<4x1xf32> -> vector<4x1xf32>
    %379 = arith.addf %372, %378 : vector<4x1xf32>
    %c2_402 = arith.constant 2 : index
    %c0_403 = arith.constant 0 : index
    %c0_404 = arith.constant 0 : index
    %380 = vector.load %arg11[%c2_402, %c0_403, %c0_404] : memref<16x4x9xf32, #tpu.memory_space<vmem>>, vector<1x4x9xf32>
    %381 = vector.shape_cast %380 : vector<1x4x9xf32> to vector<4x9xf32>
    %cst_405 = arith.constant dense<0.000000e+00> : vector<4x32xf32>
    %382 = tpu.matmul %381, %364, %cst_405 {dimension_numbers = #tpu.dot_dimension_numbers<[1], [0], [0], [1], [0, 0, 1, 1], [], []>} : vector<4x9xf32>, vector<9x32xf32>, vector<4x32xf32> -> vector<4x32xf32>
    %c2_406 = arith.constant 2 : index
    %c0_407 = arith.constant 0 : index
    %c0_408 = arith.constant 0 : index
    %383 = vector.load %arg12[%c2_406, %c0_407, %c0_408] : memref<16x32x1xf32, #tpu.memory_space<vmem>>, vector<1x32x1xf32>
    %384 = vector.shape_cast %383 : vector<1x32x1xf32> to vector<32x1xf32>
    %cst_409 = arith.constant dense<0.000000e+00> : vector<4x1xf32>
    %385 = tpu.matmul %382, %384, %cst_409 {dimension_numbers = #tpu.dot_dimension_numbers<[1], [0], [0], [1], [0, 0, 1, 1], [], []>} : vector<4x32xf32>, vector<32x1xf32>, vector<4x1xf32> -> vector<4x1xf32>
    %386 = arith.addf %379, %385 : vector<4x1xf32>
    %c3_410 = arith.constant 3 : index
    %c0_411 = arith.constant 0 : index
    %c0_412 = arith.constant 0 : index
    %387 = vector.load %arg11[%c3_410, %c0_411, %c0_412] : memref<16x4x9xf32, #tpu.memory_space<vmem>>, vector<1x4x9xf32>
    %388 = vector.shape_cast %387 : vector<1x4x9xf32> to vector<4x9xf32>
    %cst_413 = arith.constant dense<0.000000e+00> : vector<4x32xf32>
    %389 = tpu.matmul %388, %364, %cst_413 {dimension_numbers = #tpu.dot_dimension_numbers<[1], [0], [0], [1], [0, 0, 1, 1], [], []>} : vector<4x9xf32>, vector<9x32xf32>, vector<4x32xf32> -> vector<4x32xf32>
    %c3_414 = arith.constant 3 : index
    %c0_415 = arith.constant 0 : index
    %c0_416 = arith.constant 0 : index
    %390 = vector.load %arg12[%c3_414, %c0_415, %c0_416] : memref<16x32x1xf32, #tpu.memory_space<vmem>>, vector<1x32x1xf32>
    %391 = vector.shape_cast %390 : vector<1x32x1xf32> to vector<32x1xf32>
    %cst_417 = arith.constant dense<0.000000e+00> : vector<4x1xf32>
    %392 = tpu.matmul %389, %391, %cst_417 {dimension_numbers = #tpu.dot_dimension_numbers<[1], [0], [0], [1], [0, 0, 1, 1], [], []>} : vector<4x32xf32>, vector<32x1xf32>, vector<4x1xf32> -> vector<4x1xf32>
    %393 = arith.addf %386, %392 : vector<4x1xf32>
    %c4_418 = arith.constant 4 : index
    %c0_419 = arith.constant 0 : index
    %c0_420 = arith.constant 0 : index
    %394 = vector.load %arg11[%c4_418, %c0_419, %c0_420] : memref<16x4x9xf32, #tpu.memory_space<vmem>>, vector<1x4x9xf32>
    %395 = vector.shape_cast %394 : vector<1x4x9xf32> to vector<4x9xf32>
    %cst_421 = arith.constant dense<0.000000e+00> : vector<4x32xf32>
    %396 = tpu.matmul %395, %364, %cst_421 {dimension_numbers = #tpu.dot_dimension_numbers<[1], [0], [0], [1], [0, 0, 1, 1], [], []>} : vector<4x9xf32>, vector<9x32xf32>, vector<4x32xf32> -> vector<4x32xf32>
    %c4_422 = arith.constant 4 : index
    %c0_423 = arith.constant 0 : index
    %c0_424 = arith.constant 0 : index
    %397 = vector.load %arg12[%c4_422, %c0_423, %c0_424] : memref<16x32x1xf32, #tpu.memory_space<vmem>>, vector<1x32x1xf32>
    %398 = vector.shape_cast %397 : vector<1x32x1xf32> to vector<32x1xf32>
    %cst_425 = arith.constant dense<0.000000e+00> : vector<4x1xf32>
    %399 = tpu.matmul %396, %398, %cst_425 {dimension_numbers = #tpu.dot_dimension_numbers<[1], [0], [0], [1], [0, 0, 1, 1], [], []>} : vector<4x32xf32>, vector<32x1xf32>, vector<4x1xf32> -> vector<4x1xf32>
    %400 = arith.addf %393, %399 : vector<4x1xf32>
    %c5_426 = arith.constant 5 : index
    %c0_427 = arith.constant 0 : index
    %c0_428 = arith.constant 0 : index
    %401 = vector.load %arg11[%c5_426, %c0_427, %c0_428] : memref<16x4x9xf32, #tpu.memory_space<vmem>>, vector<1x4x9xf32>
    %402 = vector.shape_cast %401 : vector<1x4x9xf32> to vector<4x9xf32>
    %cst_429 = arith.constant dense<0.000000e+00> : vector<4x32xf32>
    %403 = tpu.matmul %402, %364, %cst_429 {dimension_numbers = #tpu.dot_dimension_numbers<[1], [0], [0], [1], [0, 0, 1, 1], [], []>} : vector<4x9xf32>, vector<9x32xf32>, vector<4x32xf32> -> vector<4x32xf32>
    %c5_430 = arith.constant 5 : index
    %c0_431 = arith.constant 0 : index
    %c0_432 = arith.constant 0 : index
    %404 = vector.load %arg12[%c5_430, %c0_431, %c0_432] : memref<16x32x1xf32, #tpu.memory_space<vmem>>, vector<1x32x1xf32>
    %405 = vector.shape_cast %404 : vector<1x32x1xf32> to vector<32x1xf32>
    %cst_433 = arith.constant dense<0.000000e+00> : vector<4x1xf32>
    %406 = tpu.matmul %403, %405, %cst_433 {dimension_numbers = #tpu.dot_dimension_numbers<[1], [0], [0], [1], [0, 0, 1, 1], [], []>} : vector<4x32xf32>, vector<32x1xf32>, vector<4x1xf32> -> vector<4x1xf32>
    %407 = arith.addf %400, %406 : vector<4x1xf32>
    %c6_434 = arith.constant 6 : index
    %c0_435 = arith.constant 0 : index
    %c0_436 = arith.constant 0 : index
    %408 = vector.load %arg11[%c6_434, %c0_435, %c0_436] : memref<16x4x9xf32, #tpu.memory_space<vmem>>, vector<1x4x9xf32>
    %409 = vector.shape_cast %408 : vector<1x4x9xf32> to vector<4x9xf32>
    %cst_437 = arith.constant dense<0.000000e+00> : vector<4x32xf32>
    %410 = tpu.matmul %409, %364, %cst_437 {dimension_numbers = #tpu.dot_dimension_numbers<[1], [0], [0], [1], [0, 0, 1, 1], [], []>} : vector<4x9xf32>, vector<9x32xf32>, vector<4x32xf32> -> vector<4x32xf32>
    %c6_438 = arith.constant 6 : index
    %c0_439 = arith.constant 0 : index
    %c0_440 = arith.constant 0 : index
    %411 = vector.load %arg12[%c6_438, %c0_439, %c0_440] : memref<16x32x1xf32, #tpu.memory_space<vmem>>, vector<1x32x1xf32>
    %412 = vector.shape_cast %411 : vector<1x32x1xf32> to vector<32x1xf32>
    %cst_441 = arith.constant dense<0.000000e+00> : vector<4x1xf32>
    %413 = tpu.matmul %410, %412, %cst_441 {dimension_numbers = #tpu.dot_dimension_numbers<[1], [0], [0], [1], [0, 0, 1, 1], [], []>} : vector<4x32xf32>, vector<32x1xf32>, vector<4x1xf32> -> vector<4x1xf32>
    %414 = arith.addf %407, %413 : vector<4x1xf32>
    %c7_442 = arith.constant 7 : index
    %c0_443 = arith.constant 0 : index
    %c0_444 = arith.constant 0 : index
    %415 = vector.load %arg11[%c7_442, %c0_443, %c0_444] : memref<16x4x9xf32, #tpu.memory_space<vmem>>, vector<1x4x9xf32>
    %416 = vector.shape_cast %415 : vector<1x4x9xf32> to vector<4x9xf32>
    %cst_445 = arith.constant dense<0.000000e+00> : vector<4x32xf32>
    %417 = tpu.matmul %416, %364, %cst_445 {dimension_numbers = #tpu.dot_dimension_numbers<[1], [0], [0], [1], [0, 0, 1, 1], [], []>} : vector<4x9xf32>, vector<9x32xf32>, vector<4x32xf32> -> vector<4x32xf32>
    %c7_446 = arith.constant 7 : index
    %c0_447 = arith.constant 0 : index
    %c0_448 = arith.constant 0 : index
    %418 = vector.load %arg12[%c7_446, %c0_447, %c0_448] : memref<16x32x1xf32, #tpu.memory_space<vmem>>, vector<1x32x1xf32>
    %419 = vector.shape_cast %418 : vector<1x32x1xf32> to vector<32x1xf32>
    %cst_449 = arith.constant dense<0.000000e+00> : vector<4x1xf32>
    %420 = tpu.matmul %417, %419, %cst_449 {dimension_numbers = #tpu.dot_dimension_numbers<[1], [0], [0], [1], [0, 0, 1, 1], [], []>} : vector<4x32xf32>, vector<32x1xf32>, vector<4x1xf32> -> vector<4x1xf32>
    %421 = arith.addf %414, %420 : vector<4x1xf32>
    %c8_450 = arith.constant 8 : index
    %c0_451 = arith.constant 0 : index
    %c0_452 = arith.constant 0 : index
    %422 = vector.load %arg11[%c8_450, %c0_451, %c0_452] : memref<16x4x9xf32, #tpu.memory_space<vmem>>, vector<1x4x9xf32>
    %423 = vector.shape_cast %422 : vector<1x4x9xf32> to vector<4x9xf32>
    %cst_453 = arith.constant dense<0.000000e+00> : vector<4x32xf32>
    %424 = tpu.matmul %423, %364, %cst_453 {dimension_numbers = #tpu.dot_dimension_numbers<[1], [0], [0], [1], [0, 0, 1, 1], [], []>} : vector<4x9xf32>, vector<9x32xf32>, vector<4x32xf32> -> vector<4x32xf32>
    %c8_454 = arith.constant 8 : index
    %c0_455 = arith.constant 0 : index
    %c0_456 = arith.constant 0 : index
    %425 = vector.load %arg12[%c8_454, %c0_455, %c0_456] : memref<16x32x1xf32, #tpu.memory_space<vmem>>, vector<1x32x1xf32>
    %426 = vector.shape_cast %425 : vector<1x32x1xf32> to vector<32x1xf32>
    %cst_457 = arith.constant dense<0.000000e+00> : vector<4x1xf32>
    %427 = tpu.matmul %424, %426, %cst_457 {dimension_numbers = #tpu.dot_dimension_numbers<[1], [0], [0], [1], [0, 0, 1, 1], [], []>} : vector<4x32xf32>, vector<32x1xf32>, vector<4x1xf32> -> vector<4x1xf32>
    %428 = arith.addf %421, %427 : vector<4x1xf32>
    %c9_458 = arith.constant 9 : index
    %c0_459 = arith.constant 0 : index
    %c0_460 = arith.constant 0 : index
    %429 = vector.load %arg11[%c9_458, %c0_459, %c0_460] : memref<16x4x9xf32, #tpu.memory_space<vmem>>, vector<1x4x9xf32>
    %430 = vector.shape_cast %429 : vector<1x4x9xf32> to vector<4x9xf32>
    %cst_461 = arith.constant dense<0.000000e+00> : vector<4x32xf32>
    %431 = tpu.matmul %430, %364, %cst_461 {dimension_numbers = #tpu.dot_dimension_numbers<[1], [0], [0], [1], [0, 0, 1, 1], [], []>} : vector<4x9xf32>, vector<9x32xf32>, vector<4x32xf32> -> vector<4x32xf32>
    %c9_462 = arith.constant 9 : index
    %c0_463 = arith.constant 0 : index
    %c0_464 = arith.constant 0 : index
    %432 = vector.load %arg12[%c9_462, %c0_463, %c0_464] : memref<16x32x1xf32, #tpu.memory_space<vmem>>, vector<1x32x1xf32>
    %433 = vector.shape_cast %432 : vector<1x32x1xf32> to vector<32x1xf32>
    %cst_465 = arith.constant dense<0.000000e+00> : vector<4x1xf32>
    %434 = tpu.matmul %431, %433, %cst_465 {dimension_numbers = #tpu.dot_dimension_numbers<[1], [0], [0], [1], [0, 0, 1, 1], [], []>} : vector<4x32xf32>, vector<32x1xf32>, vector<4x1xf32> -> vector<4x1xf32>
    %435 = arith.addf %428, %434 : vector<4x1xf32>
    %c10_466 = arith.constant 10 : index
    %c0_467 = arith.constant 0 : index
    %c0_468 = arith.constant 0 : index
    %436 = vector.load %arg11[%c10_466, %c0_467, %c0_468] : memref<16x4x9xf32, #tpu.memory_space<vmem>>, vector<1x4x9xf32>
    %437 = vector.shape_cast %436 : vector<1x4x9xf32> to vector<4x9xf32>
    %cst_469 = arith.constant dense<0.000000e+00> : vector<4x32xf32>
    %438 = tpu.matmul %437, %364, %cst_469 {dimension_numbers = #tpu.dot_dimension_numbers<[1], [0], [0], [1], [0, 0, 1, 1], [], []>} : vector<4x9xf32>, vector<9x32xf32>, vector<4x32xf32> -> vector<4x32xf32>
    %c10_470 = arith.constant 10 : index
    %c0_471 = arith.constant 0 : index
    %c0_472 = arith.constant 0 : index
    %439 = vector.load %arg12[%c10_470, %c0_471, %c0_472] : memref<16x32x1xf32, #tpu.memory_space<vmem>>, vector<1x32x1xf32>
    %440 = vector.shape_cast %439 : vector<1x32x1xf32> to vector<32x1xf32>
    %cst_473 = arith.constant dense<0.000000e+00> : vector<4x1xf32>
    %441 = tpu.matmul %438, %440, %cst_473 {dimension_numbers = #tpu.dot_dimension_numbers<[1], [0], [0], [1], [0, 0, 1, 1], [], []>} : vector<4x32xf32>, vector<32x1xf32>, vector<4x1xf32> -> vector<4x1xf32>
    %442 = arith.addf %435, %441 : vector<4x1xf32>
    %c11_474 = arith.constant 11 : index
    %c0_475 = arith.constant 0 : index
    %c0_476 = arith.constant 0 : index
    %443 = vector.load %arg11[%c11_474, %c0_475, %c0_476] : memref<16x4x9xf32, #tpu.memory_space<vmem>>, vector<1x4x9xf32>
    %444 = vector.shape_cast %443 : vector<1x4x9xf32> to vector<4x9xf32>
    %cst_477 = arith.constant dense<0.000000e+00> : vector<4x32xf32>
    %445 = tpu.matmul %444, %364, %cst_477 {dimension_numbers = #tpu.dot_dimension_numbers<[1], [0], [0], [1], [0, 0, 1, 1], [], []>} : vector<4x9xf32>, vector<9x32xf32>, vector<4x32xf32> -> vector<4x32xf32>
    %c11_478 = arith.constant 11 : index
    %c0_479 = arith.constant 0 : index
    %c0_480 = arith.constant 0 : index
    %446 = vector.load %arg12[%c11_478, %c0_479, %c0_480] : memref<16x32x1xf32, #tpu.memory_space<vmem>>, vector<1x32x1xf32>
    %447 = vector.shape_cast %446 : vector<1x32x1xf32> to vector<32x1xf32>
    %cst_481 = arith.constant dense<0.000000e+00> : vector<4x1xf32>
    %448 = tpu.matmul %445, %447, %cst_481 {dimension_numbers = #tpu.dot_dimension_numbers<[1], [0], [0], [1], [0, 0, 1, 1], [], []>} : vector<4x32xf32>, vector<32x1xf32>, vector<4x1xf32> -> vector<4x1xf32>
    %449 = arith.addf %442, %448 : vector<4x1xf32>
    %c12_482 = arith.constant 12 : index
    %c0_483 = arith.constant 0 : index
    %c0_484 = arith.constant 0 : index
    %450 = vector.load %arg11[%c12_482, %c0_483, %c0_484] : memref<16x4x9xf32, #tpu.memory_space<vmem>>, vector<1x4x9xf32>
    %451 = vector.shape_cast %450 : vector<1x4x9xf32> to vector<4x9xf32>
    %cst_485 = arith.constant dense<0.000000e+00> : vector<4x32xf32>
    %452 = tpu.matmul %451, %364, %cst_485 {dimension_numbers = #tpu.dot_dimension_numbers<[1], [0], [0], [1], [0, 0, 1, 1], [], []>} : vector<4x9xf32>, vector<9x32xf32>, vector<4x32xf32> -> vector<4x32xf32>
    %c12_486 = arith.constant 12 : index
    %c0_487 = arith.constant 0 : index
    %c0_488 = arith.constant 0 : index
    %453 = vector.load %arg12[%c12_486, %c0_487, %c0_488] : memref<16x32x1xf32, #tpu.memory_space<vmem>>, vector<1x32x1xf32>
    %454 = vector.shape_cast %453 : vector<1x32x1xf32> to vector<32x1xf32>
    %cst_489 = arith.constant dense<0.000000e+00> : vector<4x1xf32>
    %455 = tpu.matmul %452, %454, %cst_489 {dimension_numbers = #tpu.dot_dimension_numbers<[1], [0], [0], [1], [0, 0, 1, 1], [], []>} : vector<4x32xf32>, vector<32x1xf32>, vector<4x1xf32> -> vector<4x1xf32>
    %456 = arith.addf %449, %455 : vector<4x1xf32>
    %c13_490 = arith.constant 13 : index
    %c0_491 = arith.constant 0 : index
    %c0_492 = arith.constant 0 : index
    %457 = vector.load %arg11[%c13_490, %c0_491, %c0_492] : memref<16x4x9xf32, #tpu.memory_space<vmem>>, vector<1x4x9xf32>
    %458 = vector.shape_cast %457 : vector<1x4x9xf32> to vector<4x9xf32>
    %cst_493 = arith.constant dense<0.000000e+00> : vector<4x32xf32>
    %459 = tpu.matmul %458, %364, %cst_493 {dimension_numbers = #tpu.dot_dimension_numbers<[1], [0], [0], [1], [0, 0, 1, 1], [], []>} : vector<4x9xf32>, vector<9x32xf32>, vector<4x32xf32> -> vector<4x32xf32>
    %c13_494 = arith.constant 13 : index
    %c0_495 = arith.constant 0 : index
    %c0_496 = arith.constant 0 : index
    %460 = vector.load %arg12[%c13_494, %c0_495, %c0_496] : memref<16x32x1xf32, #tpu.memory_space<vmem>>, vector<1x32x1xf32>
    %461 = vector.shape_cast %460 : vector<1x32x1xf32> to vector<32x1xf32>
    %cst_497 = arith.constant dense<0.000000e+00> : vector<4x1xf32>
    %462 = tpu.matmul %459, %461, %cst_497 {dimension_numbers = #tpu.dot_dimension_numbers<[1], [0], [0], [1], [0, 0, 1, 1], [], []>} : vector<4x32xf32>, vector<32x1xf32>, vector<4x1xf32> -> vector<4x1xf32>
    %463 = arith.addf %456, %462 : vector<4x1xf32>
    %c14_498 = arith.constant 14 : index
    %c0_499 = arith.constant 0 : index
    %c0_500 = arith.constant 0 : index
    %464 = vector.load %arg11[%c14_498, %c0_499, %c0_500] : memref<16x4x9xf32, #tpu.memory_space<vmem>>, vector<1x4x9xf32>
    %465 = vector.shape_cast %464 : vector<1x4x9xf32> to vector<4x9xf32>
    %cst_501 = arith.constant dense<0.000000e+00> : vector<4x32xf32>
    %466 = tpu.matmul %465, %364, %cst_501 {dimension_numbers = #tpu.dot_dimension_numbers<[1], [0], [0], [1], [0, 0, 1, 1], [], []>} : vector<4x9xf32>, vector<9x32xf32>, vector<4x32xf32> -> vector<4x32xf32>
    %c14_502 = arith.constant 14 : index
    %c0_503 = arith.constant 0 : index
    %c0_504 = arith.constant 0 : index
    %467 = vector.load %arg12[%c14_502, %c0_503, %c0_504] : memref<16x32x1xf32, #tpu.memory_space<vmem>>, vector<1x32x1xf32>
    %468 = vector.shape_cast %467 : vector<1x32x1xf32> to vector<32x1xf32>
    %cst_505 = arith.constant dense<0.000000e+00> : vector<4x1xf32>
    %469 = tpu.matmul %466, %468, %cst_505 {dimension_numbers = #tpu.dot_dimension_numbers<[1], [0], [0], [1], [0, 0, 1, 1], [], []>} : vector<4x32xf32>, vector<32x1xf32>, vector<4x1xf32> -> vector<4x1xf32>
    %470 = arith.addf %463, %469 : vector<4x1xf32>
    %c15_506 = arith.constant 15 : index
    %c0_507 = arith.constant 0 : index
    %c0_508 = arith.constant 0 : index
    %471 = vector.load %arg11[%c15_506, %c0_507, %c0_508] : memref<16x4x9xf32, #tpu.memory_space<vmem>>, vector<1x4x9xf32>
    %472 = vector.shape_cast %471 : vector<1x4x9xf32> to vector<4x9xf32>
    %cst_509 = arith.constant dense<0.000000e+00> : vector<4x32xf32>
    %473 = tpu.matmul %472, %364, %cst_509 {dimension_numbers = #tpu.dot_dimension_numbers<[1], [0], [0], [1], [0, 0, 1, 1], [], []>} : vector<4x9xf32>, vector<9x32xf32>, vector<4x32xf32> -> vector<4x32xf32>
    %c15_510 = arith.constant 15 : index
    %c0_511 = arith.constant 0 : index
    %c0_512 = arith.constant 0 : index
    %474 = vector.load %arg12[%c15_510, %c0_511, %c0_512] : memref<16x32x1xf32, #tpu.memory_space<vmem>>, vector<1x32x1xf32>
    %475 = vector.shape_cast %474 : vector<1x32x1xf32> to vector<32x1xf32>
    %cst_513 = arith.constant dense<0.000000e+00> : vector<4x1xf32>
    %476 = tpu.matmul %473, %475, %cst_513 {dimension_numbers = #tpu.dot_dimension_numbers<[1], [0], [0], [1], [0, 0, 1, 1], [], []>} : vector<4x32xf32>, vector<32x1xf32>, vector<4x1xf32> -> vector<4x1xf32>
    %477 = arith.addf %470, %476 : vector<4x1xf32>
    %c0_514 = arith.constant 0 : index
    %c0_515 = arith.constant 0 : index
    %478 = vector.load %arg13[%c0_514, %c0_515] : memref<1x1xf32, #tpu.memory_space<vmem>>, vector<1x1xf32>
    %479 = vector.broadcast %478 : vector<1x1xf32> to vector<4x1xf32>
    %480 = arith.addf %477, %479 : vector<4x1xf32>
    %c0_516 = arith.constant 0 : index
    %c0_517 = arith.constant 0 : index
    %c0_518 = arith.constant 0 : index
    %481 = vector.load %arg14[%c0_516, %c0_517, %c0_518] : memref<1x4x1xf32, #tpu.memory_space<vmem>>, vector<1x4x1xf32>
    %482 = vector.shape_cast %481 : vector<1x4x1xf32> to vector<4x1xf32>
    %483 = vector.shape_cast %480 : vector<4x1xf32> to vector<1x4x1xf32>
    tpu.vector_store %arg14[%c0_516, %c0_517, %c0_518], %483 {strides = array<i32>} : memref<1x4x1xf32, #tpu.memory_space<vmem>>, vector<1x4x1xf32>,
    return
  }
  func.func @transform_0(%arg0: i32) -> (i32, i32, i32) {
    %c0_i32 = arith.constant 0 : i32
    %c0_i32_0 = arith.constant 0 : i32
    %c0_i32_1 = arith.constant 0 : i32
    return %arg0, %c0_i32, %c0_i32_0 : i32, i32, i32
  }
  func.func @transform_1(%arg0: i32) -> (i32, i32, i32) {
    %c0_i32 = arith.constant 0 : i32
    %c0_i32_0 = arith.constant 0 : i32
    %c0_i32_1 = arith.constant 0 : i32
    %c0_i32_2 = arith.constant 0 : i32
    return %c0_i32, %c0_i32_0, %c0_i32_1 : i32, i32, i32
  }
  func.func @transform_2(%arg0: i32) -> (i32, i32, i32) {
    %c0_i32 = arith.constant 0 : i32
    %c0_i32_0 = arith.constant 0 : i32
    %c0_i32_1 = arith.constant 0 : i32
    %c0_i32_2 = arith.constant 0 : i32
    return %c0_i32, %c0_i32_0, %c0_i32_1 : i32, i32, i32
  }
  func.func @transform_3(%arg0: i32) -> (i32, i32) {
    %c0_i32 = arith.constant 0 : i32
    %c0_i32_0 = arith.constant 0 : i32
    %c0_i32_1 = arith.constant 0 : i32
    return %c0_i32, %c0_i32_0 : i32, i32
  }
  func.func @transform_4(%arg0: i32) -> (i32, i32, i32) {
    %c0_i32 = arith.constant 0 : i32
    %c0_i32_0 = arith.constant 0 : i32
    %c0_i32_1 = arith.constant 0 : i32
    %c0_i32_2 = arith.constant 0 : i32
    return %c0_i32, %c0_i32_0, %c0_i32_1 : i32, i32, i32
  }
  func.func @transform_5(%arg0: i32) -> (i32, i32, i32) {
    %c0_i32 = arith.constant 0 : i32
    %c0_i32_0 = arith.constant 0 : i32
    %c0_i32_1 = arith.constant 0 : i32
    %c0_i32_2 = arith.constant 0 : i32
    return %c0_i32, %c0_i32_0, %c0_i32_1 : i32, i32, i32
  }
  func.func @transform_6(%arg0: i32) -> (i32, i32) {
    %c0_i32 = arith.constant 0 : i32
    %c0_i32_0 = arith.constant 0 : i32
    %c0_i32_1 = arith.constant 0 : i32
    return %c0_i32, %c0_i32_0 : i32, i32
  }
  func.func @transform_7(%arg0: i32) -> (i32, i32, i32) {
    %c0_i32 = arith.constant 0 : i32
    %c0_i32_0 = arith.constant 0 : i32
    %c0_i32_1 = arith.constant 0 : i32
    %c0_i32_2 = arith.constant 0 : i32
    return %c0_i32, %c0_i32_0, %c0_i32_1 : i32, i32, i32
  }
  func.func @transform_8(%arg0: i32) -> (i32, i32, i32) {
    %c0_i32 = arith.constant 0 : i32
    %c0_i32_0 = arith.constant 0 : i32
    %c0_i32_1 = arith.constant 0 : i32
    %c0_i32_2 = arith.constant 0 : i32
    return %c0_i32, %c0_i32_0, %c0_i32_1 : i32, i32, i32
  }
  func.func @transform_9(%arg0: i32) -> (i32, i32) {
    %c0_i32 = arith.constant 0 : i32
    %c0_i32_0 = arith.constant 0 : i32
    %c0_i32_1 = arith.constant 0 : i32
    return %c0_i32, %c0_i32_0 : i32, i32
  }
  func.func @transform_10(%arg0: i32) -> (i32, i32, i32) {
    %c0_i32 = arith.constant 0 : i32
    %c0_i32_0 = arith.constant 0 : i32
    %c0_i32_1 = arith.constant 0 : i32
    %c0_i32_2 = arith.constant 0 : i32
    return %c0_i32, %c0_i32_0, %c0_i32_1 : i32, i32, i32
  }
  func.func @transform_11(%arg0: i32) -> (i32, i32, i32) {
    %c0_i32 = arith.constant 0 : i32
    %c0_i32_0 = arith.constant 0 : i32
    %c0_i32_1 = arith.constant 0 : i32
    %c0_i32_2 = arith.constant 0 : i32
    return %c0_i32, %c0_i32_0, %c0_i32_1 : i32, i32, i32
  }
  func.func @transform_12(%arg0: i32) -> (i32, i32) {
    %c0_i32 = arith.constant 0 : i32
    %c0_i32_0 = arith.constant 0 : i32
    %c0_i32_1 = arith.constant 0 : i32
    return %c0_i32, %c0_i32_0 : i32, i32
  }
  func.func @transform_13(%arg0: i32) -> (i32, i32, i32) {
    %c0_i32 = arith.constant 0 : i32
    %c0_i32_0 = arith.constant 0 : i32
    %c0_i32_1 = arith.constant 0 : i32
    return %arg0, %c0_i32, %c0_i32_0 : i32, i32, i32
  }
}

</mosaic_0001>

<bundles_post_ra>
// kernel: tpu_custom_call.1
= control target key start
LH: loop header
LB: loop body
LE: loop exit
PB: predicated region body
PF: predicated region fallthrough
CT: control target
= control target key end

     0   :  { %s19208_s0 = inlined_call_operand.vmem [shape: f32[2,256,3], index: 0, kind: input, shape index: {}]   ;;  %s19209_s1 = inlined_call_operand.hbm [shape: f32[16,64,256], index: 1, kind: input, shape index: {}]   ;;  %s19210_s2 = inlined_call_operand.vmem [shape: f32[16,3,8], index: 2, kind: input, shape index: {}]   ;;  %s19211_s3 = inlined_call_operand.vmem [shape: f32[1,8], index: 3, kind: input, shape index: {}]   ;;  %s19212_s4 = inlined_call_operand.vmem [shape: f32[16,16,64], index: 4, kind: input, shape index: {}]   ;;  %s19213_s5 = inlined_call_operand.vmem [shape: f32[16,8,16], index: 5, kind: input, shape index: {}]   ;;  %s19214_s6 = inlined_call_operand.vmem [shape: f32[1,16], index: 6, kind: input, shape index: {}]   ;;  %s19215_s7 = inlined_call_operand.vmem [shape: f32[16,9,16], index: 7, kind: input, shape index: {}]   ;;  %s19216_s8 = inlined_call_operand.vmem [shape: f32[16,16,32], index: 8, kind: input, shape index: {}]   ;;  %s19217_s9 = inlined_call_operand.vmem [shape: f32[1,32], index: 9, kind: input, shape index: {}]   ;;  %s19218_s10 = inlined_call_operand.vmem [shape: f32[16,4,9], index: 10, kind: input, shape index: {}]   ;;  %s19219_s11 = inlined_call_operand.vmem [shape: f32[16,32,1], index: 11, kind: input, shape index: {}]   ;;  %s19220_s12 = inlined_call_operand.<no memory space> [shape: f32[1,1], index: 12, kind: input, shape index: {}]   ;;  %s19221_s13 = inlined_call_operand.vmem [shape: f32[2,4,1], index: 13, kind: output, shape index: {}]  }
   0x1   :  { %v18_v0 = vstv %s19220_s12 }
   0x2   :  { %19 = vst [vmem:[#allocation2] sm:$0x1] %v18_v0 }
   0x3   :  { %20 = vsyncpa [#allocation4], 0  ;;  %s17258_s27 = smov 0  }
   0x4 LB: > { %s17264_s28 = sadd.s32 4294967295, %s17176_s27   ;;  %p12723_p0 = scmp.ge.s32.totalorder %s17176_s27, 1  ;;  %s17176_s27 = sphi %s17258_s27, %s26_s27  }
   0x5   : > { %p335_p1 = scmp.lt.s32.totalorder %s17176_s27, 3  ;;  %s17178_s29 = smov [#allocation3]  }
   0x6   : > { %s347_s12 = sshll.u32 %s17178_s29, 4  ;;  %p19222_p3 = scmp.eq.s32.totalorder %s17264_s28, 0  ;;  %s348_s12 = int_to_ptr.vmem [resolvable:$true] %s347_s12 }
   0x7   : > { %p17268_p2 = pnand %p12723_p0, %p335_p1  ;;  %s17138_s17 = scalar_lea.hbm %s19209_s1, 32768 }
   0x8   : > { %p17139_p6 = scmp.ne.s32.totalorder %s19209_s1, %s17138_s17  ;;  %p17145_p10 = scmp.lt.u32.totalorder %s17138_s17, %s19209_s1 }
   0x9   : > { %s19224_s30 = scalar_select %p17268_p2, 1, 0 }
   0xa   : > { %p17117_p4 = pneg %p17268_p2 }
   0xc   : > { %p17277_p5 = pnand %p19222_p3, %p17117_p4 }
   0xe   : > { %p17140_p7 = pneg %p17277_p5 }
  0x10   : > { %p17141_p8 = pnand %p17140_p7, %p17139_p6 }
  0x12   : > { %p17142_p9 = pneg %p17141_p8 }
  0x14   : > { %p17147_p11 = pnand %p17145_p10, %p17142_p9 }
  0x16   : > { %17150 = shalt.err (!%p17147_p11)
}
  0x17   : > { %s17151_s22 = scalar_lea.vmem %s348_s12, 32768  ;;  %p17159_p1 = scmp.lt.s32.totalorder %s348_s12, %s348_s12 }
  0x18   : > { %p17152_p12 = scmp.ne.s32.totalorder %s348_s12, %s17151_s22  ;;  %p17160_p4 = scmp.lt.s32.totalorder %s17151_s22, %s17151_s22 }
  0x1a   : > { %p17154_p13 = pnand %p17152_p12, %p17140_p7  ;;  %p17161_p3 = por %p17160_p4, %p17159_p1 }
  0x1c   : > { %p17155_p0 = pneg %p17154_p13 }
  0x1e   : > { %p17162_p2 = pnand %p17161_p3, %p17155_p0 }
  0x20   : > { %17165 = shalt.err (!%p17162_p2)
}
  0x21   : > { %s17179_s23 = smov 256   ;;  %s17180_s24 = smov 16  }
  0x22   : > { %17120 = dma.hbm_to_vmem [thread:$0]  (!%p17277_p5), %s19209_s1, 32768, %s348_s12, [#allocation4], %s17179_s23, %s17179_s23, %s17180_s24  }
  0x23   : > { %p19226_p6 = scmp.ne.s32.totalorder %s19224_s30, 0 }
  0x24   : > { %p19227_p8 = scmp.eq.s32.totalorder (!%p19226_p6), %s17264_s28, 0 }
  0x25   : > { %404 = sbr.rel (%p19226_p6) target bundleno = 6175 (0x181f), region = 72 }
  0x2c   : > { %17171 = dma.done.wait (%p19227_p8), [#allocation4], 32768   ;;  %p19228_p7 = pmov %p19227_p8 }
  0x2d   : > { %p447_p2 = scmp.lt.s32.totalorder %s17264_s28, 1  ;;  %v612_v26 = vld [vmem:[#allocation3 + $0x88] sm:$0xff]  ;;  %v611_v51 = vld [vmem:[#allocation3 + $0x80] sm:$0xff]  ;;  %v614_v53 = vld [vmem:[#allocation3 + $0x98] sm:$0xff]  ;;  %vm759_vm0 = vcmask 1042432   ;;  %vm734_vm1 = vcmask 23552  }
  0x2e   : > { %17173 = vsyncadd (%p19228_p7), [#allocation4], 4294934528  ;;  %691 = vmatprep.mubr.f32.mxu1 %v612_v26  ;;  %v489_v31 = vld [vmem:[#allocation3 + $0x8] sm:$0xff]  ;;  %v488_v52 = vld [vmem:[#allocation3] sm:$0xff]  ;;  %vm4737_vm2 = vcmask 523264   ;;  %vm4906_vm11 = vcmask 64512  }
  0x2f   : > { %s19232_s28 = smov (!%p447_p2, %s17264_s28), 1  ;;  %568 = vmatprep.mubr.f32.mxu0 %v489_v31  ;;  %v491_v54 = vld [vmem:[#allocation3 + $0x18] sm:$0xff]  ;;  %v613_v55 = vld [vmem:[#allocation3 + $0x90] sm:$0xff]  ;;  %v616_v57 = vld [vmem:[#allocation3 + $0xa8] sm:$0xff]  ;;  %vm7452_vm12 = vcmask 130048   ;;  %vm17182_vm15 = vmmov 0  }
  0x30   : > { %s13252_s29 = sshll.u32 %s19232_s28, 8  ;;  %v490_v56 = vld [vmem:[#allocation3 + $0x10] sm:$0xff]  ;;  %v493_v58 = vld [vmem:[#allocation3 + $0x28] sm:$0xff]  ;;  %v615_v59 = vld [vmem:[#allocation3 + $0xa0] sm:$0xff]  ;;  %s12730_s21 = sshll.u32 %s19232_s28, 2 }
  0x31   : > { %s17311_s12 = scalar_lea.vmem %s19208_s0, %s13252_s29  ;;  %v492_v60 = vld [vmem:[#allocation3 + $0x20] sm:$0xff]  ;;  %v618_v61 = vld [vmem:[#allocation3 + $0xb8] sm:$0xff]  ;;  %v617_v63 = vld [vmem:[#allocation3 + $0xb0] sm:$0xff]  ;;  %s455_s24 = scalar_lea.vmem %s19221_s13, %s12730_s21 }
  0x32   : > { %v472_v1 = vld [vmem:[%s17311_s12 + $0x80] sm:$0xff]  ;;  %v473_v2 = vld [vmem:[%s17311_s12 + $0x88] sm:$0xff]  ;;  %v474_v6 = vld [vmem:[%s17311_s12 + $0x90] sm:$0xff] }
  0x33   : > { %v456_v3 = vld [vmem:[%s17311_s12] sm:$0xff]  ;;  %v17316_v4 = vpack.c.bf16 %v473_v2, %v472_v1  ;;  %v457_v5 = vld [vmem:[%s17311_s12 + $0x8] sm:$0xff]  ;;  %v475_v7 = vld [vmem:[%s17311_s12 + $0x98] sm:$0xff] }
  0x34   : > { %v17321_v8 = vpack.c.bf16 %v457_v5, %v456_v3  ;;  %v17323_v9 = vpack.c.bf16 %v475_v7, %v474_v6  ;;  %v458_v10 = vld [vmem:[%s17311_s12 + $0x10] sm:$0xff]  ;;  %v459_v11 = vld [vmem:[%s17311_s12 + $0x18] sm:$0xff]  ;;  %v476_v12 = vld [vmem:[%s17311_s12 + $0xa0] sm:$0xff] }
  0x35   : > { %15910 = vmatprep.subr.bf16.mxu1 %v17316_v4  ;;  %v477_v13 = vld [vmem:[%s17311_s12 + $0xa8] sm:$0xff]  ;;  %15878 = vmatprep.subr.bf16.mxu0 %v17316_v4  ;;  %v17332_v14 = vpack.c.bf16 %v459_v11, %v458_v10  ;;  %v460_v16 = vld [vmem:[%s17311_s12 + $0x20] sm:$0xff]  ;;  %v478_v18 = vld [vmem:[%s17311_s12 + $0xb0] sm:$0xff] }
  0x36   : > { %15912 = vmatpush3.bf16.msra.mxu1 %v17321_v8  ;;  %15880 = vmatpush3.bf16.msra.mxu0 %v17321_v8  ;;  %v17336_v15 = vpack.c.bf16 %v477_v13, %v476_v12  ;;  %v461_v17 = vld [vmem:[%s17311_s12 + $0x28] sm:$0xff]  ;;  %v479_v19 = vld [vmem:[%s17311_s12 + $0xb8] sm:$0xff]  ;;  %v462_v22 = vld [vmem:[%s17311_s12 + $0x30] sm:$0xff] }
  0x37   : > { %15914 = vmatprep.subr.bf16.mxu1 %v17323_v9  ;;  %15882 = vmatprep.subr.bf16.mxu0 %v17323_v9  ;;  %v17344_v20 = vpack.c.bf16 %v461_v17, %v460_v16  ;;  %v17348_v21 = vpack.c.bf16 %v479_v19, %v478_v18  ;;  %v463_v23 = vld [vmem:[%s17311_s12 + $0x38] sm:$0xff]  ;;  %v480_v24 = vld [vmem:[%s17311_s12 + $0xc0] sm:$0xff]  ;;  %v481_v25 = vld [vmem:[%s17311_s12 + $0xc8] sm:$0xff] }
  0x38   : > { %v17356_v27 = vpack.c.bf16 %v463_v23, %v462_v22  ;;  %v17360_v28 = vpack.c.bf16 %v481_v25, %v480_v24  ;;  %v464_v29 = vld [vmem:[%s17311_s12 + $0x40] sm:$0xff]  ;;  %v465_v30 = vld [vmem:[%s17311_s12 + $0x48] sm:$0xff]  ;;  %v482_v32 = vld [vmem:[%s17311_s12 + $0xd0] sm:$0xff] }
  0x39   : > { %v483_v33 = vld [vmem:[%s17311_s12 + $0xd8] sm:$0xff]  ;;  %v17368_v34 = vpack.c.bf16 %v465_v30, %v464_v29  ;;  %v466_v36 = vld [vmem:[%s17311_s12 + $0x50] sm:$0xff]  ;;  %v484_v38 = vld [vmem:[%s17311_s12 + $0xe0] sm:$0xff] }
  0x3a   : > { %15916 = vmatpush3.bf16.msra.mxu1 %v17332_v14  ;;  %15884 = vmatpush3.bf16.msra.mxu0 %v17332_v14  ;;  %v17372_v35 = vpack.c.bf16 %v483_v33, %v482_v32  ;;  %v467_v37 = vld [vmem:[%s17311_s12 + $0x58] sm:$0xff]  ;;  %v485_v39 = vld [vmem:[%s17311_s12 + $0xe8] sm:$0xff]  ;;  %v468_v42 = vld [vmem:[%s17311_s12 + $0x60] sm:$0xff] }
  0x3b   : > { %15918 = vmatprep.subr.bf16.mxu1 %v17336_v15  ;;  %15886 = vmatprep.subr.bf16.mxu0 %v17336_v15  ;;  %v17380_v40 = vpack.c.bf16 %v467_v37, %v466_v36  ;;  %v17384_v41 = vpack.c.bf16 %v485_v39, %v484_v38  ;;  %v469_v43 = vld [vmem:[%s17311_s12 + $0x68] sm:$0xff]  ;;  %v486_v44 = vld [vmem:[%s17311_s12 + $0xf0] sm:$0xff]  ;;  %v487_v45 = vld [vmem:[%s17311_s12 + $0xf8] sm:$0xff] }
  0x3c   : > { %v17392_v46 = vpack.c.bf16 %v469_v43, %v468_v42  ;;  %v17396_v47 = vpack.c.bf16 %v487_v45, %v486_v44  ;;  %v470_v48 = vld [vmem:[%s17311_s12 + $0x70] sm:$0xff]  ;;  %v471_v49 = vld [vmem:[%s17311_s12 + $0x78] sm:$0xff]  ;;  %v619_v3 = vld [vmem:[#allocation3 + $0xc0] sm:$0xff] }
  0x3d   : > { %v17402_v50 = vpack.c.bf16 %v471_v49, %v470_v48  ;;  %v495_v62 = vld [vmem:[#allocation3 + $0x38] sm:$0xff]  ;;  %v494_v0 = vld [vmem:[#allocation3 + $0x30] sm:$0xff]  ;;  %v620_v1 = vld [vmem:[#allocation3 + $0xc8] sm:$0xff] }
  0x3e   : > { %15920 = vmatpush3.bf16.msra.mxu1 %v17344_v20  ;;  %15888 = vmatpush3.bf16.msra.mxu0 %v17344_v20  ;;  %v497_v2 = vld [vmem:[#allocation3 + $0x48] sm:$0xff]  ;;  %v496_v5 = vld [vmem:[#allocation3 + $0x40] sm:$0xff]  ;;  %v622_v6 = vld [vmem:[#allocation3 + $0xd8] sm:$0xff] }
  0x3f   : > { %15922 = vmatprep.subr.bf16.mxu1 %v17348_v21  ;;  %15890 = vmatprep.subr.bf16.mxu0 %v17348_v21  ;;  %v499_v7 = vld [vmem:[#allocation3 + $0x58] sm:$0xff]  ;;  %v621_v10 = vld [vmem:[#allocation3 + $0xd0] sm:$0xff]  ;;  %v624_v12 = vld [vmem:[#allocation3 + $0xe8] sm:$0xff] }
  0x40   : > { %v498_v11 = vld [vmem:[#allocation3 + $0x50] sm:$0xff]  ;;  %v501_v13 = vld [vmem:[#allocation3 + $0x68] sm:$0xff]  ;;  %v623_v16 = vld [vmem:[#allocation3 + $0xe0] sm:$0xff] }
  0x41   : > { %v500_v17 = vld [vmem:[#allocation3 + $0x60] sm:$0xff]  ;;  %v626_v18 = vld [vmem:[#allocation3 + $0xf8] sm:$0xff]  ;;  %v625_v22 = vld [vmem:[#allocation3 + $0xf0] sm:$0xff] }
  0x42   : > { %15924 = vmatpush3.bf16.msra.mxu1 %v17356_v27  ;;  %15892 = vmatpush3.bf16.msra.mxu0 %v17356_v27  ;;  %v503_v19 = vld [vmem:[#allocation3 + $0x78] sm:$0xff]  ;;  %v502_v23 = vld [vmem:[#allocation3 + $0x70] sm:$0xff]  ;;  %v1002_v24 = vld [vmem:[#allocation3 + $0x108] sm:$0xff] }
  0x43   : > { %15926 = vmatprep.subr.bf16.mxu1 %v17360_v28  ;;  %15894 = vmatprep.subr.bf16.mxu0 %v17360_v28  ;;  %v1001_v25 = vld [vmem:[#allocation3 + $0x100] sm:$0xff]  ;;  %v1004_v26 = vld [vmem:[#allocation3 + $0x118] sm:$0xff]  ;;  %v1003_v29 = vld [vmem:[#allocation3 + $0x110] sm:$0xff] }
  0x44   : > { %v1006_v30 = vld [vmem:[#allocation3 + $0x128] sm:$0xff]  ;;  %v1005_v31 = vld [vmem:[#allocation3 + $0x120] sm:$0xff]  ;;  %v1008_v32 = vld [vmem:[#allocation3 + $0x138] sm:$0xff] }
  0x45   : > { %v1007_v33 = vld [vmem:[#allocation3 + $0x130] sm:$0xff]  ;;  %v1010_v36 = vld [vmem:[#allocation3 + $0x148] sm:$0xff]  ;;  %v1009_v37 = vld [vmem:[#allocation3 + $0x140] sm:$0xff] }
  0x46   : > { %15928 = vmatpush3.bf16.msra.mxu1 %v17368_v34  ;;  %15896 = vmatpush3.bf16.msra.mxu0 %v17368_v34  ;;  %v1012_v38 = vld [vmem:[#allocation3 + $0x158] sm:$0xff]  ;;  %v1011_v39 = vld [vmem:[#allocation3 + $0x150] sm:$0xff]  ;;  %v1014_v42 = vld [vmem:[#allocation3 + $0x168] sm:$0xff] }
  0x47   : > { %15930 = vmatprep.subr.bf16.mxu1 %v17372_v35  ;;  %15898 = vmatprep.subr.bf16.mxu0 %v17372_v35  ;;  %v1013_v43 = vld [vmem:[#allocation3 + $0x160] sm:$0xff]  ;;  %v1016_v44 = vld [vmem:[#allocation3 + $0x178] sm:$0xff]  ;;  %v1015_v45 = vld [vmem:[#allocation3 + $0x170] sm:$0xff] }
  0x48   : > { %v1266_v48 = vld [vmem:[#allocation3 + $0x188] sm:$0xff]  ;;  %v1265_v49 = vld [vmem:[#allocation3 + $0x180] sm:$0xff] }
  0x4a   : > { %15932 = vmatpush3.bf16.msra.mxu1 %v17380_v40  ;;  %15900 = vmatpush3.bf16.msra.mxu0 %v17380_v40 }
  0x4b   : > { %15934 = vmatprep.subr.bf16.mxu1 %v17384_v41  ;;  %15902 = vmatprep.subr.bf16.mxu0 %v17384_v41 }
  0x4e   : > { %15936 = vmatpush3.bf16.msra.mxu1 %v17392_v46  ;;  %15904 = vmatpush3.bf16.msra.mxu0 %v17392_v46 }
  0x4f   : > { %15938 = vmatprep.subr.bf16.mxu1 %v17396_v47  ;;  %15906 = vmatprep.subr.bf16.mxu0 %v17396_v47 }
  0x52   : > { %15940 = vmatpush3.bf16.msra.mxu1 %v17402_v50  ;;  %15908 = vmatpush3.bf16.msra.mxu0 %v17402_v50 }
  0x53   : > { %15942 = vmatprep.subr.bf16.mxu1 %v17316_v4 }
  0x55   : > { %692 = vmatmul.mubr.f32.vlgmr.msra.gmra.mrb[0].mxu1 %v611_v51  ;;  %569 = vmatmul.mubr.f32.vlgmr.msra.gmra.mrb[0].mxu0 %v488_v52  ;;  %v1268_v51 = vld [vmem:[#allocation3 + $0x198] sm:$0xff]  ;;  %v1267_v52 = vld [vmem:[#allocation3 + $0x190] sm:$0xff] }
  0x56   : > { %15944 = vmatpush3.bf16.msra.mxu1 %v17321_v8  ;;  %696 = vmatprep.mubr.f32.mxu1 %v614_v53  ;;  %v1270_v53 = vld [vmem:[#allocation3 + $0x1a8] sm:$0xff] }
  0x57   : > { %15946 = vmatprep.subr.bf16.mxu1 %v17323_v9  ;;  %573 = vmatprep.mubr.f32.mxu0 %v491_v54  ;;  %v1269_v54 = vld [vmem:[#allocation3 + $0x1a0] sm:$0xff] }
  0x59   : > { %697 = vmatmul.mubr.f32.gmra.mrb[2].mxu1 %v613_v55  ;;  %574 = vmatmul.mubr.f32.gmra.mrb[2].mxu0 %v490_v56  ;;  %v1272_v55 = vld [vmem:[#allocation3 + $0x1b8] sm:$0xff]  ;;  %v1271_v56 = vld [vmem:[#allocation3 + $0x1b0] sm:$0xff] }
  0x5a   : > { %15948 = vmatpush3.bf16.msra.mxu1 %v17332_v14  ;;  %701 = vmatprep.mubr.f32.mxu1 %v616_v57  ;;  %v1274_v57 = vld [vmem:[#allocation3 + $0x1c8] sm:$0xff] }
  0x5b   : > { %15950 = vmatprep.subr.bf16.mxu1 %v17336_v15  ;;  %578 = vmatprep.mubr.f32.mxu0 %v493_v58  ;;  %v1273_v58 = vld [vmem:[#allocation3 + $0x1c0] sm:$0xff] }
  0x5d   : > { %702 = vmatmul.mubr.f32.gmra.mrb[4].mxu1 %v615_v59  ;;  %579 = vmatmul.mubr.f32.gmra.mrb[4].mxu0 %v492_v60  ;;  %v1276_v59 = vld [vmem:[#allocation3 + $0x1d8] sm:$0xff]  ;;  %v1275_v60 = vld [vmem:[#allocation3 + $0x1d0] sm:$0xff] }
  0x5e   : > { %15952 = vmatpush3.bf16.msra.mxu1 %v17344_v20  ;;  %706 = vmatprep.mubr.f32.mxu1 %v618_v61  ;;  %v1278_v61 = vld [vmem:[#allocation3 + $0x1e8] sm:$0xff] }
  0x5f   : > { %15954 = vmatprep.subr.bf16.mxu1 %v17348_v21  ;;  %583 = vmatprep.mubr.f32.mxu0 %v495_v62  ;;  %v1277_v62 = vld [vmem:[#allocation3 + $0x1e0] sm:$0xff] }
  0x61   : > { %707 = vmatmul.mubr.f32.gmra.mrb[6].mxu1 %v617_v63  ;;  %584 = vmatmul.mubr.f32.gmra.mrb[6].mxu0 %v494_v0  ;;  %v1280_v63 = vld [vmem:[#allocation3 + $0x1f8] sm:$0xff]  ;;  %v12731_v0 = vld [vmem:[%s19210_s2 + $0x4] sm:$0x7] }
  0x62   : > { %15956 = vmatpush3.bf16.msra.mxu1 %v17356_v27  ;;  %711 = vmatprep.mubr.f32.mxu1 %v620_v1  ;;  %v1279_v1 = vld [vmem:[#allocation3 + $0x1f0] sm:$0xff] }
  0x63   : > { %15958 = vmatprep.subr.bf16.mxu1 %v17360_v28  ;;  %588 = vmatprep.mubr.f32.mxu0 %v497_v2  ;;  %v1530_v2 = vld [vmem:[#allocation3 + $0x208] sm:$0xff] }
  0x64   : > { %14757 = vmatprep.subr.msk.mxu0 %vm759_vm0, %v12731_v0 }
  0x65   : > { %712 = vmatmul.mubr.f32.gmra.mrb[8].mxu1 %v619_v3  ;;  %589 = vmatmul.mubr.f32.gmra.mrb[8].mxu0 %v496_v5  ;;  %v1529_v3 = vld [vmem:[#allocation3 + $0x200] sm:$0xff]  ;;  %v1532_v5 = vld [vmem:[#allocation3 + $0x218] sm:$0xff] }
  0x66   : > { %15960 = vmatpush3.bf16.msra.mxu1 %v17368_v34  ;;  %716 = vmatprep.mubr.f32.mxu1 %v622_v6  ;;  %v1531_v6 = vld [vmem:[#allocation3 + $0x210] sm:$0xff] }
  0x67   : > { %15962 = vmatprep.subr.bf16.mxu1 %v17372_v35  ;;  %593 = vmatprep.mubr.f32.mxu0 %v499_v7  ;;  %v1534_v7 = vld [vmem:[#allocation3 + $0x228] sm:$0xff] }
  0x68   : > { %14758 = vmatpush3.msk.msra.mxu0 %vm759_vm0, %v12731_v0 }
  0x69   : > { %717 = vmatmul.mubr.f32.gmra.mrb[10].mxu1 %v621_v10  ;;  %594 = vmatmul.mubr.f32.gmra.mrb[10].mxu0 %v498_v11  ;;  %v1533_v10 = vld [vmem:[#allocation3 + $0x220] sm:$0xff]  ;;  %v1536_v11 = vld [vmem:[#allocation3 + $0x238] sm:$0xff] }
  0x6a   : > { %15964 = vmatpush3.bf16.msra.mxu1 %v17380_v40  ;;  %721 = vmatprep.mubr.f32.mxu1 %v624_v12  ;;  %v1535_v12 = vld [vmem:[#allocation3 + $0x230] sm:$0xff] }
  0x6b   : > { %15966 = vmatprep.subr.bf16.mxu1 %v17384_v41  ;;  %598 = vmatprep.mubr.f32.mxu0 %v501_v13  ;;  %v1538_v13 = vld [vmem:[#allocation3 + $0x248] sm:$0xff] }
  0x6d   : > { %722 = vmatmul.mubr.f32.gmra.mrb[12].mxu1 %v623_v16  ;;  %599 = vmatmul.mubr.f32.gmra.mrb[12].mxu0 %v500_v17  ;;  %v1537_v16 = vld [vmem:[#allocation3 + $0x240] sm:$0xff]  ;;  %v1540_v17 = vld [vmem:[#allocation3 + $0x258] sm:$0xff] }
  0x6e   : > { %15968 = vmatpush3.bf16.msra.mxu1 %v17392_v46  ;;  %726 = vmatprep.mubr.f32.mxu1 %v626_v18  ;;  %v1539_v18 = vld [vmem:[#allocation3 + $0x250] sm:$0xff] }
  0x6f   : > { %15970 = vmatprep.subr.bf16.mxu1 %v17396_v47  ;;  %603 = vmatprep.mubr.f32.mxu0 %v503_v19  ;;  %v1542_v19 = vld [vmem:[#allocation3 + $0x268] sm:$0xff] }
  0x71   : > { %727 = vmatmul.mubr.f32.gmra.mrb[14].mxu1 %v625_v22  ;;  %604 = vmatmul.mubr.f32.gmra.mrb[14].mxu0 %v502_v23  ;;  %v17476_v22 = vld [vmem:[%s19210_s2] sm:$0x7] }
  0x72   : > { %15972 = vmatpush3.bf16.msra.mxu1 %v17402_v50  ;;  %1081 = vmatprep.mubr.f32.mxu1 %v1002_v24  ;;  %v1541_v23 = vld [vmem:[#allocation3 + $0x260] sm:$0xff]  ;;  %v1544_v24 = vld [vmem:[#allocation3 + $0x278] sm:$0xff] }
  0x73   : > { %15974 = vmatprep.subr.bf16.mxu1 %v17316_v4  ;;  %14771 = vmatprep.subr.msk.mxu0 %vm759_vm0, %v17476_v22 }
  0x75   : > { %1082 = vmatmul.mubr.f32.vlgmr.msra.gmra.mrb[16].mxu1 %v1001_v25  ;;  %v1543_v25 = vld [vmem:[#allocation3 + $0x270] sm:$0xff] }
  0x76   : > { %15976 = vmatpush3.bf16.msra.mxu1 %v17321_v8  ;;  %1086 = vmatprep.mubr.f32.mxu1 %v1004_v26  ;;  %v2058_v26 = vld [vmem:[#allocation3 + $0x308] sm:$0xff] }
  0x77   : > { %15978 = vmatprep.subr.bf16.mxu1 %v17323_v9 }
  0x79   : > { %1087 = vmatmul.mubr.f32.gmra.mrb[18].mxu1 %v1003_v29  ;;  %v2057_v29 = vld [vmem:[#allocation3 + $0x300] sm:$0xff] }
  0x7a   : > { %15980 = vmatpush3.bf16.msra.mxu1 %v17332_v14  ;;  %1091 = vmatprep.mubr.f32.mxu1 %v1006_v30  ;;  %v2060_v30 = vld [vmem:[#allocation3 + $0x318] sm:$0xff] }
  0x7b   : > { %15982 = vmatprep.subr.bf16.mxu1 %v17336_v15 }
  0x7d   : > { %1092 = vmatmul.mubr.f32.gmra.mrb[20].mxu1 %v1005_v31  ;;  %v2059_v31 = vld [vmem:[#allocation3 + $0x310] sm:$0xff] }
  0x7e   : > { %15984 = vmatpush3.bf16.msra.mxu1 %v17344_v20  ;;  %1096 = vmatprep.mubr.f32.mxu1 %v1008_v32  ;;  %v2062_v32 = vld [vmem:[#allocation3 + $0x328] sm:$0xff] }
  0x7f   : > { %15986 = vmatprep.subr.bf16.mxu1 %v17348_v21 }
  0x81   : > { %1097 = vmatmul.mubr.f32.gmra.mrb[22].mxu1 %v1007_v33  ;;  %v2061_v33 = vld [vmem:[#allocation3 + $0x320] sm:$0xff] }
  0x82   : > { %15988 = vmatpush3.bf16.msra.mxu1 %v17356_v27  ;;  %1101 = vmatprep.mubr.f32.mxu1 %v1010_v36  ;;  %v2064_v36 = vld [vmem:[#allocation3 + $0x338] sm:$0xff] }
  0x83   : > { %15990 = vmatprep.subr.bf16.mxu1 %v17360_v28 }
  0x85   : > { %1102 = vmatmul.mubr.f32.gmra.mrb[24].mxu1 %v1009_v37  ;;  %v2063_v37 = vld [vmem:[#allocation3 + $0x330] sm:$0xff] }
  0x86   : > { %15992 = vmatpush3.bf16.msra.mxu1 %v17368_v34  ;;  %1106 = vmatprep.mubr.f32.mxu1 %v1012_v38 }
  0x87   : > { %15994 = vmatprep.subr.bf16.mxu1 %v17372_v35 }
  0x89   : > { %1107 = vmatmul.mubr.f32.gmra.mrb[26].mxu1 %v1011_v39 }
  0x8a   : > { %15996 = vmatpush3.bf16.msra.mxu1 %v17380_v40  ;;  %1111 = vmatprep.mubr.f32.mxu1 %v1014_v42 }
  0x8b   : > { %15998 = vmatprep.subr.bf16.mxu1 %v17384_v41 }
  0x8d   : > { %1112 = vmatmul.mubr.f32.gmra.mrb[28].mxu1 %v1013_v43 }
  0x8e   : > { %16000 = vmatpush3.bf16.msra.mxu1 %v17392_v46  ;;  %1116 = vmatprep.mubr.f32.mxu1 %v1016_v44  ;;  %v2066_v44 = vld [vmem:[#allocation3 + $0x348] sm:$0xff] }
  0x8f   : > { %16002 = vmatprep.subr.bf16.mxu1 %v17396_v47 }
  0x91   : > { %1117 = vmatmul.mubr.f32.gmra.mrb[30].mxu1 %v1015_v45  ;;  %v2065_v45 = vld [vmem:[#allocation3 + $0x340] sm:$0xff] }
  0x92   : > { %16004 = vmatpush3.bf16.msra.mxu1 %v17402_v50  ;;  %1345 = vmatprep.mubr.f32.mxu1 %v1266_v48 }
  0x93   : > { %16006 = vmatprep.subr.bf16.mxu1 %v17316_v4 }
  0x95   : > { %1346 = vmatmul.mubr.f32.vlgmr.msra.gmra.mrb[32].mxu1 %v1265_v49 }
  0x96   : > { %16008 = vmatpush3.bf16.msra.mxu1 %v17321_v8  ;;  %1350 = vmatprep.mubr.f32.mxu1 %v1268_v51 }
  0x97   : > { %16010 = vmatprep.subr.bf16.mxu1 %v17323_v9 }
  0x99   : > { %1351 = vmatmul.mubr.f32.gmra.mrb[34].mxu1 %v1267_v52 }
  0x9a   : > { %16012 = vmatpush3.bf16.msra.mxu1 %v17332_v14  ;;  %1355 = vmatprep.mubr.f32.mxu1 %v1270_v53 }
  0x9b   : > { %16014 = vmatprep.subr.bf16.mxu1 %v17336_v15 }
  0x9d   : > { %1356 = vmatmul.mubr.f32.gmra.mrb[36].mxu1 %v1269_v54 }
  0x9e   : > { %16016 = vmatpush3.bf16.msra.mxu1 %v17344_v20  ;;  %1360 = vmatprep.mubr.f32.mxu1 %v1272_v55  ;;  %v2068_v55 = vld [vmem:[#allocation3 + $0x358] sm:$0xff] }
  0x9f   : > { %16018 = vmatprep.subr.bf16.mxu1 %v17348_v21 }
  0xa1   : > { %1361 = vmatmul.mubr.f32.gmra.mrb[38].mxu1 %v1271_v56  ;;  %v2067_v56 = vld [vmem:[#allocation3 + $0x350] sm:$0xff] }
  0xa2   : > { %16020 = vmatpush3.bf16.msra.mxu1 %v17356_v27  ;;  %1365 = vmatprep.mubr.f32.mxu1 %v1274_v57 }
  0xa3   : > { %16022 = vmatprep.subr.bf16.mxu1 %v17360_v28 }
  0xa5   : > { %1366 = vmatmul.mubr.f32.gmra.mrb[40].mxu1 %v1273_v58 }
  0xa6   : > { %16024 = vmatpush3.bf16.msra.mxu1 %v17368_v34  ;;  %1370 = vmatprep.mubr.f32.mxu1 %v1276_v59  ;;  %v17504_v59 = vld [vmem:[%s19210_s2 + $0x8] sm:$0x7] }
  0xa7   : > { %16026 = vmatprep.subr.bf16.mxu1 %v17372_v35 }
  0xa9   : > { %1371 = vmatmul.mubr.f32.gmra.mrb[42].mxu1 %v1275_v60 }
  0xaa   : > { %16028 = vmatpush3.bf16.msra.mxu1 %v17380_v40  ;;  %1375 = vmatprep.mubr.f32.mxu1 %v1278_v61 }
  0xab   : > { %16030 = vmatprep.subr.bf16.mxu1 %v17384_v41 }
  0xad   : > { %1376 = vmatmul.mubr.f32.gmra.mrb[44].mxu1 %v1277_v62  ;;  %v2070_v62 = vld [vmem:[#allocation3 + $0x368] sm:$0xff] }
  0xae   : > { %16032 = vmatpush3.bf16.msra.mxu1 %v17392_v46  ;;  %1380 = vmatprep.mubr.f32.mxu1 %v1280_v63 }
  0xaf   : > { %16034 = vmatprep.subr.bf16.mxu1 %v17396_v47 }
  0xb1   : > { %1381 = vmatmul.mubr.f32.gmra.mrb[46].mxu1 %v1279_v1  ;;  %v2069_v1 = vld [vmem:[#allocation3 + $0x360] sm:$0xff] }
  0xb2   : > { %16036 = vmatpush3.bf16.msra.mxu1 %v17402_v50  ;;  %1609 = vmatprep.mubr.f32.mxu1 %v1530_v2 }
  0xb3   : > { %16070 = vmatprep.subr.bf16.mxu1 %v17316_v4 }
  0xb5   : > { %1610 = vmatmul.mubr.f32.vlgmr.msra.gmra.mrb[48].mxu1 %v1529_v3 }
  0xb6   : > { %1614 = vmatprep.mubr.f32.mxu1 %v1532_v5  ;;  %16072 = vmatpush3.bf16.msra.mxu1 %v17321_v8 }
  0xb7   : > { %16074 = vmatprep.subr.bf16.mxu1 %v17323_v9 }
  0xb9   : > { %1615 = vmatmul.mubr.f32.gmra.mrb[50].mxu1 %v1531_v6 }
  0xba   : > { %1619 = vmatprep.mubr.f32.mxu1 %v1534_v7  ;;  %16076 = vmatpush3.bf16.msra.mxu1 %v17332_v14  ;;  %v2072_v7 = vld [vmem:[#allocation3 + $0x378] sm:$0xff] }
  0xbb   : > { %16078 = vmatprep.subr.bf16.mxu1 %v17336_v15 }
  0xbd   : > { %1620 = vmatmul.mubr.f32.gmra.mrb[52].mxu1 %v1533_v10 }
  0xbe   : > { %1624 = vmatprep.mubr.f32.mxu1 %v1536_v11  ;;  %16080 = vmatpush3.bf16.msra.mxu1 %v17344_v20 }
  0xbf   : > { %16082 = vmatprep.subr.bf16.mxu1 %v17348_v21 }
  0xc1   : > { %1625 = vmatmul.mubr.f32.gmra.mrb[54].mxu1 %v1535_v12  ;;  %v2071_v12 = vld [vmem:[#allocation3 + $0x370] sm:$0xff] }
  0xc2   : > { %1629 = vmatprep.mubr.f32.mxu1 %v1538_v13  ;;  %16084 = vmatpush3.bf16.msra.mxu1 %v17356_v27 }
  0xc3   : > { %16086 = vmatprep.subr.bf16.mxu1 %v17360_v28 }
  0xc5   : > { %1630 = vmatmul.mubr.f32.gmra.mrb[56].mxu1 %v1537_v16 }
  0xc6   : > { %1634 = vmatprep.mubr.f32.mxu1 %v1540_v17  ;;  %16088 = vmatpush3.bf16.msra.mxu1 %v17368_v34 }
  0xc7   : > { %16090 = vmatprep.subr.bf16.mxu1 %v17372_v35 }
  0xc9   : > { %1635 = vmatmul.mubr.f32.gmra.mrb[58].mxu1 %v1539_v18 }
  0xca   : > { %1639 = vmatprep.mubr.f32.mxu1 %v1542_v19  ;;  %16092 = vmatpush3.bf16.msra.mxu1 %v17380_v40  ;;  %v2322_v19 = vld [vmem:[#allocation3 + $0x388] sm:$0xff] }
  0xcb   : > { %16094 = vmatprep.subr.bf16.mxu1 %v17384_v41 }
  0xcd   : > { %1640 = vmatmul.mubr.f32.gmra.mrb[60].mxu1 %v1541_v23 }
  0xce   : > { %1644 = vmatprep.mubr.f32.mxu1 %v1544_v24  ;;  %16096 = vmatpush3.bf16.msra.mxu1 %v17392_v46  ;;  %v2321_v24 = vld [vmem:[#allocation3 + $0x380] sm:$0xff] }
  0xcf   : > { %16098 = vmatprep.subr.bf16.mxu1 %v17396_v47 }
  0xd1   : > { %1645 = vmatmul.mubr.f32.gmra.mrb[62].mxu1 %v1543_v25 }
  0xd2   : > { %16100 = vmatpush3.bf16.msra.mxu1 %v17402_v50  ;;  %2137 = vmatprep.mubr.f32.mxu1 %v2058_v26 }
  0xd3   : > { %16102 = vmatprep.subr.bf16.mxu1 %v17316_v4 }
  0xd5   : > { %2138 = vmatmul.mubr.f32.vlgmr.msra.gmra.mrb[64].mxu1 %v2057_v29 }
  0xd6   : > { %16104 = vmatpush3.bf16.msra.mxu1 %v17321_v8  ;;  %2142 = vmatprep.mubr.f32.mxu1 %v2060_v30 }
  0xd7   : > { %16106 = vmatprep.subr.bf16.mxu1 %v17323_v9 }
  0xd9   : > { %2143 = vmatmul.mubr.f32.gmra.mrb[66].mxu1 %v2059_v31  ;;  %v2324_v31 = vld [vmem:[#allocation3 + $0x398] sm:$0xff] }
  0xda   : > { %16108 = vmatpush3.bf16.msra.mxu1 %v17332_v14  ;;  %2147 = vmatprep.mubr.f32.mxu1 %v2062_v32 }
  0xdb   : > { %16110 = vmatprep.subr.bf16.mxu1 %v17336_v15 }
  0xdd   : > { %2148 = vmatmul.mubr.f32.gmra.mrb[68].mxu1 %v2061_v33 }
  0xde   : > { %16112 = vmatpush3.bf16.msra.mxu1 %v17344_v20  ;;  %2152 = vmatprep.mubr.f32.mxu1 %v2064_v36  ;;  %v2323_v36 = vld [vmem:[#allocation3 + $0x390] sm:$0xff] }
  0xdf   : > { %16114 = vmatprep.subr.bf16.mxu1 %v17348_v21 }
  0xe1   : > { %2153 = vmatmul.mubr.f32.gmra.mrb[70].mxu1 %v2063_v37 }
  0xe2   : > { %16116 = vmatpush3.bf16.msra.mxu1 %v17356_v27  ;;  %2157 = vmatprep.mubr.f32.mxu1 %v2066_v44 }
  0xe3   : > { %16118 = vmatprep.subr.bf16.mxu1 %v17360_v28 }
  0xe5   : > { %2158 = vmatmul.mubr.f32.gmra.mrb[72].mxu1 %v2065_v45 }
  0xe6   : > { %16120 = vmatpush3.bf16.msra.mxu1 %v17368_v34  ;;  %2162 = vmatprep.mubr.f32.mxu1 %v2068_v55  ;;  %v2328_v55 = vld [vmem:[#allocation3 + $0x3b8] sm:$0xff] }
  0xe7   : > { %16122 = vmatprep.subr.bf16.mxu1 %v17372_v35 }
  0xe9   : > { %2163 = vmatmul.mubr.f32.gmra.mrb[74].mxu1 %v2067_v56 }
  0xea   : > { %16124 = vmatpush3.bf16.msra.mxu1 %v17380_v40  ;;  %2167 = vmatprep.mubr.f32.mxu1 %v2070_v62 }
  0xeb   : > { %16126 = vmatprep.subr.bf16.mxu1 %v17384_v41 }
  0xed   : > { %2168 = vmatmul.mubr.f32.gmra.mrb[76].mxu1 %v2069_v1 }
  0xee   : > { %16128 = vmatpush3.bf16.msra.mxu1 %v17392_v46  ;;  %2172 = vmatprep.mubr.f32.mxu1 %v2072_v7 }
  0xef   : > { %16130 = vmatprep.subr.bf16.mxu1 %v17396_v47 }
  0xf1   : > { %2173 = vmatmul.mubr.f32.gmra.mrb[78].mxu1 %v2071_v12 }
  0xf2   : > { %16132 = vmatpush3.bf16.msra.mxu1 %v17402_v50  ;;  %2401 = vmatprep.mubr.f32.mxu1 %v2322_v19 }
  0xf3   : > { %16134 = vmatprep.subr.bf16.mxu1 %v17316_v4 }
  0xf5   : > { %2402 = vmatmul.mubr.f32.vlgmr.msra.gmra.mrb[80].mxu1 %v2321_v24  ;;  %v2586_v24 = vld [vmem:[#allocation3 + $0x408] sm:$0xff] }
  0xf6   : > { %16136 = vmatpush3.bf16.msra.mxu1 %v17321_v8  ;;  %2406 = vmatprep.mubr.f32.mxu1 %v2324_v31  ;;  %v17571_v31 = vld [vmem:[%s19210_s2 + $0x10] sm:$0x7] }
  0xf7   : > { %16138 = vmatprep.subr.bf16.mxu1 %v17323_v9 }
  0xf9   : > { %2407 = vmatmul.mubr.f32.gmra.mrb[82].mxu1 %v2323_v36  ;;  %v2587_v36 = vld [vmem:[#allocation3 + $0x410] sm:$0xff] }
  0xfa   : > { %16140 = vmatpush3.bf16.msra.mxu1 %v17332_v14 }
  0xfb   : > { %16142 = vmatprep.subr.bf16.mxu1 %v17336_v15 }
  0xfe   : > { %16144 = vmatpush3.bf16.msra.mxu1 %v17344_v20 }
  0xff   : > { %16146 = vmatprep.subr.bf16.mxu1 %v17348_v21 }
 0x102   : > { %16148 = vmatpush3.bf16.msra.mxu1 %v17356_v27 }
 0x103   : > { %16150 = vmatprep.subr.bf16.mxu1 %v17360_v28 }
 0x106   : > { %16152 = vmatpush3.bf16.msra.mxu1 %v17368_v34 }
 0x107   : > { %16154 = vmatprep.subr.bf16.mxu1 %v17372_v35 }
 0x10a   : > { %16156 = vmatpush3.bf16.msra.mxu1 %v17380_v40 }
 0x10b   : > { %16158 = vmatprep.subr.bf16.mxu1 %v17384_v41 }
 0x10e   : > { %16160 = vmatpush3.bf16.msra.mxu1 %v17392_v46 }
 0x10f   : > { %16162 = vmatprep.subr.bf16.mxu1 %v17396_v47 }
 0x112   : > { %16164 = vmatpush3.bf16.msra.mxu1 %v17402_v50 }
 0x113   : > { %16166 = vmatprep.subr.bf16.mxu1 %v17316_v4 }
 0x128   : > { %v13341_v38 = vpop.f32.mrb[0].mxu1  ;;  %v13285_v39 = vpop.f32.mrb[0].mxu0 }
 0x129   : > { %v13342_v42 = vpop.f32.mrb[1].mxu1  ;;  %v13286_v43 = vpop.f32.mrb[1].mxu0 }
 0x12a   : > { %v13343_v48 = vadd.f32 %v13342_v42, %v13341_v38  ;;  %v17494_v49 = vadd.f32 %v13286_v43, %v13285_v39  ;;  %v2326_v43 = vld [vmem:[#allocation3 + $0x3a8] sm:$0xff] }
 0x12b   : > { %2411 = vmatprep.mubr.f32.mxu1 %v2326_v43  ;;  %v2589_v43 = vld [vmem:[#allocation3 + $0x420] sm:$0xff] }
 0x12c   : > { %v13344_v51 = vpop.f32.mrb[2].mxu1  ;;  %14759 = vmatprep.mubr.msk.f32.mxu0 %vm734_vm1, %v13343_v48  ;;  %v13288_v52 = vpop.f32.mrb[2].mxu0  ;;  %v2325_v48 = vld [vmem:[#allocation3 + $0x3a0] sm:$0xff] }
 0x12d   : > { %v13345_v53 = vpop.f32.mrb[3].mxu1  ;;  %v13289_v54 = vpop.f32.mrb[3].mxu0  ;;  %2412 = vmatmul.mubr.f32.gmra.mrb[84].mxu1 %v2325_v48  ;;  %v2592_v48 = vld [vmem:[#allocation3 + $0x438] sm:$0xff] }
 0x12e   : > { %v13346_v57 = vadd.f32 %v13345_v53, %v13344_v51  ;;  %v17499_v58 = vadd.f32 %v13289_v54, %v13288_v52  ;;  %2416 = vmatprep.mubr.f32.mxu1 %v2328_v55  ;;  %v2594_v55 = vld [vmem:[#allocation3 + $0x448] sm:$0xff] }
 0x130   : > { %v13347_v60 = vpop.f32.mrb[4].mxu1  ;;  %14760 = vmatmul.mubr.msk.f32.vlgmr.msra.gmra.mrb[16].mxu0 %vm734_vm1, %v13346_v57  ;;  %v13291_v61 = vpop.f32.mrb[4].mxu0 }
 0x131   : > { %v13348_v63 = vpop.f32.mrb[5].mxu1  ;;  %v13292_v0 = vpop.f32.mrb[5].mxu0  ;;  %14772 = vmatpush3.msk.msra.mxu0 %vm759_vm0, %v17476_v22 }
 0x132   : > { %v13349_v2 = vadd.f32 %v13348_v63, %v13347_v60  ;;  %v17510_v3 = vadd.f32 %v13292_v0, %v13291_v61  ;;  %14785 = vmatprep.subr.msk.mxu0 %vm759_vm0, %v17504_v59  ;;  %v2327_v60 = vld [vmem:[#allocation3 + $0x3b0] sm:$0xff]  ;;  %v2330_v0 = vld [vmem:[#allocation3 + $0x3c8] sm:$0xff] }
 0x133   : > { %2417 = vmatmul.mubr.f32.gmra.mrb[86].mxu1 %v2327_v60 }
 0x134   : > { %v13350_v5 = vpop.f32.mrb[6].mxu1  ;;  %14762 = vmatprep.mubr.msk.f32.mxu0 %vm734_vm1, %v13349_v2  ;;  %v13294_v6 = vpop.f32.mrb[6].mxu0  ;;  %2421 = vmatprep.mubr.f32.mxu1 %v2330_v0  ;;  %v2329_v2 = vld [vmem:[#allocation3 + $0x3c0] sm:$0xff]  ;;  %v2595_v0 = vld [vmem:[#allocation3 + $0x450] sm:$0xff] }
 0x135   : > { %v13351_v10 = vpop.f32.mrb[7].mxu1  ;;  %v13295_v11 = vpop.f32.mrb[7].mxu0 }
 0x136   : > { %v13352_v13 = vadd.f32 %v13351_v10, %v13350_v5  ;;  %v17518_v16 = vadd.f32 %v13295_v11, %v13294_v6  ;;  %v12760_v6 = vld [vmem:[%s19210_s2 + $0xc] sm:$0x7]  ;;  %v2332_v10 = vld [vmem:[#allocation3 + $0x3d8] sm:$0xff]  ;;  %v2331_v11 = vld [vmem:[#allocation3 + $0x3d0] sm:$0xff] }
 0x137   : > { %2422 = vmatmul.mubr.f32.gmra.mrb[88].mxu1 %v2329_v2 }
 0x138   : > { %v13353_v17 = vpop.f32.mrb[8].mxu1  ;;  %14763 = vmatmul.mubr.msk.f32.gmra.mrb[18].mxu0 %vm734_vm1, %v13352_v13  ;;  %v13297_v18 = vpop.f32.mrb[8].mxu0  ;;  %2426 = vmatprep.mubr.f32.mxu1 %v2332_v10  ;;  %v2334_v13 = vld [vmem:[#allocation3 + $0x3e8] sm:$0xff] }
 0x139   : > { %v13354_v22 = vpop.f32.mrb[9].mxu1  ;;  %v13298_v23 = vpop.f32.mrb[9].mxu0 }
 0x13a   : > { %v13355_v25 = vadd.f32 %v13354_v22, %v13353_v17  ;;  %v17523_v26 = vadd.f32 %v13298_v23, %v13297_v18  ;;  %v2333_v17 = vld [vmem:[#allocation3 + $0x3e0] sm:$0xff] }
 0x13b   : > { %2427 = vmatmul.mubr.f32.gmra.mrb[90].mxu1 %v2331_v11 }
 0x13c   : > { %v13356_v29 = vpop.f32.mrb[10].mxu1  ;;  %14765 = vmatprep.mubr.msk.f32.mxu0 %vm734_vm1, %v13355_v25  ;;  %v13300_v30 = vpop.f32.mrb[10].mxu0  ;;  %2431 = vmatprep.mubr.f32.mxu1 %v2334_v13  ;;  %v2599_v13 = vld [vmem:[#allocation3 + $0x470] sm:$0xff] }
 0x13d   : > { %v13357_v32 = vpop.f32.mrb[11].mxu1  ;;  %v13301_v33 = vpop.f32.mrb[11].mxu0 }
 0x13e   : > { %v13358_v37 = vadd.f32 %v13357_v32, %v13356_v29  ;;  %v17528_v38 = vadd.f32 %v13301_v33, %v13300_v30  ;;  %v2588_v32 = vld [vmem:[#allocation3 + $0x418] sm:$0xff] }
 0x13f   : > { %2432 = vmatmul.mubr.f32.gmra.mrb[92].mxu1 %v2333_v17 }
 0x140   : > { %v13359_v39 = vpop.f32.mrb[12].mxu1  ;;  %14766 = vmatmul.mubr.msk.f32.gmra.mrb[20].mxu0 %vm734_vm1, %v13358_v37  ;;  %v13303_v42 = vpop.f32.mrb[12].mxu0 }
 0x141   : > { %v13360_v44 = vpop.f32.mrb[13].mxu1  ;;  %v13304_v45 = vpop.f32.mrb[13].mxu0 }
 0x142   : > { %v13361_v51 = vadd.f32 %v13360_v44, %v13359_v39  ;;  %v13305_v52 = vadd.f32 %v13304_v45, %v13303_v42  ;;  %v2590_v39 = vld [vmem:[#allocation3 + $0x428] sm:$0xff] }
 0x144   : > { %v13362_v53 = vpop.f32.mrb[14].mxu1  ;;  %14768 = vmatprep.mubr.msk.f32.mxu0 %vm734_vm1, %v13361_v51  ;;  %v13306_v54 = vpop.f32.mrb[14].mxu0 }
 0x145   : > { %v13363_v56 = vpop.f32.mrb[15].mxu1  ;;  %v13307_v57 = vpop.f32.mrb[15].mxu0 }
 0x146   : > { %v13364_v61 = vadd.f32 %v13363_v56, %v13362_v53  ;;  %v13308_v62 = vadd.f32 %v13307_v57, %v13306_v54  ;;  %v2593_v57 = vld [vmem:[#allocation3 + $0x440] sm:$0xff] }
 0x148   : > { %14769 = vmatmul.mubr.msk.f32.gmra.mrb[22].mxu0 %vm734_vm1, %v13364_v61  ;;  %v13415_v63 = vpop.f32.mrb[16].mxu1 }
 0x149   : > { %v13416_v1 = vpop.f32.mrb[17].mxu1  ;;  %14773 = vmatprep.mubr.msk.f32.mxu0 %vm734_vm1, %v17494_v49 }
 0x14a   : > { %v13417_v5 = vadd.f32 %v13416_v1, %v13415_v63 }
 0x14c   : > { %14774 = vmatmul.mubr.msk.f32.vlgmr.msra.gmra.mrb[16].mxu0 %vm734_vm1, %v17499_v58  ;;  %v13418_v7 = vpop.f32.mrb[18].mxu1 }
 0x14d   : > { %v13419_v12 = vpop.f32.mrb[19].mxu1  ;;  %14776 = vmatprep.mubr.msk.f32.mxu0 %vm734_vm1, %v17510_v3  ;;  %14786 = vmatpush3.msk.msra.mxu0 %vm759_vm0, %v17504_v59  ;;  %v2336_v3 = vld [vmem:[#allocation3 + $0x3f8] sm:$0xff] }
 0x14e   : > { %v13420_v49 = vadd.f32 %v13419_v12, %v13418_v7  ;;  %14799 = vmatprep.subr.msk.mxu0 %vm759_vm0, %v12760_v6  ;;  %2436 = vmatprep.mubr.f32.mxu1 %v2336_v3  ;;  %v2597_v7 = vld [vmem:[#allocation3 + $0x460] sm:$0xff]  ;;  %v2600_v12 = vld [vmem:[#allocation3 + $0x478] sm:$0xff] }
 0x14f   : > { %v2849_v3 = vld [vmem:[#allocation3 + $0x480] sm:$0xff] }
 0x150   : > { %14777 = vmatmul.mubr.msk.f32.gmra.mrb[18].mxu0 %vm734_vm1, %v17518_v16  ;;  %v13421_v58 = vpop.f32.mrb[20].mxu1  ;;  %v2335_v16 = vld [vmem:[#allocation3 + $0x3f0] sm:$0xff] }
 0x151   : > { %v13422_v18 = vpop.f32.mrb[21].mxu1  ;;  %14779 = vmatprep.mubr.msk.f32.mxu0 %vm734_vm1, %v17523_v26  ;;  %2437 = vmatmul.mubr.f32.gmra.mrb[94].mxu1 %v2335_v16  ;;  %v2585_v26 = vld [vmem:[#allocation3 + $0x400] sm:$0xff]  ;;  %v2852_v16 = vld [vmem:[#allocation3 + $0x498] sm:$0xff] }
 0x152   : > { %v13423_v59 = vadd.f32 %v13422_v18, %v13421_v58  ;;  %2665 = vmatprep.mubr.f32.mxu1 %v2586_v24  ;;  %v2850_v18 = vld [vmem:[#allocation3 + $0x488] sm:$0xff]  ;;  %v2851_v24 = vld [vmem:[#allocation3 + $0x490] sm:$0xff] }
 0x154   : > { %14780 = vmatmul.mubr.msk.f32.gmra.mrb[20].mxu0 %vm734_vm1, %v17528_v38  ;;  %v13424_v19 = vpop.f32.mrb[22].mxu1 }
 0x155   : > { %v13425_v22 = vpop.f32.mrb[23].mxu1  ;;  %14782 = vmatprep.mubr.msk.f32.mxu0 %vm734_vm1, %v13305_v52  ;;  %2666 = vmatmul.mubr.f32.vlgmr.msra.gmra.mrb[96].mxu1 %v2585_v26  ;;  %v2591_v52 = vld [vmem:[#allocation3 + $0x430] sm:$0xff]  ;;  %v2854_v26 = vld [vmem:[#allocation3 + $0x4a8] sm:$0xff] }
 0x156   : > { %v13426_v23 = vadd.f32 %v13425_v22, %v13424_v19  ;;  %16168 = vmatpush3.bf16.msra.mxu1 %v17321_v8  ;;  %2670 = vmatprep.mubr.f32.mxu1 %v2588_v32 }
 0x157   : > { %16170 = vmatprep.subr.bf16.mxu1 %v17323_v9 }
 0x158   : > { %14783 = vmatmul.mubr.msk.f32.gmra.mrb[22].mxu0 %vm734_vm1, %v13308_v62  ;;  %v13427_v25 = vpop.f32.mrb[24].mxu1  ;;  %v2596_v62 = vld [vmem:[#allocation3 + $0x458] sm:$0xff] }
 0x159   : > { %v13428_v29 = vpop.f32.mrb[25].mxu1  ;;  %14787 = vmatprep.mubr.msk.f32.mxu0 %vm734_vm1, %v13417_v5  ;;  %2671 = vmatmul.mubr.f32.gmra.mrb[98].mxu1 %v2587_v36  ;;  %v2598_v5 = vld [vmem:[#allocation3 + $0x468] sm:$0xff] }
 0x15a   : > { %v13429_v30 = vadd.f32 %v13428_v29, %v13427_v25  ;;  %16172 = vmatpush3.bf16.msra.mxu1 %v17332_v14  ;;  %2675 = vmatprep.mubr.f32.mxu1 %v2590_v39 }
 0x15b   : > { %16174 = vmatprep.subr.bf16.mxu1 %v17336_v15 }
 0x15c   : > { %v13430_v33 = vpop.f32.mrb[26].mxu1  ;;  %14788 = vmatmul.mubr.msk.f32.vlgmr.msra.gmra.mrb[16].mxu0 %vm734_vm1, %v13420_v49 }
 0x15d   : > { %v13431_v37 = vpop.f32.mrb[27].mxu1  ;;  %14790 = vmatprep.mubr.msk.f32.mxu0 %vm734_vm1, %v13423_v59  ;;  %14800 = vmatpush3.msk.msra.mxu0 %vm759_vm0, %v12760_v6 }
 0x15e   : > { %v13432_v38 = vadd.f32 %v13431_v37, %v13430_v33  ;;  %14813 = vmatprep.subr.msk.mxu0 %vm759_vm0, %v17571_v31  ;;  %2676 = vmatmul.mubr.f32.gmra.mrb[100].mxu1 %v2589_v43  ;;  %v2856_v33 = vld [vmem:[#allocation3 + $0x4b8] sm:$0xff] }
 0x15f   : > { %16176 = vmatpush3.bf16.msra.mxu1 %v17344_v20  ;;  %2680 = vmatprep.mubr.f32.mxu1 %v2592_v48 }
 0x160   : > { %v13433_v42 = vpop.f32.mrb[28].mxu1  ;;  %14791 = vmatmul.mubr.msk.f32.gmra.mrb[18].mxu0 %vm734_vm1, %v13426_v23  ;;  %16178 = vmatprep.subr.bf16.mxu1 %v17348_v21 }
 0x161   : > { %v13434_v44 = vpop.f32.mrb[29].mxu1  ;;  %14793 = vmatprep.mubr.msk.f32.mxu0 %vm734_vm1, %v13429_v30 }
 0x162   : > { %v13435_v45 = vadd.f32 %v13434_v44, %v13433_v42  ;;  %2681 = vmatmul.mubr.f32.gmra.mrb[102].mxu1 %v2591_v52  ;;  %v2858_v42 = vld [vmem:[#allocation3 + $0x4c8] sm:$0xff] }
 0x163   : > { %16180 = vmatpush3.bf16.msra.mxu1 %v17356_v27  ;;  %2685 = vmatprep.mubr.f32.mxu1 %v2594_v55 }
 0x164   : > { %v13436_v51 = vpop.f32.mrb[30].mxu1  ;;  %14794 = vmatmul.mubr.msk.f32.gmra.mrb[20].mxu0 %vm734_vm1, %v13432_v38  ;;  %16182 = vmatprep.subr.bf16.mxu1 %v17360_v28  ;;  %v2855_v38 = vld [vmem:[#allocation3 + $0x4b0] sm:$0xff] }
 0x165   : > { %v13437_v53 = vpop.f32.mrb[31].mxu1  ;;  %14796 = vmatprep.mubr.msk.f32.mxu0 %vm734_vm1, %v13435_v45  ;;  %v2857_v45 = vld [vmem:[#allocation3 + $0x4c0] sm:$0xff] }
 0x166   : > { %v13438_v54 = vadd.f32 %v13437_v53, %v13436_v51  ;;  %2686 = vmatmul.mubr.f32.gmra.mrb[104].mxu1 %v2593_v57  ;;  %v2860_v51 = vld [vmem:[#allocation3 + $0x4d8] sm:$0xff] }
 0x167   : > { %16184 = vmatpush3.bf16.msra.mxu1 %v17368_v34  ;;  %2690 = vmatprep.mubr.f32.mxu1 %v2596_v62 }
 0x168   : > { %14797 = vmatmul.mubr.msk.f32.gmra.mrb[22].mxu0 %vm734_vm1, %v13438_v54  ;;  %v13480_v56 = vpop.f32.mrb[32].mxu1  ;;  %16186 = vmatprep.subr.bf16.mxu1 %v17372_v35  ;;  %v2859_v54 = vld [vmem:[#allocation3 + $0x4d0] sm:$0xff] }
 0x169   : > { %v13481_v60 = vpop.f32.mrb[33].mxu1 }
 0x16a   : > { %v13482_v61 = vadd.f32 %v13481_v60, %v13480_v56  ;;  %2691 = vmatmul.mubr.f32.gmra.mrb[106].mxu1 %v2595_v0  ;;  %v2862_v56 = vld [vmem:[#allocation3 + $0x4e8] sm:$0xff] }
 0x16b   : > { %16188 = vmatpush3.bf16.msra.mxu1 %v17380_v40  ;;  %2695 = vmatprep.mubr.f32.mxu1 %v2598_v5 }
 0x16c   : > { %v13483_v63 = vpop.f32.mrb[34].mxu1  ;;  %14801 = vmatprep.mubr.msk.f32.mxu0 %vm734_vm1, %v13482_v61  ;;  %16190 = vmatprep.subr.bf16.mxu1 %v17384_v41  ;;  %v2861_v61 = vld [vmem:[#allocation3 + $0x4e0] sm:$0xff] }
 0x16d   : > { %v13484_v1 = vpop.f32.mrb[35].mxu1 }
 0x16e   : > { %v13485_v2 = vadd.f32 %v13484_v1, %v13483_v63  ;;  %2696 = vmatmul.mubr.f32.gmra.mrb[108].mxu1 %v2597_v7  ;;  %v2864_v63 = vld [vmem:[#allocation3 + $0x4f8] sm:$0xff] }
 0x16f   : > { %16192 = vmatpush3.bf16.msra.mxu1 %v17392_v46  ;;  %2700 = vmatprep.mubr.f32.mxu1 %v2600_v12 }
 0x170   : > { %v13486_v6 = vpop.f32.mrb[36].mxu1  ;;  %14802 = vmatmul.mubr.msk.f32.vlgmr.msra.gmra.mrb[16].mxu0 %vm734_vm1, %v13485_v2  ;;  %16194 = vmatprep.subr.bf16.mxu1 %v17396_v47  ;;  %v2863_v2 = vld [vmem:[#allocation3 + $0x4f0] sm:$0xff] }
 0x171   : > { %v13487_v10 = vpop.f32.mrb[37].mxu1  ;;  %14814 = vmatpush3.msk.msra.mxu0 %vm759_vm0, %v17571_v31  ;;  %v2853_v31 = vld [vmem:[#allocation3 + $0x4a0] sm:$0xff] }
 0x172   : > { %v13488_v11 = vadd.f32 %v13487_v10, %v13486_v6  ;;  %16038 = vmatprep.subr.bf16.mxu0 %v17316_v4  ;;  %2701 = vmatmul.mubr.f32.gmra.mrb[110].mxu1 %v2599_v13 }
 0x173   : > { %16196 = vmatpush3.bf16.msra.mxu1 %v17402_v50  ;;  %2929 = vmatprep.mubr.f32.mxu1 %v2850_v18 }
 0x174   : > { %v13489_v49 = vpop.f32.mrb[38].mxu1  ;;  %14804 = vmatprep.mubr.msk.f32.mxu0 %vm734_vm1, %v13488_v11  ;;  %16230 = vmatprep.subr.bf16.mxu1 %v17316_v4 }
 0x175   : > { %v13490_v58 = vpop.f32.mrb[39].mxu1 }
 0x176   : > { %v13491_v17 = vadd.f32 %v13490_v58, %v13489_v49  ;;  %2930 = vmatmul.mubr.f32.vlgmr.msra.gmra.mrb[112].mxu1 %v2849_v3 }
 0x177   : > { %2934 = vmatprep.mubr.f32.mxu1 %v2852_v16  ;;  %16232 = vmatpush3.bf16.msra.mxu1 %v17321_v8  ;;  %v1794_v16 = vld [vmem:[#allocation3 + $0x288] sm:$0xff] }
 0x178   : > { %v13492_v59 = vpop.f32.mrb[40].mxu1  ;;  %14805 = vmatmul.mubr.msk.f32.gmra.mrb[18].mxu0 %vm734_vm1, %v13491_v17  ;;  %16234 = vmatprep.subr.bf16.mxu1 %v17323_v9 }
 0x179   : > { %v13493_v19 = vpop.f32.mrb[41].mxu1 }
 0x17a   : > { %v13494_v22 = vadd.f32 %v13493_v19, %v13492_v59  ;;  %2935 = vmatmul.mubr.f32.gmra.mrb[114].mxu1 %v2851_v24  ;;  %v1796_v24 = vld [vmem:[#allocation3 + $0x298] sm:$0xff] }
 0x17b   : > { %2939 = vmatprep.mubr.f32.mxu1 %v2854_v26  ;;  %16236 = vmatpush3.bf16.msra.mxu1 %v17332_v14  ;;  %v1798_v26 = vld [vmem:[#allocation3 + $0x2a8] sm:$0xff] }
 0x17c   : > { %v13495_v23 = vpop.f32.mrb[42].mxu1  ;;  %14807 = vmatprep.mubr.msk.f32.mxu0 %vm734_vm1, %v13494_v22  ;;  %16238 = vmatprep.subr.bf16.mxu1 %v17336_v15  ;;  %v12780_v22 = vld [vmem:[%s19210_s2 + $0x14] sm:$0x7] }
 0x17d   : > { %v13496_v25 = vpop.f32.mrb[43].mxu1 }
 0x17e   : > { %v13497_v29 = vadd.f32 %v13496_v25, %v13495_v23  ;;  %2940 = vmatmul.mubr.f32.gmra.mrb[116].mxu1 %v2853_v31  ;;  %v1793_v23 = vld [vmem:[#allocation3 + $0x280] sm:$0xff]  ;;  %v1795_v25 = vld [vmem:[#allocation3 + $0x290] sm:$0xff] }
 0x17f   : > { %2944 = vmatprep.mubr.f32.mxu1 %v2856_v33  ;;  %16240 = vmatpush3.bf16.msra.mxu1 %v17344_v20  ;;  %v1799_v31 = vld [vmem:[#allocation3 + $0x2b0] sm:$0xff]  ;;  %v1801_v33 = vld [vmem:[#allocation3 + $0x2c0] sm:$0xff] }
 0x180   : > { %v13498_v30 = vpop.f32.mrb[44].mxu1  ;;  %14808 = vmatmul.mubr.msk.f32.gmra.mrb[20].mxu0 %vm734_vm1, %v13497_v29  ;;  %16242 = vmatprep.subr.bf16.mxu1 %v17348_v21  ;;  %v1797_v29 = vld [vmem:[#allocation3 + $0x2a0] sm:$0xff] }
 0x181   : > { %v13499_v32 = vpop.f32.mrb[45].mxu1 }
 0x182   : > { %v13500_v36 = vadd.f32 %v13499_v32, %v13498_v30  ;;  %2945 = vmatmul.mubr.f32.gmra.mrb[118].mxu1 %v2855_v38  ;;  %v1800_v30 = vld [vmem:[#allocation3 + $0x2b8] sm:$0xff]  ;;  %v1802_v32 = vld [vmem:[#allocation3 + $0x2c8] sm:$0xff] }
 0x183   : > { %2949 = vmatprep.mubr.f32.mxu1 %v2858_v42  ;;  %16244 = vmatpush3.bf16.msra.mxu1 %v17356_v27  ;;  %v1806_v38 = vld [vmem:[#allocation3 + $0x2e8] sm:$0xff]  ;;  %v1808_v42 = vld [vmem:[#allocation3 + $0x2f8] sm:$0xff] }
 0x184   : > { %v13501_v37 = vpop.f32.mrb[46].mxu1  ;;  %14810 = vmatprep.mubr.msk.f32.mxu0 %vm734_vm1, %v13500_v36  ;;  %16246 = vmatprep.subr.bf16.mxu1 %v17360_v28  ;;  %v1804_v36 = vld [vmem:[#allocation3 + $0x2d8] sm:$0xff] }
 0x185   : > { %v13502_v39 = vpop.f32.mrb[47].mxu1 }
 0x186   : > { %v13503_v43 = vadd.f32 %v13502_v39, %v13501_v37  ;;  %2950 = vmatmul.mubr.f32.gmra.mrb[120].mxu1 %v2857_v45  ;;  %v1803_v37 = vld [vmem:[#allocation3 + $0x2d0] sm:$0xff]  ;;  %v1805_v39 = vld [vmem:[#allocation3 + $0x2e0] sm:$0xff] }
 0x187   : > { %2954 = vmatprep.mubr.f32.mxu1 %v2860_v51  ;;  %16248 = vmatpush3.bf16.msra.mxu1 %v17368_v34 }
 0x188   : > { %14811 = vmatmul.mubr.msk.f32.gmra.mrb[22].mxu0 %vm734_vm1, %v13503_v43  ;;  %v13545_v44 = vpop.f32.mrb[48].mxu1  ;;  %16250 = vmatprep.subr.bf16.mxu1 %v17372_v35  ;;  %v1807_v43 = vld [vmem:[#allocation3 + $0x2f0] sm:$0xff] }
 0x189   : > { %v13546_v48 = vpop.f32.mrb[49].mxu1 }
 0x18a   : > { %v13547_v52 = vadd.f32 %v13546_v48, %v13545_v44  ;;  %2955 = vmatmul.mubr.f32.gmra.mrb[122].mxu1 %v2859_v54 }
 0x18b   : > { %2959 = vmatprep.mubr.f32.mxu1 %v2862_v56  ;;  %16252 = vmatpush3.bf16.msra.mxu1 %v17380_v40 }
 0x18c   : > { %v13548_v53 = vpop.f32.mrb[50].mxu1  ;;  %14815 = vmatprep.mubr.msk.f32.mxu0 %vm734_vm1, %v13547_v52  ;;  %16254 = vmatprep.subr.bf16.mxu1 %v17384_v41 }
 0x18d   : > { %v13549_v55 = vpop.f32.mrb[51].mxu1 }
 0x18e   : > { %v13550_v57 = vadd.f32 %v13549_v55, %v13548_v53  ;;  %2960 = vmatmul.mubr.f32.gmra.mrb[124].mxu1 %v2861_v61 }
 0x18f   : > { %2964 = vmatprep.mubr.f32.mxu1 %v2864_v63  ;;  %16256 = vmatpush3.bf16.msra.mxu1 %v17392_v46 }
 0x190   : > { %14816 = vmatmul.mubr.msk.f32.vlgmr.msra.gmra.mrb[16].mxu0 %vm734_vm1, %v13550_v57  ;;  %v13551_v60 = vpop.f32.mrb[52].mxu1  ;;  %16258 = vmatprep.subr.bf16.mxu1 %v17396_v47 }
 0x191   : > { %16040 = vmatpush3.bf16.msra.mxu0 %v17321_v8  ;;  %v13552_v62 = vpop.f32.mrb[53].mxu1 }
 0x192   : > { %v13553_v0 = vadd.f32 %v13552_v62, %v13551_v60  ;;  %16042 = vmatprep.subr.bf16.mxu0 %v17323_v9  ;;  %2965 = vmatmul.mubr.f32.gmra.mrb[126].mxu1 %v2863_v2 }
 0x193   : > { %16260 = vmatpush3.bf16.msra.mxu1 %v17402_v50 }
 0x194   : > { %v13554_v1 = vpop.f32.mrb[54].mxu1  ;;  %14818 = vmatprep.mubr.msk.f32.mxu0 %vm734_vm1, %v13553_v0  ;;  %16262 = vmatprep.subr.bf16.mxu1 %v17316_v4 }
 0x195   : > { %16044 = vmatpush3.bf16.msra.mxu0 %v17332_v14  ;;  %v13555_v5 = vpop.f32.mrb[55].mxu1 }
 0x196   : > { %v13556_v6 = vadd.f32 %v13555_v5, %v13554_v1  ;;  %16046 = vmatprep.subr.bf16.mxu0 %v17336_v15 }
 0x198   : > { %v13557_v7 = vpop.f32.mrb[56].mxu1  ;;  %14819 = vmatmul.mubr.msk.f32.gmra.mrb[18].mxu0 %vm734_vm1, %v13556_v6 }
 0x199   : > { %16048 = vmatpush3.bf16.msra.mxu0 %v17344_v20  ;;  %v13558_v10 = vpop.f32.mrb[57].mxu1 }
 0x19a   : > { %v13559_v11 = vadd.f32 %v13558_v10, %v13557_v7  ;;  %16050 = vmatprep.subr.bf16.mxu0 %v17348_v21 }
 0x19c   : > { %v13560_v12 = vpop.f32.mrb[58].mxu1  ;;  %14821 = vmatprep.mubr.msk.f32.mxu0 %vm734_vm1, %v13559_v11 }
 0x19d   : > { %16052 = vmatpush3.bf16.msra.mxu0 %v17356_v27  ;;  %v13561_v49 = vpop.f32.mrb[59].mxu1 }
 0x19e   : > { %v13562_v13 = vadd.f32 %v13561_v49, %v13560_v12  ;;  %16054 = vmatprep.subr.bf16.mxu0 %v17360_v28 }
 0x1a0   : > { %v13563_v58 = vpop.f32.mrb[60].mxu1  ;;  %14822 = vmatmul.mubr.msk.f32.gmra.mrb[20].mxu0 %vm734_vm1, %v13562_v13 }
 0x1a1   : > { %16056 = vmatpush3.bf16.msra.mxu0 %v17368_v34  ;;  %v13564_v17 = vpop.f32.mrb[61].mxu1 }
 0x1a2   : > { %v13565_v18 = vadd.f32 %v13564_v17, %v13563_v58  ;;  %16058 = vmatprep.subr.bf16.mxu0 %v17372_v35 }
 0x1a4   : > { %v13566_v59 = vpop.f32.mrb[62].mxu1  ;;  %14824 = vmatprep.mubr.msk.f32.mxu0 %vm734_vm1, %v13565_v18 }
 0x1a5   : > { %16060 = vmatpush3.bf16.msra.mxu0 %v17380_v40  ;;  %v13567_v3 = vpop.f32.mrb[63].mxu1 }
 0x1a6   : > { %v13568_v19 = vadd.f32 %v13567_v3, %v13566_v59  ;;  %16062 = vmatprep.subr.bf16.mxu0 %v17384_v41 }
 0x1a8   : > { %14825 = vmatmul.mubr.msk.f32.gmra.mrb[22].mxu0 %vm734_vm1, %v13568_v19  ;;  %v13675_v44 = vpop.f32.mrb[64].mxu1 }
 0x1a9   : > { %16064 = vmatpush3.bf16.msra.mxu0 %v17392_v46  ;;  %1873 = vmatprep.mubr.f32.mxu0 %v1794_v16  ;;  %v13676_v45 = vpop.f32.mrb[65].mxu1 }
 0x1aa   : > { %16066 = vmatprep.subr.bf16.mxu0 %v17396_v47  ;;  %v17654_v48 = vadd.f32 %v13676_v45, %v13675_v44 }
 0x1ac   : > { %v13678_v51 = vpop.f32.mrb[66].mxu1 }
 0x1ad   : > { %16068 = vmatpush3.bf16.msra.mxu0 %v17402_v50  ;;  %v13679_v52 = vpop.f32.mrb[67].mxu1 }
 0x1ae   : > { %14827 = vmatprep.subr.msk.mxu0 %vm759_vm0, %v12780_v22  ;;  %v17656_v53 = vadd.f32 %v13679_v52, %v13678_v51 }
 0x1b0   : > { %1874 = vmatmul.mubr.f32.vlgmr.msra.gmra.mrb[24].mxu0 %v1793_v23  ;;  %v13681_v54 = vpop.f32.mrb[68].mxu1  ;;  %v17679_v23 = vld [vmem:[%s19210_s2 + $0x18] sm:$0x7] }
 0x1b1   : > { %1878 = vmatprep.mubr.f32.mxu0 %v1796_v24  ;;  %14828 = vmatpush3.msk.msra.mxu0 %vm759_vm0, %v12780_v22  ;;  %v13682_v55 = vpop.f32.mrb[69].mxu1 }
 0x1b2   : > { %v17658_v56 = vadd.f32 %v13682_v55, %v13681_v54  ;;  %14841 = vmatprep.subr.msk.mxu0 %vm759_vm0, %v17679_v23 }
 0x1b4   : > { %1879 = vmatmul.mubr.f32.gmra.mrb[26].mxu0 %v1795_v25  ;;  %v13684_v57 = vpop.f32.mrb[70].mxu1 }
 0x1b5   : > { %1883 = vmatprep.mubr.f32.mxu0 %v1798_v26  ;;  %v13685_v60 = vpop.f32.mrb[71].mxu1 }
 0x1b6   : > { %v17660_v61 = vadd.f32 %v13685_v60, %v13684_v57 }
 0x1b8   : > { %1884 = vmatmul.mubr.f32.gmra.mrb[28].mxu0 %v1797_v29  ;;  %v13687_v62 = vpop.f32.mrb[72].mxu1 }
 0x1b9   : > { %1888 = vmatprep.mubr.f32.mxu0 %v1800_v30  ;;  %v13688_v63 = vpop.f32.mrb[73].mxu1 }
 0x1ba   : > { %v17662_v0 = vadd.f32 %v13688_v63, %v13687_v62 }
 0x1bc   : > { %1889 = vmatmul.mubr.f32.gmra.mrb[30].mxu0 %v1799_v31  ;;  %v13690_v1 = vpop.f32.mrb[74].mxu1 }
 0x1bd   : > { %1893 = vmatprep.mubr.f32.mxu0 %v1802_v32  ;;  %v13691_v2 = vpop.f32.mrb[75].mxu1 }
 0x1be   : > { %v17664_v5 = vadd.f32 %v13691_v2, %v13690_v1 }
 0x1c0   : > { %1894 = vmatmul.mubr.f32.gmra.mrb[32].mxu0 %v1801_v33  ;;  %v13693_v6 = vpop.f32.mrb[76].mxu1 }
 0x1c1   : > { %1898 = vmatprep.mubr.f32.mxu0 %v1804_v36  ;;  %v13694_v7 = vpop.f32.mrb[77].mxu1 }
 0x1c2   : > { %v17666_v10 = vadd.f32 %v13694_v7, %v13693_v6 }
 0x1c4   : > { %1899 = vmatmul.mubr.f32.gmra.mrb[34].mxu0 %v1803_v37  ;;  %v13696_v11 = vpop.f32.mrb[78].mxu1 }
 0x1c5   : > { %1903 = vmatprep.mubr.f32.mxu0 %v1806_v38  ;;  %v13697_v12 = vpop.f32.mrb[79].mxu1 }
 0x1c6   : > { %v17668_v49 = vadd.f32 %v13697_v12, %v13696_v11 }
 0x1c8   : > { %1904 = vmatmul.mubr.f32.gmra.mrb[36].mxu0 %v1805_v39  ;;  %v13740_v13 = vpop.f32.mrb[80].mxu1 }
 0x1c9   : > { %1908 = vmatprep.mubr.f32.mxu0 %v1808_v42  ;;  %v13741_v58 = vpop.f32.mrb[81].mxu1 }
 0x1ca   : > { %v17670_v17 = vadd.f32 %v13741_v58, %v13740_v13 }
 0x1cc   : > { %1909 = vmatmul.mubr.f32.gmra.mrb[38].mxu0 %v1807_v43  ;;  %v13743_v18 = vpop.f32.mrb[82].mxu1 }
 0x1cd   : > { %v13744_v59 = vpop.f32.mrb[83].mxu1 }
 0x1ce   : > { %v17672_v3 = vadd.f32 %v13744_v59, %v13743_v18 }
 0x200   : > { %v13746_v19 = vpop.f32.mrb[84].mxu1 }
 0x201   : > { %v13747_v16 = vpop.f32.mrb[85].mxu1 }
 0x202   : > { %v17674_v22 = vadd.f32 %v13747_v16, %v13746_v19 }
 0x206   : > { %v13749_v24 = vpop.f32.mrb[86].mxu1 }
 0x207   : > { %v13750_v25 = vpop.f32.mrb[87].mxu1 }
 0x208   : > { %v17683_v26 = vadd.f32 %v13750_v25, %v13749_v24 }
 0x20a   : > { %v13752_v29 = vpop.f32.mrb[88].mxu1 }
 0x20b   : > { %v13753_v30 = vpop.f32.mrb[89].mxu1 }
 0x20c   : > { %v17685_v31 = vadd.f32 %v13753_v30, %v13752_v29 }
 0x20e   : > { %v13755_v32 = vpop.f32.mrb[90].mxu1 }
 0x20f   : > { %v13756_v33 = vpop.f32.mrb[91].mxu1 }
 0x210   : > { %v17687_v36 = vadd.f32 %v13756_v33, %v13755_v32 }
 0x212   : > { %v13758_v37 = vpop.f32.mrb[92].mxu1 }
 0x213   : > { %v13759_v38 = vpop.f32.mrb[93].mxu1 }
 0x214   : > { %v17689_v39 = vadd.f32 %v13759_v38, %v13758_v37 }
 0x224   : > { %v13761_v42 = vpop.f32.mrb[94].mxu1 }
 0x225   : > { %v13762_v43 = vpop.f32.mrb[95].mxu1 }
 0x226   : > { %v17691_v44 = vadd.f32 %v13762_v43, %v13761_v42 }
 0x228   : > { %v13805_v45 = vpop.f32.mrb[96].mxu1 }
 0x229   : > { %v13806_v51 = vpop.f32.mrb[97].mxu1 }
 0x22a   : > { %v17693_v52 = vadd.f32 %v13806_v51, %v13805_v45 }
 0x22c   : > { %v13808_v54 = vpop.f32.mrb[98].mxu1 }
 0x22d   : > { %v13809_v55 = vpop.f32.mrb[99].mxu1 }
 0x22e   : > { %v17695_v57 = vadd.f32 %v13809_v55, %v13808_v54 }
 0x231   : > { %v13811_v60 = vpop.f32.mrb[100].mxu1 }
 0x232   : > { %v13812_v62 = vpop.f32.mrb[101].mxu1 }
 0x233   : > { %v17697_v63 = vadd.f32 %v13812_v62, %v13811_v60  ;;  %v3378_v62 = vld [vmem:[#allocation3 + $0x588] sm:$0xff] }
 0x234   : > { %3457 = vmatprep.mubr.f32.mxu1 %v3378_v62 }
 0x235   : > { %v13814_v1 = vpop.f32.mrb[102].mxu1 }
 0x236   : > { %v13815_v2 = vpop.f32.mrb[103].mxu1 }
 0x237   : > { %v17699_v6 = vadd.f32 %v13815_v2, %v13814_v1  ;;  %v3377_v2 = vld [vmem:[#allocation3 + $0x580] sm:$0xff] }
 0x238   : > { %3458 = vmatmul.mubr.f32.vlgmr.msra.gmra.mrb[128].mxu1 %v3377_v2  ;;  %v3385_v2 = vld [vmem:[#allocation3 + $0x5c0] sm:$0xff] }
 0x239   : > { %v13817_v7 = vpop.f32.mrb[104].mxu1  ;;  %16264 = vmatpush3.bf16.msra.mxu1 %v17321_v8 }
 0x23a   : > { %v13818_v11 = vpop.f32.mrb[105].mxu1  ;;  %16266 = vmatprep.subr.bf16.mxu1 %v17323_v9 }
 0x23b   : > { %v17701_v12 = vadd.f32 %v13818_v11, %v13817_v7 }
 0x23d   : > { %v13820_v13 = vpop.f32.mrb[106].mxu1  ;;  %16268 = vmatpush3.bf16.msra.mxu1 %v17332_v14 }
 0x23e   : > { %v13821_v58 = vpop.f32.mrb[107].mxu1  ;;  %16270 = vmatprep.subr.bf16.mxu1 %v17336_v15 }
 0x23f   : > { %v17703_v18 = vadd.f32 %v13821_v58, %v13820_v13  ;;  %v3380_v13 = vld [vmem:[#allocation3 + $0x598] sm:$0xff] }
 0x240   : > { %3462 = vmatprep.mubr.f32.mxu1 %v3380_v13  ;;  %v3387_v13 = vld [vmem:[#allocation3 + $0x5d0] sm:$0xff] }
 0x241   : > { %v13823_v59 = vpop.f32.mrb[108].mxu1  ;;  %16272 = vmatpush3.bf16.msra.mxu1 %v17344_v20 }
 0x242   : > { %v13824_v19 = vpop.f32.mrb[109].mxu1  ;;  %16274 = vmatprep.subr.bf16.mxu1 %v17348_v21 }
 0x243   : > { %v17705_v16 = vadd.f32 %v13824_v19, %v13823_v59  ;;  %v3379_v59 = vld [vmem:[#allocation3 + $0x590] sm:$0xff] }
 0x244   : > { %3463 = vmatmul.mubr.f32.gmra.mrb[130].mxu1 %v3379_v59  ;;  %v3389_v59 = vld [vmem:[#allocation3 + $0x5e0] sm:$0xff] }
 0x245   : > { %v13826_v24 = vpop.f32.mrb[110].mxu1  ;;  %16276 = vmatpush3.bf16.msra.mxu1 %v17356_v27 }
 0x246   : > { %v13827_v25 = vpop.f32.mrb[111].mxu1  ;;  %16278 = vmatprep.subr.bf16.mxu1 %v17360_v28 }
 0x247   : > { %v17707_v29 = vadd.f32 %v13827_v25, %v13826_v24  ;;  %v3382_v25 = vld [vmem:[#allocation3 + $0x5a8] sm:$0xff] }
 0x248   : > { %3467 = vmatprep.mubr.f32.mxu1 %v3382_v25  ;;  %v3391_v25 = vld [vmem:[#allocation3 + $0x5f0] sm:$0xff] }
 0x249   : > { %v13870_v30 = vpop.f32.mrb[112].mxu1  ;;  %16280 = vmatpush3.bf16.msra.mxu1 %v17368_v34 }
 0x24a   : > { %v13871_v32 = vpop.f32.mrb[113].mxu1  ;;  %16282 = vmatprep.subr.bf16.mxu1 %v17372_v35 }
 0x24b   : > { %v17709_v33 = vadd.f32 %v13871_v32, %v13870_v30  ;;  %v3381_v32 = vld [vmem:[#allocation3 + $0x5a0] sm:$0xff] }
 0x24c   : > { %3468 = vmatmul.mubr.f32.gmra.mrb[132].mxu1 %v3381_v32  ;;  %v3641_v32 = vld [vmem:[#allocation3 + $0x600] sm:$0xff] }
 0x24d   : > { %v13873_v37 = vpop.f32.mrb[114].mxu1  ;;  %16284 = vmatpush3.bf16.msra.mxu1 %v17380_v40 }
 0x24e   : > { %v13874_v38 = vpop.f32.mrb[115].mxu1  ;;  %16286 = vmatprep.subr.bf16.mxu1 %v17384_v41 }
 0x24f   : > { %v17711_v42 = vadd.f32 %v13874_v38, %v13873_v37 }
 0x251   : > { %v13876_v43 = vpop.f32.mrb[116].mxu1  ;;  %16288 = vmatpush3.bf16.msra.mxu1 %v17392_v46 }
 0x252   : > { %v13877_v45 = vpop.f32.mrb[117].mxu1  ;;  %16290 = vmatprep.subr.bf16.mxu1 %v17396_v47 }
 0x253   : > { %v17713_v51 = vadd.f32 %v13877_v45, %v13876_v43  ;;  %v3384_v43 = vld [vmem:[#allocation3 + $0x5b8] sm:$0xff] }
 0x254   : > { %3472 = vmatprep.mubr.f32.mxu1 %v3384_v43  ;;  %v3644_v43 = vld [vmem:[#allocation3 + $0x618] sm:$0xff] }
 0x255   : > { %v13879_v54 = vpop.f32.mrb[118].mxu1  ;;  %16292 = vmatpush3.bf16.msra.mxu1 %v17402_v50 }
 0x256   : > { %v13880_v55 = vpop.f32.mrb[119].mxu1  ;;  %16294 = vmatprep.subr.bf16.mxu1 %v17316_v4 }
 0x257   : > { %v17715_v60 = vadd.f32 %v13880_v55, %v13879_v54  ;;  %v3383_v54 = vld [vmem:[#allocation3 + $0x5b0] sm:$0xff] }
 0x258   : > { %3473 = vmatmul.mubr.f32.gmra.mrb[134].mxu1 %v3383_v54  ;;  %v3643_v54 = vld [vmem:[#allocation3 + $0x610] sm:$0xff] }
 0x259   : > { %v13882_v1 = vpop.f32.mrb[120].mxu1 }
 0x25a   : > { %v13883_v7 = vpop.f32.mrb[121].mxu1 }
 0x25b   : > { %v17717_v11 = vadd.f32 %v13883_v7, %v13882_v1  ;;  %v3386_v1 = vld [vmem:[#allocation3 + $0x5c8] sm:$0xff]  ;;  %v3388_v7 = vld [vmem:[#allocation3 + $0x5d8] sm:$0xff] }
 0x25c   : > { %3477 = vmatprep.mubr.f32.mxu1 %v3386_v1 }
 0x25d   : > { %v13885_v58 = vpop.f32.mrb[122].mxu1  ;;  %3478 = vmatmul.mubr.f32.gmra.mrb[136].mxu1 %v3385_v2  ;;  %v3646_v2 = vld [vmem:[#allocation3 + $0x628] sm:$0xff] }
 0x25e   : > { %v13886_v19 = vpop.f32.mrb[123].mxu1  ;;  %3482 = vmatprep.mubr.f32.mxu1 %v3388_v7 }
 0x25f   : > { %v17721_v24 = vadd.f32 %v13886_v19, %v13885_v58  ;;  %v3390_v58 = vld [vmem:[#allocation3 + $0x5e8] sm:$0xff]  ;;  %v3392_v19 = vld [vmem:[#allocation3 + $0x5f8] sm:$0xff] }
 0x261   : > { %v13888_v30 = vpop.f32.mrb[124].mxu1  ;;  %3483 = vmatmul.mubr.f32.gmra.mrb[138].mxu1 %v3387_v13  ;;  %v3645_v13 = vld [vmem:[#allocation3 + $0x620] sm:$0xff] }
 0x262   : > { %v13889_v37 = vpop.f32.mrb[125].mxu1  ;;  %3487 = vmatprep.mubr.f32.mxu1 %v3390_v58 }
 0x263   : > { %v17725_v38 = vadd.f32 %v13889_v37, %v13888_v30  ;;  %v3642_v30 = vld [vmem:[#allocation3 + $0x608] sm:$0xff] }
 0x265   : > { %v13891_v45 = vpop.f32.mrb[126].mxu1  ;;  %3488 = vmatmul.mubr.f32.gmra.mrb[140].mxu1 %v3389_v59  ;;  %v17749_v59 = vld [vmem:[%s19210_s2 + $0x1c] sm:$0x7] }
 0x266   : > { %v13892_v55 = vpop.f32.mrb[127].mxu1  ;;  %3492 = vmatprep.mubr.f32.mxu1 %v3392_v19 }
 0x267   : > { %v17729_v62 = vadd.f32 %v13892_v55, %v13891_v45 }
 0x269   : > { %3493 = vmatmul.mubr.f32.gmra.mrb[142].mxu1 %v3391_v25  ;;  %v3648_v25 = vld [vmem:[#allocation3 + $0x638] sm:$0xff] }
 0x26a   : > { %3721 = vmatprep.mubr.f32.mxu1 %v3642_v30 }
 0x26d   : > { %3722 = vmatmul.mubr.f32.vlgmr.msra.gmra.mrb[144].mxu1 %v3641_v32  ;;  %v3647_v32 = vld [vmem:[#allocation3 + $0x630] sm:$0xff] }
 0x26e   : > { %16296 = vmatpush3.bf16.msra.mxu1 %v17321_v8  ;;  %3726 = vmatprep.mubr.f32.mxu1 %v3644_v43 }
 0x26f   : > { %16298 = vmatprep.subr.bf16.mxu1 %v17323_v9 }
 0x271   : > { %3727 = vmatmul.mubr.f32.gmra.mrb[146].mxu1 %v3643_v54 }
 0x272   : > { %16300 = vmatpush3.bf16.msra.mxu1 %v17332_v14  ;;  %3731 = vmatprep.mubr.f32.mxu1 %v3646_v2  ;;  %v3652_v2 = vld [vmem:[#allocation3 + $0x658] sm:$0xff] }
 0x273   : > { %16302 = vmatprep.subr.bf16.mxu1 %v17336_v15 }
 0x275   : > { %3732 = vmatmul.mubr.f32.gmra.mrb[148].mxu1 %v3645_v13 }
 0x276   : > { %16304 = vmatpush3.bf16.msra.mxu1 %v17344_v20  ;;  %3736 = vmatprep.mubr.f32.mxu1 %v3648_v25 }
 0x277   : > { %16306 = vmatprep.subr.bf16.mxu1 %v17348_v21 }
 0x279   : > { %3737 = vmatmul.mubr.f32.gmra.mrb[150].mxu1 %v3647_v32 }
 0x27a   : > { %16308 = vmatpush3.bf16.msra.mxu1 %v17356_v27 }
 0x27b   : > { %16310 = vmatprep.subr.bf16.mxu1 %v17360_v28 }
 0x27e   : > { %16312 = vmatpush3.bf16.msra.mxu1 %v17368_v34 }
 0x27f   : > { %16314 = vmatprep.subr.bf16.mxu1 %v17372_v35 }
 0x282   : > { %16316 = vmatpush3.bf16.msra.mxu1 %v17380_v40 }
 0x283   : > { %v13610_v37 = vpop.f32.mrb[24].mxu0  ;;  %16318 = vmatprep.subr.bf16.mxu1 %v17384_v41 }
 0x284   : > { %v13611_v45 = vpop.f32.mrb[25].mxu0 }
 0x285   : > { %v13612_v55 = vadd.f32 %v13611_v45, %v13610_v37  ;;  %v3650_v45 = vld [vmem:[#allocation3 + $0x648] sm:$0xff] }
 0x286   : > { %3741 = vmatprep.mubr.f32.mxu1 %v3650_v45  ;;  %16320 = vmatpush3.bf16.msra.mxu1 %v17392_v46 }
 0x287   : > { %v13613_v1 = vpop.f32.mrb[26].mxu0  ;;  %14829 = vmatprep.mubr.msk.f32.mxu0 %vm734_vm1, %v13612_v55  ;;  %v3649_v55 = vld [vmem:[#allocation3 + $0x640] sm:$0xff]  ;;  %16322 = vmatprep.subr.bf16.mxu1 %v17396_v47 }
 0x288   : > { %v13614_v7 = vpop.f32.mrb[27].mxu0  ;;  %3742 = vmatmul.mubr.f32.gmra.mrb[152].mxu1 %v3649_v55 }
 0x289   : > { %v13615_v58 = vadd.f32 %v13614_v7, %v13613_v1  ;;  %v3651_v7 = vld [vmem:[#allocation3 + $0x650] sm:$0xff]  ;;  %3746 = vmatprep.mubr.f32.mxu1 %v3652_v2 }
 0x28a   : > { %16324 = vmatpush3.bf16.msra.mxu1 %v17402_v50 }
 0x28b   : > { %v13616_v19 = vpop.f32.mrb[28].mxu0  ;;  %14830 = vmatmul.mubr.msk.f32.vlgmr.msra.gmra.mrb[16].mxu0 %vm734_vm1, %v13615_v58  ;;  %16326 = vmatprep.subr.bf16.mxu1 %v17316_v4 }
 0x28c   : > { %v13617_v30 = vpop.f32.mrb[29].mxu0  ;;  %14842 = vmatpush3.msk.msra.mxu0 %vm759_vm0, %v17679_v23  ;;  %3747 = vmatmul.mubr.f32.gmra.mrb[154].mxu1 %v3651_v7  ;;  %v3905_v7 = vld [vmem:[#allocation3 + $0x680] sm:$0xff] }
 0x28d   : > { %v13618_v37 = vadd.f32 %v13617_v30, %v13616_v19  ;;  %14855 = vmatprep.subr.msk.mxu0 %vm759_vm0, %v17749_v59  ;;  %v3654_v19 = vld [vmem:[#allocation3 + $0x668] sm:$0xff]  ;;  %v3653_v30 = vld [vmem:[#allocation3 + $0x660] sm:$0xff] }
 0x28e   : > { %3751 = vmatprep.mubr.f32.mxu1 %v3654_v19  ;;  %v3908_v19 = vld [vmem:[#allocation3 + $0x698] sm:$0xff] }
 0x28f   : > { %v13619_v43 = vpop.f32.mrb[30].mxu0  ;;  %14832 = vmatprep.mubr.msk.f32.mxu0 %vm734_vm1, %v13618_v37 }
 0x290   : > { %v13620_v54 = vpop.f32.mrb[31].mxu0  ;;  %3752 = vmatmul.mubr.f32.gmra.mrb[156].mxu1 %v3653_v30  ;;  %v12810_v30 = vld [vmem:[%s19210_s2 + $0x20] sm:$0x7] }
 0x291   : > { %v13621_v23 = vadd.f32 %v13620_v54, %v13619_v43  ;;  %v3656_v43 = vld [vmem:[#allocation3 + $0x678] sm:$0xff]  ;;  %v3655_v54 = vld [vmem:[#allocation3 + $0x670] sm:$0xff] }
 0x292   : > { %3756 = vmatprep.mubr.f32.mxu1 %v3656_v43  ;;  %v4169_v43 = vld [vmem:[#allocation3 + $0x700] sm:$0xff] }
 0x293   : > { %v13622_v1 = vpop.f32.mrb[32].mxu0  ;;  %14833 = vmatmul.mubr.msk.f32.gmra.mrb[18].mxu0 %vm734_vm1, %v13621_v23 }
 0x294   : > { %v13623_v13 = vpop.f32.mrb[33].mxu0  ;;  %3757 = vmatmul.mubr.f32.gmra.mrb[158].mxu1 %v3655_v54  ;;  %v3119_v54 = vld [vmem:[#allocation3 + $0x530] sm:$0xff] }
 0x295   : > { %v13624_v58 = vadd.f32 %v13623_v13, %v13622_v1  ;;  %v3906_v1 = vld [vmem:[#allocation3 + $0x688] sm:$0xff] }
 0x296   : > { %3985 = vmatprep.mubr.f32.mxu1 %v3906_v1  ;;  %v3124_v1 = vld [vmem:[#allocation3 + $0x558] sm:$0xff] }
 0x297   : > { %v13625_v25 = vpop.f32.mrb[34].mxu0  ;;  %14835 = vmatprep.mubr.msk.f32.mxu0 %vm734_vm1, %v13624_v58 }
 0x298   : > { %v13626_v32 = vpop.f32.mrb[35].mxu0  ;;  %3986 = vmatmul.mubr.f32.vlgmr.msra.gmra.mrb[160].mxu1 %v3905_v7  ;;  %v3126_v7 = vld [vmem:[#allocation3 + $0x568] sm:$0xff] }
 0x299   : > { %v13627_v37 = vadd.f32 %v13626_v32, %v13625_v25  ;;  %16328 = vmatpush3.bf16.msra.mxu1 %v17321_v8  ;;  %v3907_v25 = vld [vmem:[#allocation3 + $0x690] sm:$0xff]  ;;  %3990 = vmatprep.mubr.f32.mxu1 %v3908_v19  ;;  %v3910_v32 = vld [vmem:[#allocation3 + $0x6a8] sm:$0xff] }
 0x29a   : > { %16330 = vmatprep.subr.bf16.mxu1 %v17323_v9  ;;  %v3127_v19 = vld [vmem:[#allocation3 + $0x570] sm:$0xff] }
 0x29b   : > { %v13628_v45 = vpop.f32.mrb[36].mxu0  ;;  %14836 = vmatmul.mubr.msk.f32.gmra.mrb[20].mxu0 %vm734_vm1, %v13627_v37  ;;  %v3909_v37 = vld [vmem:[#allocation3 + $0x6a0] sm:$0xff] }
 0x29c   : > { %v13629_v55 = vpop.f32.mrb[37].mxu0  ;;  %3991 = vmatmul.mubr.f32.gmra.mrb[162].mxu1 %v3907_v25 }
 0x29d   : > { %v13630_v23 = vadd.f32 %v13629_v55, %v13628_v45  ;;  %16332 = vmatpush3.bf16.msra.mxu1 %v17332_v14  ;;  %3995 = vmatprep.mubr.f32.mxu1 %v3910_v32  ;;  %v4174_v45 = vld [vmem:[#allocation3 + $0x728] sm:$0xff] }
 0x29e   : > { %16334 = vmatprep.subr.bf16.mxu1 %v17336_v15  ;;  %v3122_v55 = vld [vmem:[#allocation3 + $0x548] sm:$0xff] }
 0x29f   : > { %v13631_v2 = vpop.f32.mrb[38].mxu0  ;;  %14838 = vmatprep.mubr.msk.f32.mxu0 %vm734_vm1, %v13630_v23  ;;  %v3121_v23 = vld [vmem:[#allocation3 + $0x540] sm:$0xff] }
 0x2a0   : > { %v13632_v13 = vpop.f32.mrb[39].mxu0  ;;  %3996 = vmatmul.mubr.f32.gmra.mrb[164].mxu1 %v3909_v37 }
 0x2a1   : > { %v13633_v58 = vadd.f32 %v13632_v13, %v13631_v2  ;;  %16336 = vmatpush3.bf16.msra.mxu1 %v17344_v20  ;;  %v3123_v2 = vld [vmem:[#allocation3 + $0x550] sm:$0xff]  ;;  %v3125_v13 = vld [vmem:[#allocation3 + $0x560] sm:$0xff] }
 0x2a2   : > { %16338 = vmatprep.subr.bf16.mxu1 %v17348_v21 }
 0x2a3   : > { %14839 = vmatmul.mubr.msk.f32.gmra.mrb[22].mxu0 %vm734_vm1, %v13633_v58  ;;  %v3128_v58 = vld [vmem:[#allocation3 + $0x578] sm:$0xff] }
 0x2a4   : > { %14843 = vmatprep.mubr.msk.f32.mxu0 %vm734_vm1, %v17654_v48  ;;  %v3912_v48 = vld [vmem:[#allocation3 + $0x6b8] sm:$0xff] }
 0x2a5   : > { %4000 = vmatprep.mubr.f32.mxu1 %v3912_v48  ;;  %16340 = vmatpush3.bf16.msra.mxu1 %v17356_v27 }
 0x2a6   : > { %16342 = vmatprep.subr.bf16.mxu1 %v17360_v28 }
 0x2a7   : > { %14844 = vmatmul.mubr.msk.f32.vlgmr.msra.gmra.mrb[16].mxu0 %vm734_vm1, %v17656_v53  ;;  %v3911_v53 = vld [vmem:[#allocation3 + $0x6b0] sm:$0xff] }
 0x2a8   : > { %14846 = vmatprep.mubr.msk.f32.mxu0 %vm734_vm1, %v17658_v56  ;;  %14856 = vmatpush3.msk.msra.mxu0 %vm759_vm0, %v17749_v59  ;;  %v3914_v56 = vld [vmem:[#allocation3 + $0x6c8] sm:$0xff]  ;;  %v3913_v59 = vld [vmem:[#allocation3 + $0x6c0] sm:$0xff] }
 0x2a9   : > { %14869 = vmatprep.subr.msk.mxu0 %vm759_vm0, %v12810_v30  ;;  %4001 = vmatmul.mubr.f32.gmra.mrb[166].mxu1 %v3911_v53 }
 0x2aa   : > { %4005 = vmatprep.mubr.f32.mxu1 %v3914_v56  ;;  %16344 = vmatpush3.bf16.msra.mxu1 %v17368_v34 }
 0x2ab   : > { %14847 = vmatmul.mubr.msk.f32.gmra.mrb[18].mxu0 %vm734_vm1, %v17660_v61  ;;  %v3916_v61 = vld [vmem:[#allocation3 + $0x6d8] sm:$0xff]  ;;  %16346 = vmatprep.subr.bf16.mxu1 %v17372_v35 }
 0x2ac   : > { %14849 = vmatprep.mubr.msk.f32.mxu0 %vm734_vm1, %v17662_v0  ;;  %v3915_v0 = vld [vmem:[#allocation3 + $0x6d0] sm:$0xff] }
 0x2ad   : > { %4006 = vmatmul.mubr.f32.gmra.mrb[168].mxu1 %v3913_v59 }
 0x2ae   : > { %4010 = vmatprep.mubr.f32.mxu1 %v3916_v61  ;;  %16348 = vmatpush3.bf16.msra.mxu1 %v17380_v40 }
 0x2af   : > { %14850 = vmatmul.mubr.msk.f32.gmra.mrb[20].mxu0 %vm734_vm1, %v17664_v5  ;;  %v12820_v5 = vld [vmem:[%s19210_s2 + $0x24] sm:$0x7]  ;;  %16350 = vmatprep.subr.bf16.mxu1 %v17384_v41 }
 0x2b0   : > { %14852 = vmatprep.mubr.msk.f32.mxu0 %vm734_vm1, %v17666_v10  ;;  %v3918_v10 = vld [vmem:[#allocation3 + $0x6e8] sm:$0xff] }
 0x2b1   : > { %4011 = vmatmul.mubr.f32.gmra.mrb[170].mxu1 %v3915_v0 }
 0x2b2   : > { %4015 = vmatprep.mubr.f32.mxu1 %v3918_v10  ;;  %16352 = vmatpush3.bf16.msra.mxu1 %v17392_v46 }
 0x2b3   : > { %14853 = vmatmul.mubr.msk.f32.gmra.mrb[22].mxu0 %vm734_vm1, %v17668_v49  ;;  %v3917_v49 = vld [vmem:[#allocation3 + $0x6e0] sm:$0xff]  ;;  %16354 = vmatprep.subr.bf16.mxu1 %v17396_v47 }
 0x2b4   : > { %14857 = vmatprep.mubr.msk.f32.mxu0 %vm734_vm1, %v17670_v17  ;;  %v3920_v17 = vld [vmem:[#allocation3 + $0x6f8] sm:$0xff] }
 0x2b5   : > { %4016 = vmatmul.mubr.f32.gmra.mrb[172].mxu1 %v3917_v49 }
 0x2b6   : > { %4020 = vmatprep.mubr.f32.mxu1 %v3920_v17  ;;  %16356 = vmatpush3.bf16.msra.mxu1 %v17402_v50 }
 0x2b7   : > { %14858 = vmatmul.mubr.msk.f32.vlgmr.msra.gmra.mrb[16].mxu0 %vm734_vm1, %v17672_v3  ;;  %v3919_v3 = vld [vmem:[#allocation3 + $0x6f0] sm:$0xff] }
 0x2b8   : > { %14860 = vmatprep.mubr.msk.f32.mxu0 %vm734_vm1, %v17674_v22  ;;  %14870 = vmatpush3.msk.msra.mxu0 %vm759_vm0, %v12810_v30  ;;  %v4170_v22 = vld [vmem:[#allocation3 + $0x708] sm:$0xff] }
 0x2b9   : > { %14883 = vmatprep.subr.msk.mxu0 %vm759_vm0, %v12820_v5  ;;  %4021 = vmatmul.mubr.f32.gmra.mrb[174].mxu1 %v3919_v3 }
 0x2ba   : > { %4249 = vmatprep.mubr.f32.mxu1 %v4170_v22 }
 0x2bb   : > { %14861 = vmatmul.mubr.msk.f32.gmra.mrb[18].mxu0 %vm734_vm1, %v17683_v26  ;;  %v4172_v26 = vld [vmem:[#allocation3 + $0x718] sm:$0xff] }
 0x2bc   : > { %14863 = vmatprep.mubr.msk.f32.mxu0 %vm734_vm1, %v17685_v31  ;;  %v4171_v31 = vld [vmem:[#allocation3 + $0x710] sm:$0xff] }
 0x2bd   : > { %4250 = vmatmul.mubr.f32.vlgmr.msra.gmra.mrb[176].mxu1 %v4169_v43 }
 0x2be   : > { %4254 = vmatprep.mubr.f32.mxu1 %v4172_v26 }
 0x2bf   : > { %14864 = vmatmul.mubr.msk.f32.gmra.mrb[20].mxu0 %vm734_vm1, %v17687_v36  ;;  %v4173_v36 = vld [vmem:[#allocation3 + $0x720] sm:$0xff] }
 0x2c0   : > { %14866 = vmatprep.mubr.msk.f32.mxu0 %vm734_vm1, %v17689_v39  ;;  %v4176_v39 = vld [vmem:[#allocation3 + $0x738] sm:$0xff] }
 0x2c1   : > { %4255 = vmatmul.mubr.f32.gmra.mrb[178].mxu1 %v4171_v31 }
 0x2c2   : > { %4259 = vmatprep.mubr.f32.mxu1 %v4174_v45 }
 0x2c3   : > { %14867 = vmatmul.mubr.msk.f32.gmra.mrb[22].mxu0 %vm734_vm1, %v17691_v44  ;;  %v4175_v44 = vld [vmem:[#allocation3 + $0x730] sm:$0xff] }
 0x2c4   : > { %14871 = vmatprep.mubr.msk.f32.mxu0 %vm734_vm1, %v17693_v52  ;;  %v4178_v52 = vld [vmem:[#allocation3 + $0x748] sm:$0xff] }
 0x2c5   : > { %4260 = vmatmul.mubr.f32.gmra.mrb[180].mxu1 %v4173_v36 }
 0x2c6   : > { %4264 = vmatprep.mubr.f32.mxu1 %v4176_v39 }
 0x2c7   : > { %14872 = vmatmul.mubr.msk.f32.vlgmr.msra.gmra.mrb[16].mxu0 %vm734_vm1, %v17695_v57  ;;  %v4177_v57 = vld [vmem:[#allocation3 + $0x740] sm:$0xff] }
 0x2c8   : > { %14874 = vmatprep.mubr.msk.f32.mxu0 %vm734_vm1, %v17697_v63  ;;  %14884 = vmatpush3.msk.msra.mxu0 %vm759_vm0, %v12820_v5  ;;  %v4180_v63 = vld [vmem:[#allocation3 + $0x758] sm:$0xff] }
 0x2c9   : > { %16198 = vmatprep.subr.bf16.mxu0 %v17316_v4  ;;  %4265 = vmatmul.mubr.f32.gmra.mrb[182].mxu1 %v4175_v44 }
 0x2ca   : > { %4269 = vmatprep.mubr.f32.mxu1 %v4178_v52 }
 0x2cb   : > { %14875 = vmatmul.mubr.msk.f32.gmra.mrb[18].mxu0 %vm734_vm1, %v17699_v6  ;;  %v4179_v6 = vld [vmem:[#allocation3 + $0x750] sm:$0xff] }
 0x2cc   : > { %14877 = vmatprep.mubr.msk.f32.mxu0 %vm734_vm1, %v17701_v12  ;;  %v4182_v12 = vld [vmem:[#allocation3 + $0x768] sm:$0xff] }
 0x2cd   : > { %4270 = vmatmul.mubr.f32.gmra.mrb[184].mxu1 %v4177_v57 }
 0x2ce   : > { %4274 = vmatprep.mubr.f32.mxu1 %v4180_v63 }
 0x2cf   : > { %14878 = vmatmul.mubr.msk.f32.gmra.mrb[20].mxu0 %vm734_vm1, %v17703_v18  ;;  %v4181_v18 = vld [vmem:[#allocation3 + $0x760] sm:$0xff] }
 0x2d0   : > { %14880 = vmatprep.mubr.msk.f32.mxu0 %vm734_vm1, %v17705_v16  ;;  %v4184_v16 = vld [vmem:[#allocation3 + $0x778] sm:$0xff] }
 0x2d1   : > { %4275 = vmatmul.mubr.f32.gmra.mrb[186].mxu1 %v4179_v6 }
 0x2d2   : > { %4279 = vmatprep.mubr.f32.mxu1 %v4182_v12 }
 0x2d3   : > { %14881 = vmatmul.mubr.msk.f32.gmra.mrb[22].mxu0 %vm734_vm1, %v17707_v29  ;;  %v4183_v29 = vld [vmem:[#allocation3 + $0x770] sm:$0xff] }
 0x2d4   : > { %14885 = vmatprep.mubr.msk.f32.mxu0 %vm734_vm1, %v17709_v33  ;;  %v3114_v33 = vld [vmem:[#allocation3 + $0x508] sm:$0xff] }
 0x2d5   : > { %4280 = vmatmul.mubr.f32.gmra.mrb[188].mxu1 %v4181_v18 }
 0x2d6   : > { %4284 = vmatprep.mubr.f32.mxu1 %v4184_v16 }
 0x2d7   : > { %14886 = vmatmul.mubr.msk.f32.vlgmr.msra.gmra.mrb[16].mxu0 %vm734_vm1, %v17711_v42  ;;  %v12830_v42 = vld [vmem:[%s19210_s2 + $0x28] sm:$0x7] }
 0x2d8   : > { %16200 = vmatpush3.bf16.msra.mxu0 %v17321_v8  ;;  %14888 = vmatprep.mubr.msk.f32.mxu0 %vm734_vm1, %v17713_v51  ;;  %v3113_v51 = vld [vmem:[#allocation3 + $0x500] sm:$0xff] }
 0x2d9   : > { %16202 = vmatprep.subr.bf16.mxu0 %v17323_v9  ;;  %4285 = vmatmul.mubr.f32.gmra.mrb[190].mxu1 %v4183_v29 }
 0x2db   : > { %14889 = vmatmul.mubr.msk.f32.gmra.mrb[18].mxu0 %vm734_vm1, %v17715_v60  ;;  %v3116_v60 = vld [vmem:[#allocation3 + $0x518] sm:$0xff] }
 0x2dc   : > { %16204 = vmatpush3.bf16.msra.mxu0 %v17332_v14  ;;  %14891 = vmatprep.mubr.msk.f32.mxu0 %vm734_vm1, %v17717_v11  ;;  %v3115_v11 = vld [vmem:[#allocation3 + $0x510] sm:$0xff] }
 0x2dd   : > { %16206 = vmatprep.subr.bf16.mxu0 %v17336_v15 }
 0x2df   : > { %14892 = vmatmul.mubr.msk.f32.gmra.mrb[20].mxu0 %vm734_vm1, %v17721_v24  ;;  %v3118_v24 = vld [vmem:[#allocation3 + $0x528] sm:$0xff] }
 0x2e0   : > { %16208 = vmatpush3.bf16.msra.mxu0 %v17344_v20  ;;  %14894 = vmatprep.mubr.msk.f32.mxu0 %vm734_vm1, %v17725_v38  ;;  %v3117_v38 = vld [vmem:[#allocation3 + $0x520] sm:$0xff] }
 0x2e1   : > { %16210 = vmatprep.subr.bf16.mxu0 %v17348_v21 }
 0x2e3   : > { %14895 = vmatmul.mubr.msk.f32.gmra.mrb[22].mxu0 %vm734_vm1, %v17729_v62  ;;  %v3120_v62 = vld [vmem:[#allocation3 + $0x538] sm:$0xff] }
 0x2e4   : > { %16212 = vmatpush3.bf16.msra.mxu0 %v17356_v27  ;;  %3193 = vmatprep.mubr.f32.mxu0 %v3114_v33 }
 0x2e5   : > { %16214 = vmatprep.subr.bf16.mxu0 %v17360_v28 }
 0x2e8   : > { %16216 = vmatpush3.bf16.msra.mxu0 %v17368_v34 }
 0x2e9   : > { %16218 = vmatprep.subr.bf16.mxu0 %v17372_v35 }
 0x2ec   : > { %16220 = vmatpush3.bf16.msra.mxu0 %v17380_v40 }
 0x2ed   : > { %16222 = vmatprep.subr.bf16.mxu0 %v17384_v41 }
 0x2f0   : > { %16224 = vmatpush3.bf16.msra.mxu0 %v17392_v46 }
 0x2f1   : > { %16226 = vmatprep.subr.bf16.mxu0 %v17396_v47 }
 0x2f4   : > { %16228 = vmatpush3.bf16.msra.mxu0 %v17402_v50 }
 0x2f5   : > { %14897 = vmatprep.subr.msk.mxu0 %vm759_vm0, %v12830_v42 }
 0x2f7   : > { %3194 = vmatmul.mubr.f32.vlgmr.msra.gmra.mrb[40].mxu0 %v3113_v51  ;;  %v17911_v51 = vld [vmem:[%s19210_s2 + $0x2c] sm:$0x7] }
 0x2f8   : > { %3198 = vmatprep.mubr.f32.mxu0 %v3116_v60  ;;  %14898 = vmatpush3.msk.msra.mxu0 %vm759_vm0, %v12830_v42 }
 0x2f9   : > { %14911 = vmatprep.subr.msk.mxu0 %vm759_vm0, %v17911_v51 }
 0x2fb   : > { %3199 = vmatmul.mubr.f32.gmra.mrb[42].mxu0 %v3115_v11 }
 0x2fc   : > { %3203 = vmatprep.mubr.f32.mxu0 %v3118_v24 }
 0x2ff   : > { %3204 = vmatmul.mubr.f32.gmra.mrb[44].mxu0 %v3117_v38 }
 0x300   : > { %3208 = vmatprep.mubr.f32.mxu0 %v3120_v62 }
 0x303   : > { %3209 = vmatmul.mubr.f32.gmra.mrb[46].mxu0 %v3119_v54 }
 0x304   : > { %3213 = vmatprep.mubr.f32.mxu0 %v3122_v55 }
 0x307   : > { %3214 = vmatmul.mubr.f32.gmra.mrb[48].mxu0 %v3121_v23 }
 0x308   : > { %3218 = vmatprep.mubr.f32.mxu0 %v3124_v1 }
 0x30b   : > { %3219 = vmatmul.mubr.f32.gmra.mrb[50].mxu0 %v3123_v2  ;;  %v14000_v25 = vpop.f32.mrb[128].mxu1 }
 0x30c   : > { %3223 = vmatprep.mubr.f32.mxu0 %v3126_v7  ;;  %v14001_v30 = vpop.f32.mrb[129].mxu1 }
 0x30d   : > { %v17886_v32 = vadd.f32 %v14001_v30, %v14000_v25 }
 0x30f   : > { %3224 = vmatmul.mubr.f32.gmra.mrb[52].mxu0 %v3125_v13 }
 0x310   : > { %3228 = vmatprep.mubr.f32.mxu0 %v3128_v58 }
 0x313   : > { %3229 = vmatmul.mubr.f32.gmra.mrb[54].mxu0 %v3127_v19 }
 0x317   : > { %v14003_v37 = vpop.f32.mrb[130].mxu1 }
 0x318   : > { %v14004_v48 = vpop.f32.mrb[131].mxu1 }
 0x319   : > { %v17888_v53 = vadd.f32 %v14004_v48, %v14003_v37 }
 0x31f   : > { %v14006_v56 = vpop.f32.mrb[132].mxu1 }
 0x320   : > { %v14007_v59 = vpop.f32.mrb[133].mxu1 }
 0x321   : > { %v17890_v61 = vadd.f32 %v14007_v59, %v14006_v56 }
 0x32b   : > { %v14009_v0 = vpop.f32.mrb[134].mxu1 }
 0x32c   : > { %v14010_v5 = vpop.f32.mrb[135].mxu1 }
 0x32d   : > { %v17892_v10 = vadd.f32 %v14010_v5, %v14009_v0 }
 0x330   : > { %v14012_v49 = vpop.f32.mrb[136].mxu1 }
 0x331   : > { %v14013_v17 = vpop.f32.mrb[137].mxu1 }
 0x332   : > { %v17894_v3 = vadd.f32 %v14013_v17, %v14012_v49 }
 0x334   : > { %v14015_v22 = vpop.f32.mrb[138].mxu1 }
 0x335   : > { %v14016_v43 = vpop.f32.mrb[139].mxu1 }
 0x336   : > { %v17896_v26 = vadd.f32 %v14016_v43, %v14015_v22 }
 0x338   : > { %v14018_v31 = vpop.f32.mrb[140].mxu1 }
 0x339   : > { %v14019_v45 = vpop.f32.mrb[141].mxu1 }
 0x33a   : > { %v17898_v36 = vadd.f32 %v14019_v45, %v14018_v31 }
 0x33c   : > { %v14021_v39 = vpop.f32.mrb[142].mxu1 }
 0x33d   : > { %v14022_v44 = vpop.f32.mrb[143].mxu1 }
 0x33e   : > { %v17900_v52 = vadd.f32 %v14022_v44, %v14021_v39 }
 0x340   : > { %v14065_v57 = vpop.f32.mrb[144].mxu1 }
 0x341   : > { %v14066_v63 = vpop.f32.mrb[145].mxu1 }
 0x342   : > { %v17902_v6 = vadd.f32 %v14066_v63, %v14065_v57 }
 0x344   : > { %v14068_v12 = vpop.f32.mrb[146].mxu1 }
 0x345   : > { %v14069_v18 = vpop.f32.mrb[147].mxu1 }
 0x346   : > { %v17904_v16 = vadd.f32 %v14069_v18, %v14068_v12 }
 0x348   : > { %v14071_v29 = vpop.f32.mrb[148].mxu1 }
 0x349   : > { %v14072_v33 = vpop.f32.mrb[149].mxu1 }
 0x34a   : > { %v17906_v42 = vadd.f32 %v14072_v33, %v14071_v29 }
 0x34c   : > { %v14074_v60 = vpop.f32.mrb[150].mxu1 }
 0x34d   : > { %v14075_v11 = vpop.f32.mrb[151].mxu1 }
 0x34e   : > { %v17915_v24 = vadd.f32 %v14075_v11, %v14074_v60 }
 0x35b   : > { %v14077_v38 = vpop.f32.mrb[152].mxu1 }
 0x35c   : > { %v14078_v62 = vpop.f32.mrb[153].mxu1 }
 0x35d   : > { %v17917_v54 = vadd.f32 %v14078_v62, %v14077_v38 }
 0x35f   : > { %v14080_v55 = vpop.f32.mrb[154].mxu1 }
 0x360   : > { %v14081_v23 = vpop.f32.mrb[155].mxu1 }
 0x361   : > { %v17919_v1 = vadd.f32 %v14081_v23, %v14080_v55 }
 0x363   : > { %v14083_v2 = vpop.f32.mrb[156].mxu1 }
 0x364   : > { %v14084_v7 = vpop.f32.mrb[157].mxu1 }
 0x365   : > { %v17921_v13 = vadd.f32 %v14084_v7, %v14083_v2 }
 0x367   : > { %v14086_v58 = vpop.f32.mrb[158].mxu1 }
 0x368   : > { %v14087_v19 = vpop.f32.mrb[159].mxu1 }
 0x369   : > { %v17923_v25 = vadd.f32 %v14087_v19, %v14086_v58 }
 0x36b   : > { %v14130_v30 = vpop.f32.mrb[160].mxu1 }
 0x36c   : > { %v14131_v37 = vpop.f32.mrb[161].mxu1 }
 0x36d   : > { %v17925_v48 = vadd.f32 %v14131_v37, %v14130_v30 }
 0x36f   : > { %v14133_v56 = vpop.f32.mrb[162].mxu1 }
 0x370   : > { %v14134_v59 = vpop.f32.mrb[163].mxu1 }
 0x371   : > { %v17927_v0 = vadd.f32 %v14134_v59, %v14133_v56 }
 0x373   : > { %v14136_v5 = vpop.f32.mrb[164].mxu1 }
 0x374   : > { %v14137_v49 = vpop.f32.mrb[165].mxu1 }
 0x375   : > { %v17929_v17 = vadd.f32 %v14137_v49, %v14136_v5 }
 0x37c   : > { %v14139_v22 = vpop.f32.mrb[166].mxu1 }
 0x37d   : > { %v14140_v43 = vpop.f32.mrb[167].mxu1 }
 0x37e   : > { %v17931_v31 = vadd.f32 %v14140_v43, %v14139_v22 }
 0x380   : > { %v14142_v45 = vpop.f32.mrb[168].mxu1 }
 0x381   : > { %v14143_v39 = vpop.f32.mrb[169].mxu1 }
 0x382   : > { %v17933_v44 = vadd.f32 %v14143_v39, %v14142_v45 }
 0x384   : > { %v14145_v57 = vpop.f32.mrb[170].mxu1 }
 0x385   : > { %v14146_v63 = vpop.f32.mrb[171].mxu1 }
 0x386   : > { %v17935_v12 = vadd.f32 %v14146_v63, %v14145_v57 }
 0x388   : > { %v14148_v18 = vpop.f32.mrb[172].mxu1 }
 0x389   : > { %v14149_v29 = vpop.f32.mrb[173].mxu1 }
 0x38a   : > { %v17937_v33 = vadd.f32 %v14149_v29, %v14148_v18 }
 0x38c   : > { %v14151_v60 = vpop.f32.mrb[174].mxu1 }
 0x38d   : > { %v14152_v11 = vpop.f32.mrb[175].mxu1 }
 0x38e   : > { %v17939_v38 = vadd.f32 %v14152_v11, %v14151_v60 }
 0x390   : > { %v14195_v62 = vpop.f32.mrb[176].mxu1 }
 0x391   : > { %v14196_v55 = vpop.f32.mrb[177].mxu1 }
 0x392   : > { %v17941_v23 = vadd.f32 %v14196_v55, %v14195_v62 }
 0x394   : > { %v14198_v2 = vpop.f32.mrb[178].mxu1 }
 0x395   : > { %v14199_v7 = vpop.f32.mrb[179].mxu1 }
 0x396   : > { %v17943_v58 = vadd.f32 %v14199_v7, %v14198_v2 }
 0x398   : > { %v14201_v19 = vpop.f32.mrb[180].mxu1 }
 0x399   : > { %v14202_v30 = vpop.f32.mrb[181].mxu1 }
 0x39a   : > { %v17945_v37 = vadd.f32 %v14202_v30, %v14201_v19 }
 0x39c   : > { %v14204_v56 = vpop.f32.mrb[182].mxu1 }
 0x39d   : > { %v14205_v59 = vpop.f32.mrb[183].mxu1 }
 0x39e   : > { %v17947_v5 = vadd.f32 %v14205_v59, %v14204_v56  ;;  %v12850_v59 = vld [vmem:[%s19210_s2 + $0x30] sm:$0x7] }
 0x3a0   : > { %v14207_v49 = vpop.f32.mrb[184].mxu1 }
 0x3a1   : > { %v14208_v22 = vpop.f32.mrb[185].mxu1 }
 0x3a2   : > { %v17949_v43 = vadd.f32 %v14208_v22, %v14207_v49 }
 0x3a4   : > { %v14210_v45 = vpop.f32.mrb[186].mxu1 }
 0x3a5   : > { %v14211_v39 = vpop.f32.mrb[187].mxu1 }
 0x3a6   : > { %v17951_v57 = vadd.f32 %v14211_v39, %v14210_v45 }
 0x3a8   : > { %v14213_v63 = vpop.f32.mrb[188].mxu1 }
 0x3a9   : > { %v14214_v18 = vpop.f32.mrb[189].mxu1 }
 0x3aa   : > { %v17953_v29 = vadd.f32 %v14214_v18, %v14213_v63 }
 0x3ac   : > { %v14216_v60 = vpop.f32.mrb[190].mxu1 }
 0x3ad   : > { %v14217_v11 = vpop.f32.mrb[191].mxu1 }
 0x3ae   : > { %v17955_v62 = vadd.f32 %v14217_v11, %v14216_v60 }
 0x3ca   : > { %v13935_v55 = vpop.f32.mrb[40].mxu0 }
 0x3cb   : > { %v13936_v2 = vpop.f32.mrb[41].mxu0 }
 0x3cc   : > { %v13937_v7 = vadd.f32 %v13936_v2, %v13935_v55 }
 0x3ce   : > { %v13938_v19 = vpop.f32.mrb[42].mxu0  ;;  %14899 = vmatprep.mubr.msk.f32.mxu0 %vm734_vm1, %v13937_v7 }
 0x3cf   : > { %v13939_v30 = vpop.f32.mrb[43].mxu0 }
 0x3d0   : > { %v13940_v56 = vadd.f32 %v13939_v30, %v13938_v19 }
 0x3d2   : > { %v13941_v49 = vpop.f32.mrb[44].mxu0  ;;  %14900 = vmatmul.mubr.msk.f32.vlgmr.msra.gmra.mrb[16].mxu0 %vm734_vm1, %v13940_v56 }
 0x3d3   : > { %v13942_v22 = vpop.f32.mrb[45].mxu0  ;;  %14912 = vmatpush3.msk.msra.mxu0 %vm759_vm0, %v17911_v51 }
 0x3d4   : > { %v13943_v45 = vadd.f32 %v13942_v22, %v13941_v49  ;;  %14925 = vmatprep.subr.msk.mxu0 %vm759_vm0, %v12850_v59 }
 0x3d6   : > { %v13944_v39 = vpop.f32.mrb[46].mxu0  ;;  %14902 = vmatprep.mubr.msk.f32.mxu0 %vm734_vm1, %v13943_v45 }
 0x3d7   : > { %v13945_v63 = vpop.f32.mrb[47].mxu0 }
 0x3d8   : > { %v13946_v18 = vadd.f32 %v13945_v63, %v13944_v39  ;;  %v12860_v39 = vld [vmem:[%s19210_s2 + $0x34] sm:$0x7] }
 0x3da   : > { %v13947_v60 = vpop.f32.mrb[48].mxu0  ;;  %14903 = vmatmul.mubr.msk.f32.gmra.mrb[18].mxu0 %vm734_vm1, %v13946_v18 }
 0x3db   : > { %v13948_v11 = vpop.f32.mrb[49].mxu0 }
 0x3dc   : > { %v13949_v55 = vadd.f32 %v13948_v11, %v13947_v60 }
 0x3de   : > { %v13950_v2 = vpop.f32.mrb[50].mxu0  ;;  %14905 = vmatprep.mubr.msk.f32.mxu0 %vm734_vm1, %v13949_v55 }
 0x3df   : > { %v13951_v7 = vpop.f32.mrb[51].mxu0 }
 0x3e0   : > { %v13952_v19 = vadd.f32 %v13951_v7, %v13950_v2 }
 0x3e2   : > { %v13953_v30 = vpop.f32.mrb[52].mxu0  ;;  %14906 = vmatmul.mubr.msk.f32.gmra.mrb[20].mxu0 %vm734_vm1, %v13952_v19 }
 0x3e3   : > { %v13954_v51 = vpop.f32.mrb[53].mxu0 }
 0x3e4   : > { %v13955_v56 = vadd.f32 %v13954_v51, %v13953_v30 }
 0x3e6   : > { %v13956_v49 = vpop.f32.mrb[54].mxu0  ;;  %14908 = vmatprep.mubr.msk.f32.mxu0 %vm734_vm1, %v13955_v56 }
 0x3e7   : > { %v13957_v22 = vpop.f32.mrb[55].mxu0 }
 0x3e8   : > { %v13958_v45 = vadd.f32 %v13957_v22, %v13956_v49 }
 0x3ea   : > { %14909 = vmatmul.mubr.msk.f32.gmra.mrb[22].mxu0 %vm734_vm1, %v13958_v45 }
 0x3eb   : > { %14913 = vmatprep.mubr.msk.f32.mxu0 %vm734_vm1, %v17886_v32  ;;  %v12870_v32 = vld [vmem:[%s19210_s2 + $0x38] sm:$0x7] }
 0x3ee   : > { %14914 = vmatmul.mubr.msk.f32.vlgmr.msra.gmra.mrb[16].mxu0 %vm734_vm1, %v17888_v53  ;;  %v4447_v53 = vld [vmem:[#allocation3 + $0x7f0] sm:$0xff] }
 0x3ef   : > { %14916 = vmatprep.mubr.msk.f32.mxu0 %vm734_vm1, %v17890_v61  ;;  %14926 = vmatpush3.msk.msra.mxu0 %vm759_vm0, %v12850_v59 }
 0x3f0   : > { %14939 = vmatprep.subr.msk.mxu0 %vm759_vm0, %v12860_v39 }
 0x3f2   : > { %14917 = vmatmul.mubr.msk.f32.gmra.mrb[18].mxu0 %vm734_vm1, %v17892_v10 }
 0x3f3   : > { %14919 = vmatprep.mubr.msk.f32.mxu0 %vm734_vm1, %v17894_v3 }
 0x3f6   : > { %14920 = vmatmul.mubr.msk.f32.gmra.mrb[20].mxu0 %vm734_vm1, %v17896_v26 }
 0x3f7   : > { %14922 = vmatprep.mubr.msk.f32.mxu0 %vm734_vm1, %v17898_v36 }
 0x3fa   : > { %14923 = vmatmul.mubr.msk.f32.gmra.mrb[22].mxu0 %vm734_vm1, %v17900_v52 }
 0x3fb   : > { %14927 = vmatprep.mubr.msk.f32.mxu0 %vm734_vm1, %v17902_v6 }
 0x3fe   : > { %14928 = vmatmul.mubr.msk.f32.vlgmr.msra.gmra.mrb[16].mxu0 %vm734_vm1, %v17904_v16 }
 0x3ff   : > { %14930 = vmatprep.mubr.msk.f32.mxu0 %vm734_vm1, %v17906_v42  ;;  %14940 = vmatpush3.msk.msra.mxu0 %vm759_vm0, %v12860_v39 }
 0x400   : > { %14953 = vmatprep.subr.msk.mxu0 %vm759_vm0, %v12870_v32 }
 0x402   : > { %14931 = vmatmul.mubr.msk.f32.gmra.mrb[18].mxu0 %vm734_vm1, %v17915_v24 }
 0x403   : > { %14933 = vmatprep.mubr.msk.f32.mxu0 %vm734_vm1, %v17917_v54 }
 0x406   : > { %14934 = vmatmul.mubr.msk.f32.gmra.mrb[20].mxu0 %vm734_vm1, %v17919_v1 }
 0x407   : > { %14936 = vmatprep.mubr.msk.f32.mxu0 %vm734_vm1, %v17921_v13 }
 0x40a   : > { %14937 = vmatmul.mubr.msk.f32.gmra.mrb[22].mxu0 %vm734_vm1, %v17923_v25 }
 0x40b   : > { %14941 = vmatprep.mubr.msk.f32.mxu0 %vm734_vm1, %v17925_v48 }
 0x40e   : > { %14942 = vmatmul.mubr.msk.f32.vlgmr.msra.gmra.mrb[16].mxu0 %vm734_vm1, %v17927_v0 }
 0x40f   : > { %14944 = vmatprep.mubr.msk.f32.mxu0 %vm734_vm1, %v17929_v17  ;;  %14954 = vmatpush3.msk.msra.mxu0 %vm759_vm0, %v12870_v32 }
 0x410   : > { %16358 = vmatprep.subr.bf16.mxu0 %v17316_v4  ;;  %v4434_v4 = vld [vmem:[#allocation3 + $0x788] sm:$0xff] }
 0x412   : > { %14945 = vmatmul.mubr.msk.f32.gmra.mrb[18].mxu0 %vm734_vm1, %v17931_v31 }
 0x413   : > { %14947 = vmatprep.mubr.msk.f32.mxu0 %vm734_vm1, %v17933_v44 }
 0x416   : > { %14948 = vmatmul.mubr.msk.f32.gmra.mrb[20].mxu0 %vm734_vm1, %v17935_v12 }
 0x417   : > { %14950 = vmatprep.mubr.msk.f32.mxu0 %vm734_vm1, %v17937_v33 }
 0x41a   : > { %14951 = vmatmul.mubr.msk.f32.gmra.mrb[22].mxu0 %vm734_vm1, %v17939_v38 }
 0x41b   : > { %14955 = vmatprep.mubr.msk.f32.mxu0 %vm734_vm1, %v17941_v23 }
 0x41e   : > { %14956 = vmatmul.mubr.msk.f32.vlgmr.msra.gmra.mrb[16].mxu0 %vm734_vm1, %v17943_v58 }
 0x41f   : > { %16360 = vmatpush3.bf16.msra.mxu0 %v17321_v8  ;;  %14958 = vmatprep.mubr.msk.f32.mxu0 %vm734_vm1, %v17945_v37  ;;  %v12880_v8 = vld [vmem:[%s19210_s2 + $0x3c] sm:$0x7]  ;;  %v4735_v37 = vld [vmem:[%s19212_s4] sm:$0xff] }
 0x420   : > { %16362 = vmatprep.subr.bf16.mxu0 %v17323_v9  ;;  %v4433_v9 = vld [vmem:[#allocation3 + $0x780] sm:$0xff]  ;;  %14997 = vmatprep.mubr.msk.f32.mxu1 %vm4737_vm2, %v4735_v37 }
 0x422   : > { %14959 = vmatmul.mubr.msk.f32.gmra.mrb[18].mxu0 %vm734_vm1, %v17947_v5  ;;  %v12909_v5 = vld [vmem:[%s19212_s4 + $0x30] sm:$0xff] }
 0x423   : > { %16364 = vmatpush3.bf16.msra.mxu0 %v17332_v14  ;;  %14961 = vmatprep.mubr.msk.f32.mxu0 %vm734_vm1, %v17949_v43  ;;  %v4436_v14 = vld [vmem:[#allocation3 + $0x798] sm:$0xff] }
 0x424   : > { %16366 = vmatprep.subr.bf16.mxu0 %v17336_v15  ;;  %v4435_v15 = vld [vmem:[#allocation3 + $0x790] sm:$0xff]  ;;  %v12890_v43 = vld [vmem:[%s19211_s3] ss:$0 sm:$0xff] }
 0x426   : > { %14962 = vmatmul.mubr.msk.f32.gmra.mrb[20].mxu0 %vm734_vm1, %v17951_v57 }
 0x427   : > { %16368 = vmatpush3.bf16.msra.mxu0 %v17344_v20  ;;  %14964 = vmatprep.mubr.msk.f32.mxu0 %vm734_vm1, %v17953_v29  ;;  %v4438_v20 = vld [vmem:[#allocation3 + $0x7a8] sm:$0xff] }
 0x428   : > { %16370 = vmatprep.subr.bf16.mxu0 %v17348_v21  ;;  %v4437_v21 = vld [vmem:[#allocation3 + $0x7a0] sm:$0xff] }
 0x42a   : > { %14965 = vmatmul.mubr.msk.f32.gmra.mrb[22].mxu0 %vm734_vm1, %v17955_v62 }
 0x42b   : > { %16372 = vmatpush3.bf16.msra.mxu0 %v17356_v27  ;;  %4513 = vmatprep.mubr.f32.mxu0 %v4434_v4  ;;  %v4440_v27 = vld [vmem:[#allocation3 + $0x7b8] sm:$0xff] }
 0x42c   : > { %16374 = vmatprep.subr.bf16.mxu0 %v17360_v28  ;;  %v4439_v28 = vld [vmem:[#allocation3 + $0x7b0] sm:$0xff] }
 0x42f   : > { %16376 = vmatpush3.bf16.msra.mxu0 %v17368_v34  ;;  %v4442_v34 = vld [vmem:[#allocation3 + $0x7c8] sm:$0xff] }
 0x430   : > { %16378 = vmatprep.subr.bf16.mxu0 %v17372_v35  ;;  %v4441_v35 = vld [vmem:[#allocation3 + $0x7c0] sm:$0xff] }
 0x433   : > { %16380 = vmatpush3.bf16.msra.mxu0 %v17380_v40  ;;  %v4444_v40 = vld [vmem:[#allocation3 + $0x7d8] sm:$0xff] }
 0x434   : > { %16382 = vmatprep.subr.bf16.mxu0 %v17384_v41  ;;  %v4443_v41 = vld [vmem:[#allocation3 + $0x7d0] sm:$0xff] }
 0x437   : > { %16384 = vmatpush3.bf16.msra.mxu0 %v17392_v46  ;;  %v4446_v46 = vld [vmem:[#allocation3 + $0x7e8] sm:$0xff] }
 0x438   : > { %16386 = vmatprep.subr.bf16.mxu0 %v17396_v47  ;;  %v4445_v47 = vld [vmem:[#allocation3 + $0x7e0] sm:$0xff] }
 0x43b   : > { %16388 = vmatpush3.bf16.msra.mxu0 %v17402_v50  ;;  %v4448_v50 = vld [vmem:[#allocation3 + $0x7f8] sm:$0xff] }
 0x43c   : > { %14967 = vmatprep.subr.msk.mxu0 %vm759_vm0, %v12880_v8 }
 0x43e   : > { %4514 = vmatmul.mubr.f32.vlgmr.msra.gmra.mrb[56].mxu0 %v4433_v9 }
 0x43f   : > { %4518 = vmatprep.mubr.f32.mxu0 %v4436_v14  ;;  %14968 = vmatpush3.msk.msra.mxu0 %vm759_vm0, %v12880_v8 }
 0x442   : > { %4519 = vmatmul.mubr.f32.gmra.mrb[58].mxu0 %v4435_v15 }
 0x443   : > { %4523 = vmatprep.mubr.f32.mxu0 %v4438_v20 }
 0x446   : > { %4524 = vmatmul.mubr.f32.gmra.mrb[60].mxu0 %v4437_v21 }
 0x447   : > { %4528 = vmatprep.mubr.f32.mxu0 %v4440_v27 }
 0x44a   : > { %4529 = vmatmul.mubr.f32.gmra.mrb[62].mxu0 %v4439_v28 }
 0x44b   : > { %4533 = vmatprep.mubr.f32.mxu0 %v4442_v34 }
 0x44e   : > { %4534 = vmatmul.mubr.f32.gmra.mrb[64].mxu0 %v4441_v35 }
 0x44f   : > { %4538 = vmatprep.mubr.f32.mxu0 %v4444_v40 }
 0x452   : > { %4539 = vmatmul.mubr.f32.gmra.mrb[66].mxu0 %v4443_v41 }
 0x453   : > { %4543 = vmatprep.mubr.f32.mxu0 %v4446_v46 }
 0x456   : > { %4544 = vmatmul.mubr.f32.gmra.mrb[68].mxu0 %v4445_v47 }
 0x457   : > { %4548 = vmatprep.mubr.f32.mxu0 %v4448_v50 }
 0x45a   : > { %4549 = vmatmul.mubr.f32.gmra.mrb[70].mxu0 %v4447_v53  ;;  %v4736_v53 = vld [vmem:[%s19212_s4 + $0x8] sm:$0xff] }
 0x511   : > { %v14260_v61 = vpop.f32.mrb[56].mxu0 }
 0x512   : > { %v14261_v10 = vpop.f32.mrb[57].mxu0 }
 0x513   : > { %v14262_v3 = vadd.f32 %v14261_v10, %v14260_v61  ;;  %v12910_v61 = vld [vmem:[%s19212_s4 + $0x38] sm:$0xff]  ;;  %v12893_v10 = vld [vmem:[%s19212_s4 + $0x10] sm:$0xff] }
 0x515   : > { %v14263_v26 = vpop.f32.mrb[58].mxu0  ;;  %14969 = vmatprep.mubr.msk.f32.mxu0 %vm734_vm1, %v14262_v3  ;;  %v12916_v3 = vld [vmem:[%s19212_s4 + $0x40] sm:$0xff] }
 0x516   : > { %v14264_v36 = vpop.f32.mrb[59].mxu0 }
 0x517   : > { %v14265_v52 = vadd.f32 %v14264_v36, %v14263_v26  ;;  %v12894_v26 = vld [vmem:[%s19212_s4 + $0x18] sm:$0xff]  ;;  %v12917_v36 = vld [vmem:[%s19212_s4 + $0x48] sm:$0xff] }
 0x519   : > { %v14266_v6 = vpop.f32.mrb[60].mxu0  ;;  %14970 = vmatmul.mubr.msk.f32.vlgmr.msra.gmra.mrb[16].mxu0 %vm734_vm1, %v14265_v52  ;;  %v12930_v52 = vld [vmem:[%s19212_s4 + $0x60] sm:$0xff] }
 0x51a   : > { %v14267_v16 = vpop.f32.mrb[61].mxu0 }
 0x51b   : > { %v14268_v42 = vadd.f32 %v14267_v16, %v14266_v6  ;;  %v12931_v6 = vld [vmem:[%s19212_s4 + $0x68] sm:$0xff]  ;;  %v12944_v16 = vld [vmem:[%s19212_s4 + $0x80] sm:$0xff] }
 0x51d   : > { %v14269_v24 = vpop.f32.mrb[62].mxu0  ;;  %14972 = vmatprep.mubr.msk.f32.mxu0 %vm734_vm1, %v14268_v42  ;;  %v12945_v42 = vld [vmem:[%s19212_s4 + $0x88] sm:$0xff] }
 0x51e   : > { %v14270_v54 = vpop.f32.mrb[63].mxu0 }
 0x51f   : > { %v14271_v1 = vadd.f32 %v14270_v54, %v14269_v24  ;;  %v12951_v24 = vld [vmem:[%s19212_s4 + $0x90] sm:$0xff]  ;;  %v12952_v54 = vld [vmem:[%s19212_s4 + $0x98] sm:$0xff] }
 0x521   : > { %v14272_v13 = vpop.f32.mrb[64].mxu0  ;;  %14973 = vmatmul.mubr.msk.f32.gmra.mrb[18].mxu0 %vm734_vm1, %v14271_v1  ;;  %v12965_v1 = vld [vmem:[%s19212_s4 + $0xb0] sm:$0xff] }
 0x522   : > { %v14273_v25 = vpop.f32.mrb[65].mxu0 }
 0x523   : > { %v14274_v48 = vadd.f32 %v14273_v25, %v14272_v13  ;;  %v12966_v13 = vld [vmem:[%s19212_s4 + $0xb8] sm:$0xff]  ;;  %v12972_v25 = vld [vmem:[%s19212_s4 + $0xc0] sm:$0xff] }
 0x525   : > { %v14275_v0 = vpop.f32.mrb[66].mxu0  ;;  %14975 = vmatprep.mubr.msk.f32.mxu0 %vm734_vm1, %v14274_v48  ;;  %v12973_v48 = vld [vmem:[%s19212_s4 + $0xc8] sm:$0xff] }
 0x526   : > { %v14276_v17 = vpop.f32.mrb[67].mxu0 }
 0x527   : > { %v14277_v31 = vadd.f32 %v14276_v17, %v14275_v0  ;;  %v12897_v0 = vld [vmem:[%s19213_s5 + $0x8] sm:$0xff]  ;;  %v4819_v17 = vld [vmem:[%s19213_s5] sm:$0xff] }
 0x529   : > { %v14278_v44 = vpop.f32.mrb[68].mxu0  ;;  %14976 = vmatmul.mubr.msk.f32.gmra.mrb[20].mxu0 %vm734_vm1, %v14277_v31 }
 0x52a   : > { %v14279_v12 = vpop.f32.mrb[69].mxu0 }
 0x52b   : > { %v14280_v33 = vadd.f32 %v14279_v12, %v14278_v44 }
 0x52d   : > { %v14281_v38 = vpop.f32.mrb[70].mxu0  ;;  %14978 = vmatprep.mubr.msk.f32.mxu0 %vm734_vm1, %v14280_v33 }
 0x52e   : > { %v14282_v23 = vpop.f32.mrb[71].mxu0 }
 0x52f   : > { %v14283_v58 = vadd.f32 %v14282_v23, %v14281_v38  ;;  %v12902_v38 = vld [vmem:[%s19212_s4 + $0x20] sm:$0xff]  ;;  %v12903_v23 = vld [vmem:[%s19212_s4 + $0x28] sm:$0xff] }
 0x531   : > { %14979 = vmatmul.mubr.msk.f32.gmra.mrb[22].mxu0 %vm734_vm1, %v14283_v58  ;;  %v12906_v58 = vld [vmem:[%s19213_s5 + $0x10] sm:$0xff]  ;;  %vm10185_vm1 = vcmask 1040384  }
 0x532   : > { %15069 = vmatprep.mubr.msk.f32.mxu0 %vm4737_vm2, %v12909_v5 }
 0x5ec   : > { %v14971_v57 = vpop.f32.mrb[16].mxu0 }
 0x5ed   : > { %v4704_v29 = vadd.f32 %v14971_v57, %v12890_v43  ;;  %v4649_v62 = vpop.f32.mrb[17].mxu0 }
 0x5ee   : > { %v4703_v59 = vadd.f32 %v12890_v43, %v4649_v62 }
 0x5ef   : > { %vm4712_vm3 = vcmp.ge.f32.partialorder %v4704_v29, 0.0  ;;  %v4720_v63 = vmul.f32 0.2, %v4704_v29 }
 0x5f0   : > { %vm4711_vm4 = vcmp.ge.f32.partialorder %v4703_v59, 0.0  ;;  %v4719_v18 = vmul.f32 0.2, %v4703_v59 }
 0x5f1   : > { %v4728_v60 = vsel %vm4712_vm3, %v4704_v29, %v4720_v63  ;;  %v12920_v63 = vld [vmem:[%s19213_s5 + $0x20] sm:$0xff]  ;;  %vm17184_vm3 = vmmov 1  }
 0x5f2   : > { %v4727_v11 = vsel %vm4711_vm4, %v4703_v59, %v4719_v18  ;;  %v12923_v18 = vld [vmem:[%s19212_s4 + $0x50] sm:$0xff]  ;;  %vm18783_vm4 = vmpackc.low %vm10185_vm1, %vm17184_vm3 }
 0x5f3   : > { %v18086_v55 = vpack.c.bf16 %v4728_v60, %v4727_v11  ;;  %v12924_v60 = vld [vmem:[%s19212_s4 + $0x58] sm:$0xff]  ;;  %v12927_v11 = vld [vmem:[%s19213_s5 + $0x28] sm:$0xff] }
 0x5f4   : > { %v14974_v2 = vpop.f32.mrb[18].mxu0 }
 0x5f5   : > { %v4706_v7 = vadd.f32 %v14974_v2, %v12890_v43  ;;  %v4659_v19 = vpop.f32.mrb[19].mxu0  ;;  %16390 = vmatprep.subr.bf16.mxu1 %v18086_v55  ;;  %16438 = vmatprep.subr.bf16.mxu0 %v18086_v55  ;;  %v12934_v2 = vld [vmem:[%s19213_s5 + $0x30] sm:$0xff] }
 0x5f6   : > { %v4705_v30 = vadd.f32 %v12890_v43, %v4659_v19  ;;  %16392 = vmatpush3.bf16.msra.mxu1 %v18086_v55  ;;  %16440 = vmatpush3.bf16.msra.mxu0 %v18086_v55 }
 0x5f7   : > { %vm4714_vm5 = vcmp.ge.f32.partialorder %v4706_v7, 0.0  ;;  %v4722_v51 = vmul.f32 0.2, %v4706_v7 }
 0x5f8   : > { %vm4713_vm6 = vcmp.ge.f32.partialorder %v4705_v30, 0.0  ;;  %v4721_v56 = vmul.f32 0.2, %v4705_v30 }
 0x5f9   : > { %v4730_v49 = vsel %vm4714_vm5, %v4706_v7, %v4722_v51  ;;  %vm10181_vm5 = vcmask 72704  }
 0x5fa   : > { %v4729_v22 = vsel %vm4713_vm6, %v4705_v30, %v4721_v56  ;;  %v12937_v56 = vld [vmem:[%s19212_s4 + $0x70] sm:$0xff]  ;;  %vm10343_vm6 = vcmask 261120  }
 0x5fb   : > { %v18092_v45 = vpack.c.bf16 %v4730_v49, %v4729_v22  ;;  %v12938_v49 = vld [vmem:[%s19212_s4 + $0x78] sm:$0xff] }
 0x5fc   : > { %v14977_v39 = vpop.f32.mrb[20].mxu0  ;;  %v12941_v22 = vld [vmem:[%s19213_s5 + $0x38] sm:$0xff] }
 0x5fd   : > { %v4708_v32 = vadd.f32 %v14977_v39, %v12890_v43  ;;  %v4669_v4 = vpop.f32.mrb[21].mxu0  ;;  %16394 = vmatprep.subr.bf16.mxu1 %v18092_v45  ;;  %16442 = vmatprep.subr.bf16.mxu0 %v18092_v45 }
 0x5fe   : > { %v4707_v8 = vadd.f32 %v12890_v43, %v4669_v4  ;;  %16396 = vmatpush3.bf16.msra.mxu1 %v18092_v45  ;;  %16444 = vmatpush3.bf16.msra.mxu0 %v18092_v45  ;;  %v12948_v4 = vld [vmem:[%s19213_s5 + $0x40] sm:$0xff] }
 0x5ff   : > { %vm4716_vm7 = vcmp.ge.f32.partialorder %v4708_v32, 0.0  ;;  %v4724_v9 = vmul.f32 0.2, %v4708_v32 }
 0x600   : > { %vm4715_vm8 = vcmp.ge.f32.partialorder %v4707_v8, 0.0  ;;  %v4723_v14 = vmul.f32 0.2, %v4707_v8 }
 0x601   : > { %v4732_v15 = vsel %vm4716_vm7, %v4708_v32, %v4724_v9  ;;  %vm12654_vm7 = vcmask 3072  }
 0x602   : > { %v4731_v20 = vsel %vm4715_vm8, %v4707_v8, %v4723_v14 }
 0x603   : > { %v18098_v21 = vpack.c.bf16 %v4732_v15, %v4731_v20  ;;  %v12955_v20 = vld [vmem:[%s19213_s5 + $0x48] sm:$0xff] }
 0x604   : > { %v14980_v27 = vpop.f32.mrb[22].mxu0 }
 0x605   : > { %v4710_v28 = vadd.f32 %v14980_v27, %v12890_v43  ;;  %v4679_v34 = vpop.f32.mrb[23].mxu0  ;;  %16398 = vmatprep.subr.bf16.mxu1 %v18098_v21  ;;  %16446 = vmatprep.subr.bf16.mxu0 %v18098_v21  ;;  %v12958_v27 = vld [vmem:[%s19212_s4 + $0xa0] sm:$0xff] }
 0x606   : > { %v4709_v35 = vadd.f32 %v12890_v43, %v4679_v34  ;;  %16400 = vmatpush3.bf16.msra.mxu1 %v18098_v21  ;;  %16448 = vmatpush3.bf16.msra.mxu0 %v18098_v21  ;;  %v12913_v43 = vld [vmem:[%s19213_s5 + $0x18] sm:$0xff]  ;;  %v12962_v34 = vld [vmem:[%s19213_s5 + $0x50] sm:$0xff] }
 0x607   : > { %vm4718_vm9 = vcmp.ge.f32.partialorder %v4710_v28, 0.0  ;;  %v4726_v40 = vmul.f32 0.2, %v4710_v28 }
 0x608   : > { %vm4717_vm10 = vcmp.ge.f32.partialorder %v4709_v35, 0.0  ;;  %v4725_v41 = vmul.f32 0.2, %v4709_v35 }
 0x609   : > { %v4734_v46 = vsel %vm4718_vm9, %v4710_v28, %v4726_v40  ;;  %v12959_v28 = vld [vmem:[%s19212_s4 + $0xa8] sm:$0xff] }
 0x60a   : > { %v4733_v47 = vsel %vm4717_vm10, %v4709_v35, %v4725_v41  ;;  %v12969_v41 = vld [vmem:[%s19213_s5 + $0x58] sm:$0xff] }
 0x60b   : > { %v18104_v50 = vpack.c.bf16 %v4734_v46, %v4733_v47 }
 0x60d   : > { %16402 = vmatprep.subr.bf16.mxu1 %v18104_v50  ;;  %16450 = vmatprep.subr.bf16.mxu0 %v18104_v50 }
 0x60e   : > { %16404 = vmatpush3.bf16.msra.mxu1 %v18104_v50  ;;  %16452 = vmatpush3.bf16.msra.mxu0 %v18104_v50 }
 0x60f   : > { %16406 = vmatprep.subr.bf16.mxu1 %v18086_v55  ;;  %16454 = vmatprep.subr.bf16.mxu0 %v18086_v55 }
 0x611   : > { %14998 = vmatmul.mubr.msk.f32.vlgmr.msra.gmra.mrb[192].mxu1 %vm4737_vm2, %v4736_v53  ;;  %15070 = vmatmul.mubr.msk.f32.vlgmr.msra.gmra.mrb[72].mxu0 %vm4737_vm2, %v12910_v61  ;;  %v12986_v53 = vld [vmem:[%s19212_s4 + $0xe0] sm:$0xff]  ;;  %v12987_v61 = vld [vmem:[%s19212_s4 + $0xe8] sm:$0xff] }
 0x612   : > { %16408 = vmatpush3.bf16.msra.mxu1 %v18086_v55  ;;  %16456 = vmatpush3.bf16.msra.mxu0 %v18086_v55 }
 0x613   : > { %16410 = vmatprep.subr.bf16.mxu1 %v18092_v45  ;;  %16458 = vmatprep.subr.bf16.mxu0 %v18092_v45 }
 0x614   : > { %15016 = vmatprep.mubr.msk.f32.mxu1 %vm4737_vm2, %v12893_v10  ;;  %15093 = vmatprep.mubr.msk.f32.mxu0 %vm4737_vm2, %v12916_v3 }
 0x616   : > { %16412 = vmatpush3.bf16.msra.mxu1 %v18092_v45  ;;  %16460 = vmatpush3.bf16.msra.mxu0 %v18092_v45 }
 0x617   : > { %16414 = vmatprep.subr.bf16.mxu1 %v18098_v21  ;;  %16462 = vmatprep.subr.bf16.mxu0 %v18098_v21 }
 0x61a   : > { %16416 = vmatpush3.bf16.msra.mxu1 %v18098_v21  ;;  %16464 = vmatpush3.bf16.msra.mxu0 %v18098_v21 }
 0x61b   : > { %16418 = vmatprep.subr.bf16.mxu1 %v18104_v50  ;;  %16466 = vmatprep.subr.bf16.mxu0 %v18104_v50 }
 0x61e   : > { %16420 = vmatpush3.bf16.msra.mxu1 %v18104_v50  ;;  %16468 = vmatpush3.bf16.msra.mxu0 %v18104_v50 }
 0x61f   : > { %16486 = vmatprep.subr.bf16.mxu0 %v18086_v55  ;;  %15019 = vmatprep.subr.mxu1 %v12897_v0 }
 0x621   : > { %15017 = vmatmul.mubr.msk.f32.vlgmr.msra.gmra.mrb[194].mxu1 %vm4737_vm2, %v12894_v26  ;;  %15094 = vmatmul.mubr.msk.f32.vlgmr.msra.gmra.mrb[74].mxu0 %vm4737_vm2, %v12917_v36  ;;  %v12976_v26 = vld [vmem:[%s19213_s5 + $0x60] sm:$0xff]  ;;  %v12979_v36 = vld [vmem:[%s19212_s4 + $0xd0] sm:$0xff] }
 0x622   : > { %16488 = vmatpush3.bf16.msra.mxu0 %v18086_v55  ;;  %15141 = vmatprep.mubr.msk.f32.mxu0 %vm4737_vm2, %v12930_v52  ;;  %v12980_v52 = vld [vmem:[%s19212_s4 + $0xd8] sm:$0xff] }
 0x623   : > { %16490 = vmatprep.subr.bf16.mxu0 %v18092_v45  ;;  %15020 = vmatpush3.msra.mxu1 %v12897_v0  ;;  %v13000_v0 = vld [vmem:[%s19214_s6] ss:$0 sm:$0xff] }
 0x624   : > { %15024 = vmatprep.subr.mxu1 %v4819_v17 }
 0x626   : > { %16492 = vmatpush3.bf16.msra.mxu0 %v18092_v45 }
 0x627   : > { %16494 = vmatprep.subr.bf16.mxu0 %v18098_v21 }
 0x62a   : > { %16496 = vmatpush3.bf16.msra.mxu0 %v18098_v21 }
 0x62b   : > { %16498 = vmatprep.subr.bf16.mxu0 %v18104_v50 }
 0x62e   : > { %16500 = vmatpush3.bf16.msra.mxu0 %v18104_v50 }
 0x62f   : > { %16518 = vmatprep.subr.bf16.mxu0 %v18086_v55 }
 0x631   : > { %15142 = vmatmul.mubr.msk.f32.vlgmr.msra.gmra.mrb[76].mxu0 %vm4737_vm2, %v12931_v6  ;;  %v12983_v6 = vld [vmem:[%s19213_s5 + $0x68] sm:$0xff] }
 0x632   : > { %16520 = vmatpush3.bf16.msra.mxu0 %v18086_v55  ;;  %15189 = vmatprep.mubr.msk.f32.mxu0 %vm4737_vm2, %v12944_v16  ;;  %v12990_v16 = vld [vmem:[%s19213_s5 + $0x70] sm:$0xff] }
 0x633   : > { %16522 = vmatprep.subr.bf16.mxu0 %v18092_v45 }
 0x636   : > { %16524 = vmatpush3.bf16.msra.mxu0 %v18092_v45 }
 0x637   : > { %16526 = vmatprep.subr.bf16.mxu0 %v18098_v21 }
 0x63a   : > { %16528 = vmatpush3.bf16.msra.mxu0 %v18098_v21 }
 0x63b   : > { %16530 = vmatprep.subr.bf16.mxu0 %v18104_v50 }
 0x63e   : > { %16532 = vmatpush3.bf16.msra.mxu0 %v18104_v50 }
 0x63f   : > { %16534 = vmatprep.subr.bf16.mxu0 %v18086_v55 }
 0x641   : > { %15190 = vmatmul.mubr.msk.f32.vlgmr.msra.gmra.mrb[78].mxu0 %vm4737_vm2, %v12945_v42 }
 0x642   : > { %16536 = vmatpush3.bf16.msra.mxu0 %v18086_v55  ;;  %15213 = vmatprep.mubr.msk.f32.mxu0 %vm4737_vm2, %v12951_v24 }
 0x643   : > { %16538 = vmatprep.subr.bf16.mxu0 %v18092_v45 }
 0x646   : > { %16540 = vmatpush3.bf16.msra.mxu0 %v18092_v45 }
 0x647   : > { %16542 = vmatprep.subr.bf16.mxu0 %v18098_v21 }
 0x64a   : > { %16544 = vmatpush3.bf16.msra.mxu0 %v18098_v21 }
 0x64b   : > { %16546 = vmatprep.subr.bf16.mxu0 %v18104_v50 }
 0x64e   : > { %16548 = vmatpush3.bf16.msra.mxu0 %v18104_v50 }
 0x64f   : > { %16566 = vmatprep.subr.bf16.mxu0 %v18086_v55 }
 0x651   : > { %15214 = vmatmul.mubr.msk.f32.vlgmr.msra.gmra.mrb[80].mxu0 %vm4737_vm2, %v12952_v54 }
 0x652   : > { %16568 = vmatpush3.bf16.msra.mxu0 %v18086_v55  ;;  %15261 = vmatprep.mubr.msk.f32.mxu0 %vm4737_vm2, %v12965_v1 }
 0x653   : > { %16570 = vmatprep.subr.bf16.mxu0 %v18092_v45 }
 0x656   : > { %16572 = vmatpush3.bf16.msra.mxu0 %v18092_v45 }
 0x657   : > { %16574 = vmatprep.subr.bf16.mxu0 %v18098_v21 }
 0x65a   : > { %16576 = vmatpush3.bf16.msra.mxu0 %v18098_v21 }
 0x65b   : > { %16578 = vmatprep.subr.bf16.mxu0 %v18104_v50 }
 0x65e   : > { %16580 = vmatpush3.bf16.msra.mxu0 %v18104_v50 }
 0x65f   : > { %16582 = vmatprep.subr.bf16.mxu0 %v18086_v55 }
 0x661   : > { %15262 = vmatmul.mubr.msk.f32.vlgmr.msra.gmra.mrb[82].mxu0 %vm4737_vm2, %v12966_v13  ;;  %v12993_v13 = vld [vmem:[%s19212_s4 + $0xf0] sm:$0xff] }
 0x662   : > { %16584 = vmatpush3.bf16.msra.mxu0 %v18086_v55  ;;  %15285 = vmatprep.mubr.msk.f32.mxu0 %vm4737_vm2, %v12972_v25  ;;  %v12994_v25 = vld [vmem:[%s19212_s4 + $0xf8] sm:$0xff] }
 0x663   : > { %16586 = vmatprep.subr.bf16.mxu0 %v18092_v45 }
 0x666   : > { %16588 = vmatpush3.bf16.msra.mxu0 %v18092_v45 }
 0x667   : > { %16590 = vmatprep.subr.bf16.mxu0 %v18098_v21 }
 0x66a   : > { %16592 = vmatpush3.bf16.msra.mxu0 %v18098_v21 }
 0x66b   : > { %16594 = vmatprep.subr.bf16.mxu0 %v18104_v50 }
 0x66e   : > { %16596 = vmatpush3.bf16.msra.mxu0 %v18104_v50 }
 0x66f   : > { %16614 = vmatprep.subr.bf16.mxu0 %v18086_v55 }
 0x671   : > { %15286 = vmatmul.mubr.msk.f32.vlgmr.msra.gmra.mrb[84].mxu0 %vm4737_vm2, %v12973_v48 }
 0x672   : > { %16616 = vmatpush3.bf16.msra.mxu0 %v18086_v55  ;;  %15333 = vmatprep.mubr.msk.f32.mxu0 %vm4737_vm2, %v12986_v53 }
 0x673   : > { %16618 = vmatprep.subr.bf16.mxu0 %v18092_v45 }
 0x676   : > { %16620 = vmatpush3.bf16.msra.mxu0 %v18092_v45 }
 0x677   : > { %16622 = vmatprep.subr.bf16.mxu0 %v18098_v21 }
 0x67a   : > { %16624 = vmatpush3.bf16.msra.mxu0 %v18098_v21 }
 0x67b   : > { %16626 = vmatprep.subr.bf16.mxu0 %v18104_v50 }
 0x67e   : > { %16628 = vmatpush3.bf16.msra.mxu0 %v18104_v50 }
 0x681   : > { %15334 = vmatmul.mubr.msk.f32.vlgmr.msra.gmra.mrb[86].mxu0 %vm4737_vm2, %v12987_v61 }
 0x6e4   : > { %v14999_v31 = vpop.f32.mrb[192].mxu1  ;;  %v15071_v37 = vpop.f32.mrb[72].mxu0 }
 0x6e5   : > { %v4810_v44 = vpop.f32.mrb[193].mxu1  ;;  %v5313_v5 = vpop.f32.mrb[73].mxu0 }
 0x6f4   : > { %v15018_v12 = vpop.f32.mrb[194].mxu1  ;;  %v15095_v57 = vpop.f32.mrb[74].mxu0 }
 0x6f5   : > { %v4895_v33 = vpop.f32.mrb[195].mxu1  ;;  %v5482_v29 = vpop.f32.mrb[75].mxu0 }
 0x6f6   : > { %15021 = vmatprep.mubr.msk.f32.mxu1 %vm4906_vm11, %v4895_v33 }
 0x6f7   : > { %15022 = vmatmul.mubr.msk.f32.vlgmr.msra.gmra.mrb[196].mxu1 %vm4906_vm11, %v15018_v12 }
 0x6f8   : > { %15025 = vmatpush3.msra.mxu1 %v4819_v17  ;;  %15026 = vmatprep.mubr.msk.f32.mxu1 %vm4906_vm11, %v4810_v44 }
 0x6f9   : > { %16422 = vmatprep.subr.bf16.mxu1 %v18086_v55 }
 0x6ff   : > { %15027 = vmatmul.mubr.msk.f32.vlgmr.msra.gmra.mrb[196].mxu1 %vm4906_vm11, %v14999_v31 }
 0x700   : > { %16424 = vmatpush3.bf16.msra.mxu1 %v18086_v55  ;;  %15045 = vmatprep.mubr.msk.f32.mxu1 %vm4737_vm2, %v12902_v38 }
 0x701   : > { %16426 = vmatprep.subr.bf16.mxu1 %v18092_v45 }
 0x704   : > { %16428 = vmatpush3.bf16.msra.mxu1 %v18092_v45  ;;  %v15143_v7 = vpop.f32.mrb[76].mxu0 }
 0x705   : > { %16430 = vmatprep.subr.bf16.mxu1 %v18098_v21  ;;  %v5820_v19 = vpop.f32.mrb[77].mxu0 }
 0x708   : > { %16432 = vmatpush3.bf16.msra.mxu1 %v18098_v21 }
 0x709   : > { %16434 = vmatprep.subr.bf16.mxu1 %v18104_v50 }
 0x70c   : > { %16436 = vmatpush3.bf16.msra.mxu1 %v18104_v50 }
 0x70d   : > { %15048 = vmatprep.subr.mxu1 %v12906_v58 }
 0x70f   : > { %15046 = vmatmul.mubr.msk.f32.vlgmr.msra.gmra.mrb[198].mxu1 %vm4737_vm2, %v12903_v23  ;;  %v13007_v23 = vld [vmem:[%s19216_s8 + $0x10] sm:$0xff] }
 0x710   : > { %15049 = vmatpush3.msra.mxu1 %v12906_v58  ;;  %v13008_v58 = vld [vmem:[%s19216_s8 + $0x18] sm:$0xff] }
 0x711   : > { %15072 = vmatprep.subr.mxu1 %v12913_v43 }
 0x714   : > { %v15191_v39 = vpop.f32.mrb[78].mxu0 }
 0x715   : > { %v6158_v32 = vpop.f32.mrb[79].mxu0 }
 0x724   : > { %v15215_v8 = vpop.f32.mrb[80].mxu0 }
 0x725   : > { %v6327_v9 = vpop.f32.mrb[81].mxu0 }
 0x734   : > { %v15263_v35 = vpop.f32.mrb[82].mxu0 }
 0x735   : > { %v6665_v40 = vpop.f32.mrb[83].mxu0 }
 0x744   : > { %v15287_v46 = vpop.f32.mrb[84].mxu0 }
 0x745   : > { %v6834_v47 = vpop.f32.mrb[85].mxu0 }
 0x754   : > { %v15335_v42 = vpop.f32.mrb[86].mxu0 }
 0x755   : > { %v7172_v24 = vpop.f32.mrb[87].mxu0 }
 0x7e2   : > { %v15047_v62 = vpop.f32.mrb[198].mxu1 }
 0x7e3   : > { %v5144_v59 = vpop.f32.mrb[199].mxu1 }
 0x7e4   : > { %15050 = vmatprep.mubr.msk.f32.mxu1 %vm4906_vm11, %v5144_v59  ;;  %v13021_v59 = vld [vmem:[%s19215_s7 + $0x30] sm:$0xff] }
 0x7e5   : > { %15051 = vmatmul.mubr.msk.f32.vlgmr.msra.gmra.mrb[196].mxu1 %vm4906_vm11, %v15047_v62  ;;  %v7451_v62 = vld [vmem:[%s19215_s7 + $0x8] sm:$0x1] }
 0x7e6   : > { %15074 = vmatprep.mubr.msk.f32.mxu1 %vm4906_vm11, %v5313_v5  ;;  %15073 = vmatpush3.msra.mxu1 %v12913_v43 }
 0x7e7   : > { %15096 = vmatprep.subr.mxu1 %v12920_v63 }
 0x7ed   : > { %15075 = vmatmul.mubr.msk.f32.vlgmr.msra.gmra.mrb[196].mxu1 %vm4906_vm11, %v15071_v37 }
 0x7ee   : > { %15097 = vmatpush3.msra.mxu1 %v12920_v63  ;;  %15098 = vmatprep.mubr.msk.f32.mxu1 %vm4906_vm11, %v5482_v29  ;;  %v13004_v29 = vld [vmem:[%s19215_s7 + $0x18] sm:$0x1] }
 0x7ef   : > { %16470 = vmatprep.subr.bf16.mxu1 %v18086_v55  ;;  %v13022_v63 = vld [vmem:[%s19215_s7 + $0x38] sm:$0x1] }
 0x7f5   : > { %15099 = vmatmul.mubr.msk.f32.vlgmr.msra.gmra.mrb[196].mxu1 %vm4906_vm11, %v15095_v57  ;;  %v16653_v57 = vpack.c.bf16 %v13008_v58, %v13007_v23 }
 0x7f6   : > { %16472 = vmatpush3.bf16.msra.mxu1 %v18086_v55  ;;  %15117 = vmatprep.mubr.msk.f32.mxu1 %vm4737_vm2, %v12923_v18  ;;  %v13029_v18 = vld [vmem:[%s19215_s7 + $0x40] sm:$0xff] }
 0x7f7   : > { %16474 = vmatprep.subr.bf16.mxu1 %v18092_v45 }
 0x7fa   : > { %16476 = vmatpush3.bf16.msra.mxu1 %v18092_v45 }
 0x7fb   : > { %16478 = vmatprep.subr.bf16.mxu1 %v18098_v21 }
 0x7fe   : > { %16480 = vmatpush3.bf16.msra.mxu1 %v18098_v21 }
 0x7ff   : > { %16482 = vmatprep.subr.bf16.mxu1 %v18104_v50 }
 0x802   : > { %16484 = vmatpush3.bf16.msra.mxu1 %v18104_v50 }
 0x803   : > { %15120 = vmatprep.subr.mxu1 %v12927_v11 }
 0x805   : > { %15118 = vmatmul.mubr.msk.f32.vlgmr.msra.gmra.mrb[200].mxu1 %vm4737_vm2, %v12924_v60  ;;  %v13030_v60 = vld [vmem:[%s19215_s7 + $0x48] sm:$0x1] }
 0x806   : > { %15121 = vmatpush3.msra.mxu1 %v12927_v11  ;;  %v13037_v11 = vld [vmem:[%s19215_s7 + $0x50] sm:$0xff] }
 0x807   : > { %15144 = vmatprep.subr.mxu1 %v12934_v2 }
 0x8d8   : > { %v15119_v30 = vpop.f32.mrb[200].mxu1 }
 0x8d9   : > { %v5651_v51 = vpop.f32.mrb[201].mxu1 }
 0x8da   : > { %15122 = vmatprep.mubr.msk.f32.mxu1 %vm4906_vm11, %v5651_v51  ;;  %v13054_v51 = vld [vmem:[%s19215_s7 + $0x78] sm:$0x1] }
 0x8db   : > { %15123 = vmatmul.mubr.msk.f32.vlgmr.msra.gmra.mrb[196].mxu1 %vm4906_vm11, %v15119_v30  ;;  %v13053_v30 = vld [vmem:[%s19215_s7 + $0x70] sm:$0xff] }
 0x8dc   : > { %15145 = vmatpush3.msra.mxu1 %v12934_v2  ;;  %15146 = vmatprep.mubr.msk.f32.mxu1 %vm4906_vm11, %v5820_v19  ;;  %v13038_v2 = vld [vmem:[%s19215_s7 + $0x58] sm:$0x1]  ;;  %v13046_v19 = vld [vmem:[%s19215_s7 + $0x68] sm:$0x1] }
 0x8dd   : > { %16502 = vmatprep.subr.bf16.mxu1 %v18086_v55 }
 0x8e3   : > { %15147 = vmatmul.mubr.msk.f32.vlgmr.msra.gmra.mrb[196].mxu1 %vm4906_vm11, %v15143_v7  ;;  %v13045_v7 = vld [vmem:[%s19215_s7 + $0x60] sm:$0xff] }
 0x8e4   : > { %16504 = vmatpush3.bf16.msra.mxu1 %v18086_v55  ;;  %15165 = vmatprep.mubr.msk.f32.mxu1 %vm4737_vm2, %v12937_v56  ;;  %v13061_v56 = vld [vmem:[%s19215_s7 + $0x80] sm:$0xff] }
 0x8e5   : > { %16506 = vmatprep.subr.bf16.mxu1 %v18092_v45 }
 0x8e8   : > { %16508 = vmatpush3.bf16.msra.mxu1 %v18092_v45 }
 0x8e9   : > { %16510 = vmatprep.subr.bf16.mxu1 %v18098_v21 }
 0x8ec   : > { %16512 = vmatpush3.bf16.msra.mxu1 %v18098_v21 }
 0x8ed   : > { %16514 = vmatprep.subr.bf16.mxu1 %v18104_v50 }
 0x8f0   : > { %16516 = vmatpush3.bf16.msra.mxu1 %v18104_v50 }
 0x8f1   : > { %15168 = vmatprep.subr.mxu1 %v12941_v22 }
 0x8f3   : > { %15166 = vmatmul.mubr.msk.f32.vlgmr.msra.gmra.mrb[202].mxu1 %vm4737_vm2, %v12938_v49  ;;  %v13062_v49 = vld [vmem:[%s19215_s7 + $0x88] sm:$0x1] }
 0x8f4   : > { %15169 = vmatpush3.msra.mxu1 %v12941_v22  ;;  %v13069_v22 = vld [vmem:[%s19215_s7 + $0x90] sm:$0xff] }
 0x8f5   : > { %15192 = vmatprep.subr.mxu1 %v12948_v4 }
 0x9c6   : > { %v15167_v14 = vpop.f32.mrb[202].mxu1 }
 0x9c7   : > { %v5989_v15 = vpop.f32.mrb[203].mxu1 }
 0x9c8   : > { %15170 = vmatprep.mubr.msk.f32.mxu1 %vm4906_vm11, %v5989_v15  ;;  %v13094_v15 = vld [vmem:[%s19215_s7 + $0xc8] sm:$0x1] }
 0x9c9   : > { %15171 = vmatmul.mubr.msk.f32.vlgmr.msra.gmra.mrb[196].mxu1 %vm4906_vm11, %v15167_v14  ;;  %v13093_v14 = vld [vmem:[%s19215_s7 + $0xc0] sm:$0xff] }
 0x9ca   : > { %15194 = vmatprep.mubr.msk.f32.mxu1 %vm4906_vm11, %v6158_v32  ;;  %15193 = vmatpush3.msra.mxu1 %v12948_v4  ;;  %v13077_v32 = vld [vmem:[%s19215_s7 + $0xa0] sm:$0xff]  ;;  %v13078_v4 = vld [vmem:[%s19215_s7 + $0xa8] sm:$0x1] }
 0x9cb   : > { %15216 = vmatprep.subr.mxu1 %v12955_v20 }
 0x9d1   : > { %15195 = vmatmul.mubr.msk.f32.vlgmr.msra.gmra.mrb[196].mxu1 %vm4906_vm11, %v15191_v39  ;;  %v13070_v39 = vld [vmem:[%s19215_s7 + $0x98] sm:$0x1] }
 0x9d2   : > { %15217 = vmatpush3.msra.mxu1 %v12955_v20  ;;  %15218 = vmatprep.mubr.msk.f32.mxu1 %vm4906_vm11, %v6327_v9  ;;  %v13086_v9 = vld [vmem:[%s19215_s7 + $0xb8] sm:$0x1]  ;;  %v13101_v20 = vld [vmem:[%s19215_s7 + $0xd0] sm:$0xff] }
 0x9d3   : > { %16550 = vmatprep.subr.bf16.mxu1 %v18086_v55 }
 0x9d9   : > { %15219 = vmatmul.mubr.msk.f32.vlgmr.msra.gmra.mrb[196].mxu1 %vm4906_vm11, %v15215_v8  ;;  %v13085_v8 = vld [vmem:[%s19215_s7 + $0xb0] sm:$0xff] }
 0x9da   : > { %16552 = vmatpush3.bf16.msra.mxu1 %v18086_v55  ;;  %15237 = vmatprep.mubr.msk.f32.mxu1 %vm4737_vm2, %v12958_v27  ;;  %v13102_v27 = vld [vmem:[%s19215_s7 + $0xd8] sm:$0x1] }
 0x9db   : > { %16554 = vmatprep.subr.bf16.mxu1 %v18092_v45 }
 0x9de   : > { %16556 = vmatpush3.bf16.msra.mxu1 %v18092_v45 }
 0x9df   : > { %16558 = vmatprep.subr.bf16.mxu1 %v18098_v21 }
 0x9e2   : > { %16560 = vmatpush3.bf16.msra.mxu1 %v18098_v21 }
 0x9e3   : > { %16562 = vmatprep.subr.bf16.mxu1 %v18104_v50 }
 0x9e6   : > { %16564 = vmatpush3.bf16.msra.mxu1 %v18104_v50 }
 0x9e7   : > { %15240 = vmatprep.subr.mxu1 %v12962_v34 }
 0x9e9   : > { %15238 = vmatmul.mubr.msk.f32.vlgmr.msra.gmra.mrb[204].mxu1 %vm4737_vm2, %v12959_v28  ;;  %v13109_v28 = vld [vmem:[%s19215_s7 + $0xe0] sm:$0xff] }
 0x9ea   : > { %15241 = vmatpush3.msra.mxu1 %v12962_v34  ;;  %v13110_v34 = vld [vmem:[%s19215_s7 + $0xe8] sm:$0x1] }
 0x9eb   : > { %15264 = vmatprep.subr.mxu1 %v12969_v41 }
 0xabc   : > { %v15239_v10 = vpop.f32.mrb[204].mxu1 }
 0xabd   : > { %v6496_v3 = vpop.f32.mrb[205].mxu1 }
 0xabe   : > { %15242 = vmatprep.mubr.msk.f32.mxu1 %vm4906_vm11, %v6496_v3 }
 0xabf   : > { %15243 = vmatmul.mubr.msk.f32.vlgmr.msra.gmra.mrb[196].mxu1 %vm4906_vm11, %v15239_v10 }
 0xac0   : > { %15266 = vmatprep.mubr.msk.f32.mxu1 %vm4906_vm11, %v6665_v40  ;;  %15265 = vmatpush3.msra.mxu1 %v12969_v41  ;;  %v7535_v40 = vld [vmem:[%s19216_s8 + $0x8] sm:$0xff] }
 0xac1   : > { %15288 = vmatprep.subr.mxu1 %v12976_v26 }
 0xac7   : > { %15267 = vmatmul.mubr.msk.f32.vlgmr.msra.gmra.mrb[196].mxu1 %vm4906_vm11, %v15263_v35  ;;  %v7534_v35 = vld [vmem:[%s19216_s8] sm:$0xff] }
 0xac8   : > { %15289 = vmatpush3.msra.mxu1 %v12976_v26  ;;  %15290 = vmatprep.mubr.msk.f32.mxu1 %vm4906_vm11, %v6834_v47  ;;  %v16657_v41 = vpack.c.bf16 %v7535_v40, %v7534_v35  ;;  %v13118_v47 = vld [vmem:[%s19215_s7 + $0xf8] sm:$0x1]  ;;  %v13017_v26 = vld [vmem:[%s19216_s8 + $0x20] sm:$0xff]  ;;  %v13082_v35 = vld [vmem:[%s19216_s8 + $0xa8] sm:$0xff] }
 0xac9   : > { %16598 = vmatprep.subr.bf16.mxu1 %v18086_v55 }
 0xacf   : > { %15291 = vmatmul.mubr.msk.f32.vlgmr.msra.gmra.mrb[196].mxu1 %vm4906_vm11, %v15287_v46  ;;  %v13117_v46 = vld [vmem:[%s19215_s7 + $0xf0] sm:$0xff] }
 0xad0   : > { %16600 = vmatpush3.bf16.msra.mxu1 %v18086_v55  ;;  %15309 = vmatprep.mubr.msk.f32.mxu1 %vm4737_vm2, %v12979_v36  ;;  %v13018_v36 = vld [vmem:[%s19216_s8 + $0x28] sm:$0xff] }
 0xad1   : > { %16602 = vmatprep.subr.bf16.mxu1 %v18092_v45 }
 0xad4   : > { %16604 = vmatpush3.bf16.msra.mxu1 %v18092_v45 }
 0xad5   : > { %16606 = vmatprep.subr.bf16.mxu1 %v18098_v21 }
 0xad8   : > { %16608 = vmatpush3.bf16.msra.mxu1 %v18098_v21 }
 0xad9   : > { %16610 = vmatprep.subr.bf16.mxu1 %v18104_v50 }
 0xadc   : > { %16612 = vmatpush3.bf16.msra.mxu1 %v18104_v50 }
 0xadd   : > { %15312 = vmatprep.subr.mxu1 %v12983_v6 }
 0xadf   : > { %15310 = vmatmul.mubr.msk.f32.vlgmr.msra.gmra.mrb[206].mxu1 %vm4737_vm2, %v12980_v52  ;;  %v13013_v52 = vld [vmem:[%s19215_s7 + $0x20] sm:$0xff] }
 0xae0   : > { %15313 = vmatpush3.msra.mxu1 %v12983_v6  ;;  %v16665_v6 = vpack.c.bf16 %v13018_v36, %v13017_v26  ;;  %v13106_v26 = vld [vmem:[%s19216_s8 + $0xd8] sm:$0xff] }
 0xae1   : > { %15336 = vmatprep.subr.mxu1 %v12990_v16 }
 0xbb2   : > { %v15311_v54 = vpop.f32.mrb[206].mxu1 }
 0xbb3   : > { %v7003_v1 = vpop.f32.mrb[207].mxu1 }
 0xbb4   : > { %15314 = vmatprep.mubr.msk.f32.mxu1 %vm4906_vm11, %v7003_v1 }
 0xbb5   : > { %15315 = vmatmul.mubr.msk.f32.vlgmr.msra.gmra.mrb[196].mxu1 %vm4906_vm11, %v15311_v54 }
 0xbb6   : > { %15337 = vmatpush3.msra.mxu1 %v12990_v16  ;;  %15338 = vmatprep.mubr.msk.f32.mxu1 %vm4906_vm11, %v7172_v24  ;;  %v13014_v16 = vld [vmem:[%s19215_s7 + $0x28] sm:$0x1]  ;;  %v13026_v24 = vld [vmem:[%s19216_s8 + $0x38] sm:$0xff] }
 0xbb7   : > { %16630 = vmatprep.subr.bf16.mxu1 %v18086_v55 }
 0xbbd   : > { %15339 = vmatmul.mubr.msk.f32.vlgmr.msra.gmra.mrb[196].mxu1 %vm4906_vm11, %v15335_v42  ;;  %v13025_v42 = vld [vmem:[%s19216_s8 + $0x30] sm:$0xff] }
 0xbbe   : > { %16632 = vmatpush3.bf16.msra.mxu1 %v18086_v55  ;;  %15357 = vmatprep.mubr.msk.f32.mxu1 %vm4737_vm2, %v12993_v13  ;;  %v12997_v55 = vld [vmem:[%s19213_s5 + $0x78] sm:$0xff]  ;;  %v16673_v54 = vpack.c.bf16 %v13026_v24, %v13025_v42  ;;  %v13121_v42 = vld [vmem:[%s19216_s8 + $0xf0] sm:$0xff] }
 0xbbf   : > { %16634 = vmatprep.subr.bf16.mxu1 %v18092_v45  ;;  %v13122_v24 = vld [vmem:[%s19216_s8 + $0xf8] sm:$0xff] }
 0xbc2   : > { %16636 = vmatpush3.bf16.msra.mxu1 %v18092_v45 }
 0xbc3   : > { %16638 = vmatprep.subr.bf16.mxu1 %v18098_v21 }
 0xbc6   : > { %16640 = vmatpush3.bf16.msra.mxu1 %v18098_v21  ;;  %v13003_v21 = vld [vmem:[%s19215_s7 + $0x10] sm:$0xff] }
 0xbc7   : > { %16642 = vmatprep.subr.bf16.mxu1 %v18104_v50  ;;  %15376 = vmatprep.mubr.msk.f32.mxu0 %vm7452_vm12, %v13003_v21 }
 0xbca   : > { %16644 = vmatpush3.bf16.msra.mxu1 %v18104_v50  ;;  %v7450_v50 = vld [vmem:[%s19215_s7] sm:$0xff] }
 0xbcb   : > { %15360 = vmatprep.subr.mxu1 %v12997_v55 }
 0xbcd   : > { %15358 = vmatmul.mubr.msk.f32.vlgmr.msra.gmra.mrb[208].mxu1 %vm4737_vm2, %v12994_v25 }
 0xbce   : > { %15361 = vmatpush3.msra.mxu1 %v12997_v55 }
 0xca0   : > { %v15359_v45 = vpop.f32.mrb[208].mxu1 }
 0xca1   : > { %v7341_v48 = vpop.f32.mrb[209].mxu1 }
 0xca2   : > { %15362 = vmatprep.mubr.msk.f32.mxu1 %vm4906_vm11, %v7341_v48 }
 0xca3   : > { %15363 = vmatmul.mubr.msk.f32.vlgmr.msra.gmra.mrb[196].mxu1 %vm4906_vm11, %v15359_v45 }
 0xca4   : > { %15369 = vmatprep.mubr.msk.f32.mxu1 %vm7452_vm12, %v7450_v50 }
 0xd76   : > { %v15364_v17 = vpop.f32.mrb[196].mxu1 }
 0xd77   : > { %v7443_v31 = vadd.f32 %v15364_v17, %v13000_v0  ;;  %v7424_v44 = vpop.f32.mrb[197].mxu1 }
 0xd78   : > { %v7442_v12 = vadd.f32 %v13000_v0, %v7424_v44 }
 0xd79   : > { %vm7445_vm13 = vcmp.ge.f32.partialorder %v7443_v31, 0.0  ;;  %v7447_v33 = vmul.f32 0.2, %v7443_v31 }
 0xd7a   : > { %vm7444_vm14 = vcmp.ge.f32.partialorder %v7442_v12, 0.0  ;;  %v7446_v38 = vmul.f32 0.2, %v7442_v12 }
 0xd7b   : > { %v7449_v37 = vsel %vm7445_vm13, %v7443_v31, %v7447_v33 }
 0xd7c   : > { %v7448_v5 = vsel %vm7444_vm14, %v7442_v12, %v7446_v38 }
 0xd7d   : > { %v18439_v43 = vpack.c.bf16 %v7449_v37, %v7448_v5 }
 0xd7f   : > { %16646 = vmatprep.subr.bf16.mxu1 %v18439_v43  ;;  %16650 = vmatprep.subr.bf16.mxu0 %v18439_v43 }
 0xd80   : > { %16648 = vmatpush3.bf16.msra.mxu1 %v18439_v43  ;;  %16652 = vmatpush3.bf16.msra.mxu0 %v18439_v43 }
 0xd81   : > { %16670 = vmatprep.subr.bf16.mxu1 %v18439_v43  ;;  %16654 = vmatprep.subr.bf16.mxu0 %v16653_v57 }
 0xd83   : > { %15377 = vmatmul.mubr.msk.f32.vlgmr.msra.gmra.mrb[88].mxu0 %vm7452_vm12, %v13004_v29  ;;  %15370 = vmatmul.mubr.msk.f32.vlgmr.msra.gmra.mrb[210].mxu1 %vm7452_vm12, %v7451_v62 }
 0xd84   : > { %16672 = vmatpush3.bf16.msra.mxu1 %v18439_v43  ;;  %15411 = vmatprep.mubr.msk.f32.mxu1 %vm7452_vm12, %v13021_v59 }
 0xd85   : > { %16678 = vmatprep.subr.bf16.mxu1 %v18439_v43  ;;  %16656 = vmatpush3.bf16.msra.mxu0 %v16653_v57 }
 0xd86   : > { %16658 = vmatprep.subr.bf16.mxu0 %v16657_v41 }
 0xd87   : > { %15412 = vmatmul.mubr.msk.f32.vlgmr.msra.gmra.mrb[212].mxu1 %vm7452_vm12, %v13022_v63 }
 0xd88   : > { %16680 = vmatpush3.bf16.msra.mxu1 %v18439_v43  ;;  %15425 = vmatprep.mubr.msk.f32.mxu1 %vm7452_vm12, %v13029_v18 }
 0xd89   : > { %16686 = vmatprep.subr.bf16.mxu1 %v18439_v43 }
 0xd8b   : > { %15426 = vmatmul.mubr.msk.f32.vlgmr.msra.gmra.mrb[214].mxu1 %vm7452_vm12, %v13030_v60  ;;  %v13033_v60 = vld [vmem:[%s19216_s8 + $0x40] sm:$0xff] }
 0xd8c   : > { %16688 = vmatpush3.bf16.msra.mxu1 %v18439_v43  ;;  %15439 = vmatprep.mubr.msk.f32.mxu1 %vm7452_vm12, %v13037_v11  ;;  %v13034_v11 = vld [vmem:[%s19216_s8 + $0x48] sm:$0xff] }
 0xd8d   : > { %16694 = vmatprep.subr.bf16.mxu1 %v18439_v43 }
 0xd8f   : > { %15440 = vmatmul.mubr.msk.f32.vlgmr.msra.gmra.mrb[216].mxu1 %vm7452_vm12, %v13038_v2 }
 0xd90   : > { %16696 = vmatpush3.bf16.msra.mxu1 %v18439_v43  ;;  %15453 = vmatprep.mubr.msk.f32.mxu1 %vm7452_vm12, %v13045_v7 }
 0xd91   : > { %16702 = vmatprep.subr.bf16.mxu1 %v18439_v43 }
 0xd93   : > { %15454 = vmatmul.mubr.msk.f32.vlgmr.msra.gmra.mrb[218].mxu1 %vm7452_vm12, %v13046_v19  ;;  %v16681_v19 = vpack.c.bf16 %v13034_v11, %v13033_v60  ;;  %v13140_v11 = vld [vmem:[%s19219_s11 + $0x40] sm:$0xff] }
 0xd94   : > { %16704 = vmatpush3.bf16.msra.mxu1 %v18439_v43  ;;  %15467 = vmatprep.mubr.msk.f32.mxu1 %vm7452_vm12, %v13053_v30  ;;  %v13041_v30 = vld [vmem:[%s19216_s8 + $0x50] sm:$0xff] }
 0xd95   : > { %16710 = vmatprep.subr.bf16.mxu1 %v18439_v43 }
 0xd97   : > { %15468 = vmatmul.mubr.msk.f32.vlgmr.msra.gmra.mrb[220].mxu1 %vm7452_vm12, %v13054_v51  ;;  %v13042_v51 = vld [vmem:[%s19216_s8 + $0x58] sm:$0xff] }
 0xd98   : > { %16712 = vmatpush3.bf16.msra.mxu1 %v18439_v43  ;;  %15481 = vmatprep.mubr.msk.f32.mxu1 %vm7452_vm12, %v13061_v56  ;;  %v16689_v56 = vpack.c.bf16 %v13042_v51, %v13041_v30 }
 0xd99   : > { %16718 = vmatprep.subr.bf16.mxu1 %v18439_v43 }
 0xd9b   : > { %15482 = vmatmul.mubr.msk.f32.vlgmr.msra.gmra.mrb[222].mxu1 %vm7452_vm12, %v13062_v49  ;;  %v13049_v49 = vld [vmem:[%s19216_s8 + $0x60] sm:$0xff] }
 0xd9c   : > { %16720 = vmatpush3.bf16.msra.mxu1 %v18439_v43  ;;  %15495 = vmatprep.mubr.msk.f32.mxu1 %vm7452_vm12, %v13069_v22  ;;  %v13050_v22 = vld [vmem:[%s19216_s8 + $0x68] sm:$0xff] }
 0xd9d   : > { %16726 = vmatprep.subr.bf16.mxu1 %v18439_v43 }
 0xd9f   : > { %15496 = vmatmul.mubr.msk.f32.vlgmr.msra.gmra.mrb[224].mxu1 %vm7452_vm12, %v13070_v39  ;;  %v16697_v39 = vpack.c.bf16 %v13050_v22, %v13049_v49  ;;  %v13137_v49 = vld [vmem:[%s19218_s10 + $0x8] sm:$0xf]  ;;  %v13145_v22 = vld [vmem:[%s19218_s10 + $0xc] sm:$0xf] }
 0xda0   : > { %16728 = vmatpush3.bf16.msra.mxu1 %v18439_v43  ;;  %15509 = vmatprep.mubr.msk.f32.mxu1 %vm7452_vm12, %v13077_v32  ;;  %v13057_v32 = vld [vmem:[%s19216_s8 + $0x70] sm:$0xff] }
 0xda1   : > { %16734 = vmatprep.subr.bf16.mxu1 %v18439_v43 }
 0xda3   : > { %15510 = vmatmul.mubr.msk.f32.vlgmr.msra.gmra.mrb[226].mxu1 %vm7452_vm12, %v13078_v4  ;;  %v13058_v4 = vld [vmem:[%s19216_s8 + $0x78] sm:$0xff] }
 0xda4   : > { %16736 = vmatpush3.bf16.msra.mxu1 %v18439_v43  ;;  %15523 = vmatprep.mubr.msk.f32.mxu1 %vm7452_vm12, %v13085_v8  ;;  %v16705_v8 = vpack.c.bf16 %v13058_v4, %v13057_v32  ;;  %v13143_v32 = vld [vmem:[%s19219_s11 + $0x58] sm:$0xff]  ;;  %v13148_v4 = vld [vmem:[%s19219_s11 + $0x60] sm:$0xff] }
 0xda5   : > { %16742 = vmatprep.subr.bf16.mxu1 %v18439_v43 }
 0xda7   : > { %15524 = vmatmul.mubr.msk.f32.vlgmr.msra.gmra.mrb[228].mxu1 %vm7452_vm12, %v13086_v9  ;;  %v13065_v9 = vld [vmem:[%s19216_s8 + $0x80] sm:$0xff] }
 0xda8   : > { %16744 = vmatpush3.bf16.msra.mxu1 %v18439_v43  ;;  %15537 = vmatprep.mubr.msk.f32.mxu1 %vm7452_vm12, %v13093_v14  ;;  %v13066_v14 = vld [vmem:[%s19216_s8 + $0x88] sm:$0xff] }
 0xda9   : > { %16750 = vmatprep.subr.bf16.mxu1 %v18439_v43 }
 0xdab   : > { %15538 = vmatmul.mubr.msk.f32.vlgmr.msra.gmra.mrb[230].mxu1 %vm7452_vm12, %v13094_v15  ;;  %v16713_v15 = vpack.c.bf16 %v13066_v14, %v13065_v9  ;;  %v13149_v9 = vld [vmem:[%s19219_s11 + $0x68] sm:$0xff] }
 0xdac   : > { %16752 = vmatpush3.bf16.msra.mxu1 %v18439_v43  ;;  %15551 = vmatprep.mubr.msk.f32.mxu1 %vm7452_vm12, %v13101_v20  ;;  %v13073_v20 = vld [vmem:[%s19216_s8 + $0x90] sm:$0xff]  ;;  %v16808_v14 = vpack.c.bf16 %v13149_v9, %v13148_v4  ;;  %v13189_v4 = vld [vmem:[%s19219_s11 + $0x108] sm:$0xff] }
 0xdad   : > { %16758 = vmatprep.subr.bf16.mxu1 %v18439_v43 }
 0xdaf   : > { %15552 = vmatmul.mubr.msk.f32.vlgmr.msra.gmra.mrb[232].mxu1 %vm7452_vm12, %v13102_v27  ;;  %v13074_v27 = vld [vmem:[%s19216_s8 + $0x98] sm:$0xff] }
 0xdb0   : > { %16760 = vmatpush3.bf16.msra.mxu1 %v18439_v43  ;;  %15565 = vmatprep.mubr.msk.f32.mxu1 %vm7452_vm12, %v13109_v28  ;;  %v16721_v28 = vpack.c.bf16 %v13074_v27, %v13073_v20  ;;  %v13151_v20 = vld [vmem:[%s19219_s11 + $0x78] sm:$0xff] }
 0xdb1   : > { %16766 = vmatprep.subr.bf16.mxu1 %v18439_v43 }
 0xdb3   : > { %15566 = vmatmul.mubr.msk.f32.vlgmr.msra.gmra.mrb[234].mxu1 %vm7452_vm12, %v13110_v34  ;;  %v13081_v34 = vld [vmem:[%s19216_s8 + $0xa0] sm:$0xff] }
 0xdb4   : > { %16768 = vmatpush3.bf16.msra.mxu1 %v18439_v43  ;;  %15579 = vmatprep.mubr.msk.f32.mxu1 %vm7452_vm12, %v13117_v46  ;;  %v16729_v40 = vpack.c.bf16 %v13082_v35, %v13081_v34  ;;  %v13090_v46 = vld [vmem:[%s19216_s8 + $0xb8] sm:$0xff] }
 0xdb7   : > { %15580 = vmatmul.mubr.msk.f32.vlgmr.msra.gmra.mrb[236].mxu1 %vm7452_vm12, %v13118_v47 }
 0xe56   : > { %v15378_v53 = vpop.f32.mrb[88].mxu0  ;;  %v15371_v61 = vpop.f32.mrb[210].mxu1 }
 0xe57   : > { %v7611_v10 = vpop.f32.mrb[89].mxu0  ;;  %v7525_v3 = vpop.f32.mrb[211].mxu1 }
 0xe58   : > { %15383 = vmatprep.mubr.msk.f32.mxu0 %vm7452_vm12, %v7611_v10 }
 0xe59   : > { %15384 = vmatmul.mubr.msk.f32.vlgmr.msra.gmra.mrb[90].mxu0 %vm7452_vm12, %v15378_v53  ;;  %v13097_v53 = vld [vmem:[%s19216_s8 + $0xc0] sm:$0xff] }
 0xe5a   : > { %16660 = vmatpush3.bf16.msra.mxu0 %v16657_v41  ;;  %15390 = vmatprep.mubr.msk.f32.mxu0 %vm7452_vm12, %v7525_v3  ;;  %v15413_v1 = vpop.f32.mrb[212].mxu1  ;;  %v13089_v41 = vld [vmem:[%s19216_s8 + $0xb0] sm:$0xff] }
 0xe5b   : > { %16662 = vmatprep.subr.bf16.mxu0 %v18439_v43  ;;  %v8030_v13 = vpop.f32.mrb[213].mxu1  ;;  %v16737_v47 = vpack.c.bf16 %v13090_v46, %v13089_v41  ;;  %v13105_v3 = vld [vmem:[%s19216_s8 + $0xd0] sm:$0xff] }
 0xe5c   : > { %v16753_v36 = vpack.c.bf16 %v13106_v26, %v13105_v3 }
 0xe5e   : > { %v15427_v25 = vpop.f32.mrb[214].mxu1 }
 0xe5f   : > { %v8200_v55 = vpop.f32.mrb[215].mxu1 }
 0xe61   : > { %15391 = vmatmul.mubr.msk.f32.vlgmr.msra.gmra.mrb[90].mxu0 %vm7452_vm12, %v15371_v61  ;;  %v13098_v61 = vld [vmem:[%s19216_s8 + $0xc8] sm:$0xff] }
 0xe62   : > { %16664 = vmatpush3.bf16.msra.mxu0 %v18439_v43  ;;  %15397 = vmatprep.mubr.msk.f32.mxu0 %vm7452_vm12, %v13013_v52  ;;  %v15441_v45 = vpop.f32.mrb[216].mxu1  ;;  %v16745_v10 = vpack.c.bf16 %v13098_v61, %v13097_v53  ;;  %v13113_v52 = vld [vmem:[%s19216_s8 + $0xe0] sm:$0xff]  ;;  %v13157_v53 = vld [vmem:[%s19219_s11 + $0x88] sm:$0xff] }
 0xe63   : > { %16666 = vmatprep.subr.bf16.mxu0 %v16665_v6  ;;  %v8370_v48 = vpop.f32.mrb[217].mxu1 }
 0xe65   : > { %15398 = vmatmul.mubr.msk.f32.vlgmr.msra.gmra.mrb[92].mxu0 %vm7452_vm12, %v13014_v16 }
 0xe66   : > { %16668 = vmatpush3.bf16.msra.mxu0 %v16665_v6  ;;  %v15455_v21 = vpop.f32.mrb[218].mxu1  ;;  %v13114_v6 = vld [vmem:[%s19216_s8 + $0xe8] sm:$0xff] }
 0xe67   : > { %16674 = vmatprep.subr.bf16.mxu0 %v16673_v54  ;;  %v8540_v50 = vpop.f32.mrb[219].mxu1  ;;  %v16761_v16 = vpack.c.bf16 %v13114_v6, %v13113_v52  ;;  %v13161_v52 = vld [vmem:[%s19218_s10 + $0x14] sm:$0xf] }
 0xe68   : > { %v13158_v6 = vld [vmem:[%s19219_s11 + $0x90] sm:$0xff] }
 0xe6a   : > { %v15469_v0 = vpop.f32.mrb[220].mxu1 }
 0xe6b   : > { %v8710_v17 = vpop.f32.mrb[221].mxu1 }
 0xe6e   : > { %v18615_v31 = vpop.f32.mrb[222].mxu1 }
 0xe6f   : > { %v8880_v44 = vpop.f32.mrb[223].mxu1 }
 0xe72   : > { %v18617_v12 = vpop.f32.mrb[224].mxu1 }
 0xe73   : > { %v18619_v33 = vpop.f32.mrb[225].mxu1 }
 0xe76   : > { %v18621_v38 = vpop.f32.mrb[226].mxu1 }
 0xe77   : > { %v18623_v23 = vpop.f32.mrb[227].mxu1 }
 0xe7a   : > { %v18625_v58 = vpop.f32.mrb[228].mxu1 }
 0xe7b   : > { %v18627_v37 = vpop.f32.mrb[229].mxu1 }
 0xe7e   : > { %v18629_v5 = vpop.f32.mrb[230].mxu1 }
 0xe7f   : > { %v18631_v43 = vpop.f32.mrb[231].mxu1 }
 0xe82   : > { %v18633_v57 = vpop.f32.mrb[232].mxu1 }
 0xe83   : > { %v18635_v29 = vpop.f32.mrb[233].mxu1 }
 0xe86   : > { %v18637_v62 = vpop.f32.mrb[234].mxu1 }
 0xe87   : > { %v18639_v59 = vpop.f32.mrb[235].mxu1 }
 0xe8a   : > { %v18641_v63 = vpop.f32.mrb[236].mxu1 }
 0xe8b   : > { %v18643_v18 = vpop.f32.mrb[237].mxu1 }
 0xf38   : > { %v15399_v2 = vpop.f32.mrb[92].mxu0 }
 0xf39   : > { %v7860_v7 = vpop.f32.mrb[93].mxu0 }
 0xf3a   : > { %15404 = vmatprep.mubr.msk.f32.mxu0 %vm7452_vm12, %v7860_v7 }
 0xf3b   : > { %15405 = vmatmul.mubr.msk.f32.vlgmr.msra.gmra.mrb[90].mxu0 %vm7452_vm12, %v15399_v2  ;;  %v13141_v2 = vld [vmem:[%s19219_s11 + $0x48] sm:$0xff] }
 0xf3c   : > { %16676 = vmatpush3.bf16.msra.mxu0 %v16673_v54  ;;  %15418 = vmatprep.mubr.msk.f32.mxu0 %vm7452_vm12, %v8030_v13  ;;  %v16769_v54 = vpack.c.bf16 %v13122_v24, %v13121_v42  ;;  %v17183_v13 = vmov 0.0   ;;  %v16798_v7 = vpack.c.bf16 %v13141_v2, %v13140_v11  ;;  %v13164_v42 = vld [vmem:[%s19219_s11 + $0xa0] sm:$0xff]  ;;  %v13181_v11 = vld [vmem:[%s19219_s11 + $0xe8] sm:$0xff] }
 0xf3d   : > { %16682 = vmatprep.subr.bf16.mxu0 %v16681_v19  ;;  %15593 = vmatprep.mubr.msk.f32.mxu1 %vm17182_vm15, %v17183_v13 }
 0xf43   : > { %15419 = vmatmul.mubr.msk.f32.vlgmr.msra.gmra.mrb[90].mxu0 %vm7452_vm12, %v15413_v1  ;;  %v17181_v1 = vmov 0.0|0.0  }
 0xf44   : > { %16684 = vmatpush3.bf16.msra.mxu0 %v16681_v19  ;;  %15432 = vmatprep.mubr.msk.f32.mxu0 %vm7452_vm12, %v8200_v55  ;;  %v13132_v55 = vld [vmem:[%s19219_s11 + $0x28] sm:$0xff] }
 0xf45   : > { %16690 = vmatprep.subr.bf16.mxu0 %v16689_v56  ;;  %16773 = vmatprep.subr.bf16.mxu1 %v17181_v1 }
 0xf4b   : > { %15433 = vmatmul.mubr.msk.f32.vlgmr.msra.gmra.mrb[90].mxu0 %vm7452_vm12, %v15427_v25  ;;  %v13131_v25 = vld [vmem:[%s19219_s11 + $0x20] sm:$0xff] }
 0xf4c   : > { %16692 = vmatpush3.bf16.msra.mxu0 %v16689_v56  ;;  %15446 = vmatprep.mubr.msk.f32.mxu0 %vm7452_vm12, %v8370_v48  ;;  %v13133_v48 = vld [vmem:[%s19219_s11 + $0x30] sm:$0xff] }
 0xf4d   : > { %16698 = vmatprep.subr.bf16.mxu0 %v16697_v39 }
 0xf53   : > { %15447 = vmatmul.mubr.msk.f32.vlgmr.msra.gmra.mrb[90].mxu0 %vm7452_vm12, %v15441_v45  ;;  %v16782_v45 = vpack.c.bf16 %v13132_v55, %v13131_v25  ;;  %v13166_v55 = vld [vmem:[%s19219_s11 + $0xb0] sm:$0xff] }
 0xf54   : > { %16700 = vmatpush3.bf16.msra.mxu0 %v16697_v39  ;;  %15460 = vmatprep.mubr.msk.f32.mxu0 %vm7452_vm12, %v8540_v50  ;;  %v13142_v39 = vld [vmem:[%s19219_s11 + $0x50] sm:$0xff] }
 0xf55   : > { %16706 = vmatprep.subr.bf16.mxu0 %v16705_v8 }
 0xf5b   : > { %15461 = vmatmul.mubr.msk.f32.vlgmr.msra.gmra.mrb[90].mxu0 %vm7452_vm12, %v15455_v21  ;;  %v13134_v21 = vld [vmem:[%s19219_s11 + $0x38] sm:$0xff] }
 0xf5c   : > { %16708 = vmatpush3.bf16.msra.mxu0 %v16705_v8  ;;  %15474 = vmatprep.mubr.msk.f32.mxu0 %vm7452_vm12, %v8710_v17  ;;  %v16785_v50 = vpack.c.bf16 %v13134_v21, %v13133_v48  ;;  %v16801_v8 = vpack.c.bf16 %v13143_v32, %v13142_v39  ;;  %v13188_v32 = vld [vmem:[%s19219_s11 + $0x100] sm:$0xff] }
 0xf5d   : > { %16714 = vmatprep.subr.bf16.mxu0 %v16713_v15 }
 0xf63   : > { %15475 = vmatmul.mubr.msk.f32.vlgmr.msra.gmra.mrb[90].mxu0 %vm7452_vm12, %v15469_v0  ;;  %v13125_v0 = vld [vmem:[%s19217_s9] ss:$0 sm:$0xff] }
 0xf64   : > { %16716 = vmatpush3.bf16.msra.mxu0 %v16713_v15  ;;  %15488 = vmatprep.mubr.msk.f32.mxu0 %vm7452_vm12, %v8880_v44  ;;  %v13150_v15 = vld [vmem:[%s19219_s11 + $0x70] sm:$0xff] }
 0xf65   : > { %16722 = vmatprep.subr.bf16.mxu0 %v16721_v28  ;;  %v16811_v27 = vpack.c.bf16 %v13151_v20, %v13150_v15  ;;  %v13185_v15 = vld [vmem:[%s19218_s10 + $0x20] sm:$0xf]  ;;  %v16858_v20 = vpack.c.bf16 %v13189_v4, %v13188_v32 }
 0xf66   : > { %v13228_v32 = vld [vmem:[%s19219_s11 + $0x1a0] sm:$0xff] }
 0xf6b   : > { %15489 = vmatmul.mubr.msk.f32.vlgmr.msra.gmra.mrb[90].mxu0 %vm7452_vm12, %v18615_v31 }
 0xf6c   : > { %16724 = vmatpush3.bf16.msra.mxu0 %v16721_v28  ;;  %15502 = vmatprep.mubr.msk.f32.mxu0 %vm7452_vm12, %v18619_v33 }
 0xf6d   : > { %16730 = vmatprep.subr.bf16.mxu0 %v16729_v40 }
 0xf73   : > { %15503 = vmatmul.mubr.msk.f32.vlgmr.msra.gmra.mrb[90].mxu0 %vm7452_vm12, %v18617_v12 }
 0xf74   : > { %16732 = vmatpush3.bf16.msra.mxu0 %v16729_v40  ;;  %15516 = vmatprep.mubr.msk.f32.mxu0 %vm7452_vm12, %v18623_v23 }
 0xf75   : > { %16738 = vmatprep.subr.bf16.mxu0 %v16737_v47 }
 0xf7b   : > { %15517 = vmatmul.mubr.msk.f32.vlgmr.msra.gmra.mrb[90].mxu0 %vm7452_vm12, %v18621_v38 }
 0xf7c   : > { %16740 = vmatpush3.bf16.msra.mxu0 %v16737_v47  ;;  %15530 = vmatprep.mubr.msk.f32.mxu0 %vm7452_vm12, %v18627_v37  ;;  %v13156_v47 = vld [vmem:[%s19219_s11 + $0x80] sm:$0xff]  ;;  %v13238_v37 = vld [vmem:[%s19219_s11 + $0x1d0] sm:$0xff] }
 0xf7d   : > { %16746 = vmatprep.subr.bf16.mxu0 %v16745_v10  ;;  %v16818_v3 = vpack.c.bf16 %v13157_v53, %v13156_v47  ;;  %v13197_v47 = vld [vmem:[%s19219_s11 + $0x128] sm:$0xff] }
 0xf83   : > { %15531 = vmatmul.mubr.msk.f32.vlgmr.msra.gmra.mrb[90].mxu0 %vm7452_vm12, %v18625_v58 }
 0xf84   : > { %16748 = vmatpush3.bf16.msra.mxu0 %v16745_v10  ;;  %15544 = vmatprep.mubr.msk.f32.mxu0 %vm7452_vm12, %v18631_v43  ;;  %v10180_v43 = vld [vmem:[%s19218_s10] sm:$0xf]  ;;  %v13153_v10 = vld [vmem:[%s19218_s10 + $0x10] sm:$0xf] }
 0xf85   : > { %16754 = vmatprep.subr.bf16.mxu0 %v16753_v36 }
 0xf8b   : > { %15545 = vmatmul.mubr.msk.f32.vlgmr.msra.gmra.mrb[90].mxu0 %vm7452_vm12, %v18629_v5 }
 0xf8c   : > { %16756 = vmatpush3.bf16.msra.mxu0 %v16753_v36  ;;  %15558 = vmatprep.mubr.msk.f32.mxu0 %vm7452_vm12, %v18635_v29  ;;  %v10260_v29 = vld [vmem:[%s19219_s11 + $0x8] sm:$0xff] }
 0xf8d   : > { %16762 = vmatprep.subr.bf16.mxu0 %v16761_v16 }
 0xf93   : > { %15559 = vmatmul.mubr.msk.f32.vlgmr.msra.gmra.mrb[90].mxu0 %vm7452_vm12, %v18633_v57  ;;  %v10259_v57 = vld [vmem:[%s19219_s11] sm:$0xff] }
 0xf94   : > { %16764 = vmatpush3.bf16.msra.mxu0 %v16761_v16  ;;  %15572 = vmatprep.mubr.msk.f32.mxu0 %vm7452_vm12, %v18639_v59  ;;  %v16788_v59 = vpack.c.bf16 %v10260_v29, %v10259_v57  ;;  %v13159_v16 = vld [vmem:[%s19219_s11 + $0x98] sm:$0xff] }
 0xf95   : > { %16770 = vmatprep.subr.bf16.mxu0 %v16769_v54  ;;  %v16821_v24 = vpack.c.bf16 %v13159_v16, %v13158_v6 }
 0xf9b   : > { %15573 = vmatmul.mubr.msk.f32.vlgmr.msra.gmra.mrb[90].mxu0 %vm7452_vm12, %v18637_v62  ;;  %v13128_v62 = vld [vmem:[%s19218_s10 + $0x4] sm:$0xf] }
 0xf9c   : > { %16772 = vmatpush3.bf16.msra.mxu0 %v16769_v54  ;;  %15586 = vmatprep.mubr.msk.f32.mxu0 %vm7452_vm12, %v18643_v18  ;;  %v10262_v18 = vld [vmem:[%s19219_s11 + $0x18] sm:$0xff]  ;;  %v13165_v54 = vld [vmem:[%s19219_s11 + $0xa8] sm:$0xff] }
 0xf9d   : > { %16781 = vmatprep.subr.bf16.mxu0 %v17181_v1  ;;  %v16828_v25 = vpack.c.bf16 %v13165_v54, %v13164_v42  ;;  %v13204_v42 = vld [vmem:[%s19219_s11 + $0x140] sm:$0xff] }
 0xfa3   : > { %15587 = vmatmul.mubr.msk.f32.vlgmr.msra.gmra.mrb[90].mxu0 %vm7452_vm12, %v18641_v63  ;;  %v10261_v63 = vld [vmem:[%s19219_s11 + $0x10] sm:$0xff] }
 0xfa4   : > { %15611 = vmatprep.mubr.msk.f32.mxu0 %vm17182_vm15, %v17183_v13  ;;  %16783 = vmatpush3.bf16.msra.mxu0 %v16782_v45  ;;  %v16791_v60 = vpack.c.bf16 %v10262_v18, %v10261_v63  ;;  %v13167_v45 = vld [vmem:[%s19219_s11 + $0xb8] sm:$0xff]  ;;  %v13180_v18 = vld [vmem:[%s19219_s11 + $0xe0] sm:$0xff] }
 0xfa5   : > { %16784 = vmatprep.subr.bf16.mxu0 %v17181_v1  ;;  %v16831_v48 = vpack.c.bf16 %v13167_v45, %v13166_v55  ;;  %v13175_v63 = vld [vmem:[%s19219_s11 + $0xd8] sm:$0xff]  ;;  %v16848_v2 = vpack.c.bf16 %v13181_v11, %v13180_v18  ;;  %v13201_v45 = vld [vmem:[%s19218_s10 + $0x28] sm:$0xf]  ;;  %v13220_v18 = vld [vmem:[%s19219_s11 + $0x180] sm:$0xff] }
 0xfa8   : > { %16786 = vmatpush3.bf16.msra.mxu0 %v16785_v50 }
 0xfa9   : > { %16793 = vmatprep.subr.bf16.mxu0 %v17181_v1 }
0x1076   : > { %v15588_v17 = vpop.f32.mrb[90].mxu0 }
0x1077   : > { %v10173_v31 = vadd.f32 %v15588_v17, %v13125_v0  ;;  %v10154_v44 = vpop.f32.mrb[91].mxu0 }
0x1078   : > { %v10172_v12 = vadd.f32 %v13125_v0, %v10154_v44  ;;  %v13172_v44 = vld [vmem:[%s19219_s11 + $0xc0] sm:$0xff] }
0x1079   : > { %vm10175_vm0 = vcmp.ge.f32.partialorder %v10173_v31, 0.0  ;;  %v10177_v33 = vmul.f32 0.2, %v10173_v31 }
0x107a   : > { %vm10174_vm2 = vcmp.ge.f32.partialorder %v10172_v12, 0.0  ;;  %v10176_v38 = vmul.f32 0.2, %v10172_v12 }
0x107b   : > { %v10179_v23 = vsel %vm10175_vm0, %v10173_v31, %v10177_v33 }
0x107c   : > { %v10178_v58 = vsel %vm10174_vm2, %v10172_v12, %v10176_v38  ;;  %v13173_v12 = vld [vmem:[%s19219_s11 + $0xc8] sm:$0xff] }
0x107d   : > { %v18787_v5 = vpack.c.bf16 %v10179_v23, %v10178_v58  ;;  %v13169_v58 = vld [vmem:[%s19218_s10 + $0x18] sm:$0xf] }
0x107f   : > { %16776 = vmatpush3.bf16.msk.msra.mxu1 %vm18783_vm4, %v18787_v5 }
0x1080   : > { %16777 = vmatprep.subr.bf16.mxu1 %v17181_v1 }
0x1082   : > { %15594 = vmatmul.mubr.msk.f32.vlgmr.msra.gmra.mrb[238].mxu1 %vm10181_vm5, %v10180_v43  ;;  %v16838_v43 = vpack.c.bf16 %v13173_v12, %v13172_v44  ;;  %v13212_v44 = vld [vmem:[%s19219_s11 + $0x160] sm:$0xff] }
0x1083   : > { %16780 = vmatpush3.bf16.msk.msra.mxu1 %vm18783_vm4, %v18787_v5  ;;  %15600 = vmatprep.mubr.msk.f32.mxu1 %vm17182_vm15, %v17183_v13 }
0x1084   : > { %16787 = vmatprep.subr.bf16.mxu1 %v17181_v1 }
0x1086   : > { %15601 = vmatmul.mubr.msk.f32.vlgmr.msra.gmra.mrb[240].mxu1 %vm10181_vm5, %v13128_v62  ;;  %v13177_v62 = vld [vmem:[%s19218_s10 + $0x1c] sm:$0xf] }
0x1087   : > { %16789 = vmatpush3.bf16.msra.mxu1 %v16788_v59  ;;  %15622 = vmatprep.mubr.msk.f32.mxu1 %vm17182_vm15, %v17183_v13  ;;  %v13174_v59 = vld [vmem:[%s19219_s11 + $0xd0] sm:$0xff] }
0x1088   : > { %16790 = vmatprep.subr.bf16.mxu1 %v17181_v1 }
0x108b   : > { %16792 = vmatpush3.bf16.msra.mxu1 %v16791_v60  ;;  %v16841_v60 = vpack.c.bf16 %v13175_v63, %v13174_v59 }
0x108c   : > { %16797 = vmatprep.subr.bf16.mxu1 %v17181_v1 }
0x1155   : > { %v10255_v19 = vpop.f32.mrb[238].mxu1 }
0x1156   : > { %v15595_v30 = vpop.f32.mrb[239].mxu1  ;;  %15623 = vmatmul.mubr.msk.f32.vlgmr.msra.gmra.mrb[242].mxu1 %vm10343_vm6, %v10255_v19  ;;  %v13183_v19 = vld [vmem:[%s19219_s11 + $0xf8] sm:$0xff] }
0x1157   : > { %16799 = vmatpush3.bf16.msra.mxu1 %v16798_v7  ;;  %15640 = vmatprep.mubr.msk.f32.mxu1 %vm17182_vm15, %v17183_v13  ;;  %v13182_v7 = vld [vmem:[%s19219_s11 + $0xf0] sm:$0xff] }
0x1158   : > { %16800 = vmatprep.subr.bf16.mxu1 %v17181_v1  ;;  %v16851_v30 = vpack.c.bf16 %v13183_v19, %v13182_v7  ;;  %v13217_v19 = vld [vmem:[%s19218_s10 + $0x30] sm:$0xf] }
0x1159   : > { %v10334_v51 = vpop.f32.mrb[240].mxu1 }
0x115a   : > { %15612 = vmatmul.mubr.msk.f32.vlgmr.msra.gmra.mrb[94].mxu0 %vm10343_vm6, %v10334_v51  ;;  %v15602_v56 = vpop.f32.mrb[241].mxu1 }
0x115b   : > { %16796 = vmatpush3.bf16.msk.msra.mxu0 %vm18783_vm4, %v18787_v5  ;;  %15629 = vmatprep.mubr.msk.f32.mxu0 %vm17182_vm15, %v17183_v13 }
0x115c   : > { %16803 = vmatprep.subr.bf16.mxu0 %v17181_v1  ;;  %16802 = vmatpush3.bf16.msra.mxu1 %v16801_v8 }
0x115d   : > { %16813 = vmatprep.subr.bf16.mxu1 %v17181_v1 }
0x115e   : > { %15630 = vmatmul.mubr.msk.f32.vlgmr.msra.gmra.mrb[96].mxu0 %vm10181_vm5, %v13137_v49 }
0x115f   : > { %16806 = vmatpush3.bf16.msk.msra.mxu0 %vm18783_vm4, %v18787_v5  ;;  %15647 = vmatprep.mubr.msk.f32.mxu0 %vm17182_vm15, %v17183_v13 }
0x1160   : > { %16807 = vmatprep.subr.bf16.mxu0 %v17181_v1 }
0x1162   : > { %15648 = vmatmul.mubr.msk.f32.vlgmr.msra.gmra.mrb[98].mxu0 %vm10181_vm5, %v13145_v22 }
0x1163   : > { %15658 = vmatprep.mubr.msk.f32.mxu0 %vm17182_vm15, %v17183_v13  ;;  %16809 = vmatpush3.bf16.msra.mxu0 %v16808_v14 }
0x1164   : > { %16810 = vmatprep.subr.bf16.mxu0 %v17181_v1 }
0x1167   : > { %16812 = vmatpush3.bf16.msra.mxu0 %v16811_v27 }
0x1168   : > { %16823 = vmatprep.subr.bf16.mxu0 %v17181_v1 }
0x1229   : > { %v10486_v28 = vpop.f32.mrb[242].mxu1 }
0x122a   : > { %v15624_v34 = vpop.f32.mrb[243].mxu1 }
0x122b   : > { %v13193_v34 = vld [vmem:[%s19218_s10 + $0x24] sm:$0xf] }
0x122d   : > { %v10413_v35 = vpop.f32.mrb[94].mxu0 }
0x122e   : > { %v10487_v40 = vadd.f32 %v10486_v28, %v10413_v35  ;;  %v15613_v41 = vpop.f32.mrb[95].mxu0  ;;  %v13190_v35 = vld [vmem:[%s19219_s11 + $0x110] sm:$0xff] }
0x122f   : > { %v13196_v41 = vld [vmem:[%s19219_s11 + $0x120] sm:$0xff] }
0x1230   : > { %v16868_v53 = vpack.c.bf16 %v13197_v47, %v13196_v41  ;;  %v13236_v41 = vld [vmem:[%s19219_s11 + $0x1c0] sm:$0xff] }
0x1231   : > { %v10561_v46 = vpop.f32.mrb[96].mxu0 }
0x1232   : > { %15641 = vmatmul.mubr.msk.f32.vlgmr.msra.gmra.mrb[244].mxu1 %vm10343_vm6, %v10561_v46  ;;  %v15631_v61 = vpop.f32.mrb[97].mxu0 }
0x1233   : > { %16816 = vmatpush3.bf16.msk.msra.mxu1 %vm18783_vm4, %v18787_v5  ;;  %15665 = vmatprep.mubr.msk.f32.mxu1 %vm17182_vm15, %v17183_v13  ;;  %v13198_v61 = vld [vmem:[%s19219_s11 + $0x130] sm:$0xff] }
0x1234   : > { %16817 = vmatprep.subr.bf16.mxu1 %v17181_v1 }
0x1235   : > { %v10715_v26 = vpop.f32.mrb[98].mxu0 }
0x1236   : > { %15659 = vmatmul.mubr.msk.f32.vlgmr.msra.gmra.mrb[100].mxu0 %vm10343_vm6, %v10715_v26  ;;  %15666 = vmatmul.mubr.msk.f32.vlgmr.msra.gmra.mrb[246].mxu1 %vm10181_vm5, %v13153_v10  ;;  %v15649_v36 = vpop.f32.mrb[99].mxu0  ;;  %v13199_v10 = vld [vmem:[%s19219_s11 + $0x138] sm:$0xff] }
0x1237   : > { %16826 = vmatpush3.bf16.msk.msra.mxu0 %vm18783_vm4, %v18787_v5  ;;  %15683 = vmatprep.mubr.msk.f32.mxu0 %vm17182_vm15, %v17183_v13 }
0x1238   : > { %16819 = vmatpush3.bf16.msra.mxu1 %v16818_v3  ;;  %16827 = vmatprep.subr.bf16.mxu0 %v17181_v1  ;;  %v16871_v3 = vpack.c.bf16 %v13199_v10, %v13198_v61  ;;  %v13233_v10 = vld [vmem:[%s19218_s10 + $0x38] sm:$0xf] }
0x1239   : > { %16820 = vmatprep.subr.bf16.mxu1 %v17181_v1  ;;  %15676 = vmatprep.mubr.msk.f32.mxu1 %vm17182_vm15, %v17183_v13 }
0x123a   : > { %15684 = vmatmul.mubr.msk.f32.vlgmr.msra.gmra.mrb[102].mxu0 %vm10181_vm5, %v13161_v52 }
0x123b   : > { %15694 = vmatprep.mubr.msk.f32.mxu0 %vm17182_vm15, %v17183_v13  ;;  %16829 = vmatpush3.bf16.msra.mxu0 %v16828_v25 }
0x123c   : > { %16822 = vmatpush3.bf16.msra.mxu1 %v16821_v24  ;;  %16830 = vmatprep.subr.bf16.mxu0 %v17181_v1  ;;  %v13205_v24 = vld [vmem:[%s19219_s11 + $0x148] sm:$0xff] }
0x123d   : > { %16833 = vmatprep.subr.bf16.mxu1 %v17181_v1 }
0x123f   : > { %16832 = vmatpush3.bf16.msra.mxu0 %v16831_v48  ;;  %v16878_v48 = vpack.c.bf16 %v13205_v24, %v13204_v42  ;;  %v13245_v42 = vld [vmem:[%s19219_s11 + $0x1e8] sm:$0xff] }
0x1240   : > { %16843 = vmatprep.subr.bf16.mxu0 %v17181_v1 }
0x1305   : > { %v10639_v21 = vpop.f32.mrb[244].mxu1 }
0x1306   : > { %v10643_v50 = vadd.f32 %v10639_v21, %v10487_v40  ;;  %v15642_v0 = vpop.f32.mrb[245].mxu1  ;;  %v13191_v40 = vld [vmem:[%s19219_s11 + $0x118] sm:$0xff] }
0x1307   : > { %v16861_v46 = vpack.c.bf16 %v13191_v40, %v13190_v35  ;;  %v13209_v0 = vld [vmem:[%s19218_s10 + $0x2c] sm:$0xf] }
0x1309   : > { %v10793_v17 = vpop.f32.mrb[100].mxu0  ;;  %v10869_v31 = vpop.f32.mrb[246].mxu1 }
0x130a   : > { %v10797_v33 = vadd.f32 %v10793_v17, %v10643_v50  ;;  %15677 = vmatmul.mubr.msk.f32.vlgmr.msra.gmra.mrb[248].mxu1 %vm10343_vm6, %v10869_v31  ;;  %v15660_v38 = vpop.f32.mrb[101].mxu0  ;;  %v15667_v23 = vpop.f32.mrb[247].mxu1  ;;  %v13206_v17 = vld [vmem:[%s19219_s11 + $0x150] sm:$0xff]  ;;  %v13207_v31 = vld [vmem:[%s19219_s11 + $0x158] sm:$0xff] }
0x130b   : > { %16836 = vmatpush3.bf16.msk.msra.mxu1 %vm18783_vm4, %v18787_v5  ;;  %15701 = vmatprep.mubr.msk.f32.mxu1 %vm17182_vm15, %v17183_v13  ;;  %v16881_v12 = vpack.c.bf16 %v13207_v31, %v13206_v17  ;;  %v13214_v23 = vld [vmem:[%s19219_s11 + $0x170] sm:$0xff] }
0x130c   : > { %16837 = vmatprep.subr.bf16.mxu1 %v17181_v1 }
0x130d   : > { %v11023_v57 = vpop.f32.mrb[102].mxu0 }
0x130e   : > { %15695 = vmatmul.mubr.msk.f32.vlgmr.msra.gmra.mrb[104].mxu0 %vm10343_vm6, %v11023_v57  ;;  %15702 = vmatmul.mubr.msk.f32.vlgmr.msra.gmra.mrb[250].mxu1 %vm10181_vm5, %v13169_v58  ;;  %v15685_v29 = vpop.f32.mrb[103].mxu0  ;;  %v13215_v58 = vld [vmem:[%s19219_s11 + $0x178] sm:$0xff] }
0x130f   : > { %16846 = vmatpush3.bf16.msk.msra.mxu0 %vm18783_vm4, %v18787_v5  ;;  %15719 = vmatprep.mubr.msk.f32.mxu0 %vm17182_vm15, %v17183_v13 }
0x1310   : > { %16839 = vmatpush3.bf16.msra.mxu1 %v16838_v43  ;;  %16847 = vmatprep.subr.bf16.mxu0 %v17181_v1  ;;  %v16891_v43 = vpack.c.bf16 %v13215_v58, %v13214_v23  ;;  %v13249_v58 = vld [vmem:[#allocation2] ss:$0 sm:$0xff] }
0x1311   : > { %16840 = vmatprep.subr.bf16.mxu1 %v17181_v1  ;;  %15712 = vmatprep.mubr.msk.f32.mxu1 %vm17182_vm15, %v17183_v13 }
0x1312   : > { %15720 = vmatmul.mubr.msk.f32.vlgmr.msra.gmra.mrb[106].mxu0 %vm10181_vm5, %v13177_v62 }
0x1313   : > { %15730 = vmatprep.mubr.msk.f32.mxu0 %vm17182_vm15, %v17183_v13  ;;  %16849 = vmatpush3.bf16.msra.mxu0 %v16848_v2 }
0x1314   : > { %16842 = vmatpush3.bf16.msra.mxu1 %v16841_v60  ;;  %16850 = vmatprep.subr.bf16.mxu0 %v17181_v1  ;;  %v13221_v60 = vld [vmem:[%s19219_s11 + $0x188] sm:$0xff] }
0x1315   : > { %16853 = vmatprep.subr.bf16.mxu1 %v17181_v1 }
0x1317   : > { %16852 = vmatpush3.bf16.msra.mxu0 %v16851_v30  ;;  %v16898_v30 = vpack.c.bf16 %v13221_v60, %v13220_v18 }
0x1318   : > { %16863 = vmatprep.subr.bf16.mxu0 %v17181_v1 }
0x13dd   : > { %v10947_v51 = vpop.f32.mrb[248].mxu1 }
0x13de   : > { %v10951_v56 = vadd.f32 %v10947_v51, %v10797_v33  ;;  %v15678_v49 = vpop.f32.mrb[249].mxu1  ;;  %v13213_v33 = vld [vmem:[%s19219_s11 + $0x168] sm:$0xff] }
0x13df   : > { %v16888_v38 = vpack.c.bf16 %v13213_v33, %v13212_v44  ;;  %v13225_v49 = vld [vmem:[%s19218_s10 + $0x34] sm:$0xf] }
0x13e1   : > { %v11101_v22 = vpop.f32.mrb[104].mxu0  ;;  %v11177_v39 = vpop.f32.mrb[250].mxu1 }
0x13e2   : > { %v11105_v8 = vadd.f32 %v11101_v22, %v10951_v56  ;;  %15713 = vmatmul.mubr.msk.f32.vlgmr.msra.gmra.mrb[252].mxu1 %vm10343_vm6, %v11177_v39  ;;  %v15696_v9 = vpop.f32.mrb[105].mxu0  ;;  %v15703_v14 = vpop.f32.mrb[251].mxu1  ;;  %v13222_v22 = vld [vmem:[%s19219_s11 + $0x190] sm:$0xff]  ;;  %v13223_v39 = vld [vmem:[%s19219_s11 + $0x198] sm:$0xff] }
0x13e3   : > { %16856 = vmatpush3.bf16.msk.msra.mxu1 %vm18783_vm4, %v18787_v5  ;;  %15737 = vmatprep.mubr.msk.f32.mxu1 %vm17182_vm15, %v17183_v13  ;;  %v16901_v4 = vpack.c.bf16 %v13223_v39, %v13222_v22  ;;  %v13230_v14 = vld [vmem:[%s19219_s11 + $0x1b0] sm:$0xff] }
0x13e4   : > { %16857 = vmatprep.subr.bf16.mxu1 %v17181_v1 }
0x13e5   : > { %v11331_v27 = vpop.f32.mrb[106].mxu0 }
0x13e6   : > { %15731 = vmatmul.mubr.msk.f32.vlgmr.msra.gmra.mrb[108].mxu0 %vm10343_vm6, %v11331_v27  ;;  %15738 = vmatmul.mubr.msk.f32.vlgmr.msra.gmra.mrb[254].mxu1 %vm10181_vm5, %v13185_v15  ;;  %v15721_v28 = vpop.f32.mrb[107].mxu0  ;;  %v13231_v15 = vld [vmem:[%s19219_s11 + $0x1b8] sm:$0xff] }
0x13e7   : > { %16866 = vmatpush3.bf16.msk.msra.mxu0 %vm18783_vm4, %v18787_v5  ;;  %15755 = vmatprep.mubr.msk.f32.mxu0 %vm17182_vm15, %v17183_v13 }
0x13e8   : > { %16859 = vmatpush3.bf16.msra.mxu1 %v16858_v20  ;;  %16867 = vmatprep.subr.bf16.mxu0 %v17181_v1  ;;  %v16911_v20 = vpack.c.bf16 %v13231_v15, %v13230_v14 }
0x13e9   : > { %16860 = vmatprep.subr.bf16.mxu1 %v17181_v1  ;;  %15748 = vmatprep.mubr.msk.f32.mxu1 %vm17182_vm15, %v17183_v13 }
0x13ea   : > { %15756 = vmatmul.mubr.msk.f32.vlgmr.msra.gmra.mrb[110].mxu0 %vm10181_vm5, %v13193_v34 }
0x13eb   : > { %15766 = vmatprep.mubr.msk.f32.mxu0 %vm17182_vm15, %v17183_v13  ;;  %16869 = vmatpush3.bf16.msra.mxu0 %v16868_v53 }
0x13ec   : > { %16862 = vmatpush3.bf16.msra.mxu1 %v16861_v46  ;;  %16870 = vmatprep.subr.bf16.mxu0 %v17181_v1  ;;  %v13237_v46 = vld [vmem:[%s19219_s11 + $0x1c8] sm:$0xff] }
0x13ed   : > { %16873 = vmatprep.subr.bf16.mxu1 %v17181_v1 }
0x13ef   : > { %16872 = vmatpush3.bf16.msra.mxu0 %v16871_v3  ;;  %v16918_v3 = vpack.c.bf16 %v13237_v46, %v13236_v41 }
0x13f0   : > { %16883 = vmatprep.subr.bf16.mxu0 %v17181_v1 }
0x14b5   : > { %v11255_v26 = vpop.f32.mrb[252].mxu1 }
0x14b6   : > { %v11259_v36 = vadd.f32 %v11255_v26, %v11105_v8  ;;  %v15714_v52 = vpop.f32.mrb[253].mxu1  ;;  %v13229_v8 = vld [vmem:[%s19219_s11 + $0x1a8] sm:$0xff] }
0x14b7   : > { %v16908_v9 = vpack.c.bf16 %v13229_v8, %v13228_v32  ;;  %v13241_v52 = vld [vmem:[%s19218_s10 + $0x3c] sm:$0xf] }
0x14b9   : > { %v11409_v6 = vpop.f32.mrb[108].mxu0  ;;  %v11485_v16 = vpop.f32.mrb[254].mxu1 }
0x14ba   : > { %v11413_v54 = vadd.f32 %v11409_v6, %v11259_v36  ;;  %15749 = vmatmul.mubr.msk.f32.vlgmr.msra.gmra.mrb[0].mxu1 %vm10343_vm6, %v11485_v16  ;;  %v15732_v25 = vpop.f32.mrb[109].mxu0  ;;  %v15739_v55 = vpop.f32.mrb[255].mxu1  ;;  %v13244_v6 = vld [vmem:[%s19219_s11 + $0x1e0] sm:$0xff] }
0x14bb   : > { %16876 = vmatpush3.bf16.msk.msra.mxu1 %vm18783_vm4, %v18787_v5  ;;  %15773 = vmatprep.mubr.msk.f32.mxu1 %vm17182_vm15, %v17183_v13  ;;  %v16928_v24 = vpack.c.bf16 %v13245_v42, %v13244_v6 }
0x14bc   : > { %16877 = vmatprep.subr.bf16.mxu1 %v17181_v1 }
0x14bd   : > { %v11639_v21 = vpop.f32.mrb[110].mxu0 }
0x14be   : > { %15767 = vmatmul.mubr.msk.f32.vlgmr.msra.gmra.mrb[112].mxu0 %vm10343_vm6, %v11639_v21  ;;  %15774 = vmatmul.mubr.msk.f32.vlgmr.msra.gmra.mrb[2].mxu1 %vm10181_vm5, %v13201_v45  ;;  %v15757_v50 = vpop.f32.mrb[111].mxu0 }
0x14bf   : > { %16886 = vmatpush3.bf16.msk.msra.mxu0 %vm18783_vm4, %v18787_v5  ;;  %15791 = vmatprep.mubr.msk.f32.mxu0 %vm17182_vm15, %v17183_v13 }
0x14c0   : > { %16879 = vmatpush3.bf16.msra.mxu1 %v16878_v48  ;;  %16887 = vmatprep.subr.bf16.mxu0 %v17181_v1 }
0x14c1   : > { %16880 = vmatprep.subr.bf16.mxu1 %v17181_v1  ;;  %15784 = vmatprep.mubr.msk.f32.mxu1 %vm17182_vm15, %v17183_v13 }
0x14c2   : > { %15792 = vmatmul.mubr.msk.f32.vlgmr.msra.gmra.mrb[114].mxu0 %vm10181_vm5, %v13209_v0 }
0x14c3   : > { %15802 = vmatprep.mubr.msk.f32.mxu0 %vm17182_vm15, %v17183_v13  ;;  %16889 = vmatpush3.bf16.msra.mxu0 %v16888_v38 }
0x14c4   : > { %16882 = vmatpush3.bf16.msra.mxu1 %v16881_v12  ;;  %16890 = vmatprep.subr.bf16.mxu0 %v17181_v1 }
0x14c5   : > { %16893 = vmatprep.subr.bf16.mxu1 %v17181_v1 }
0x14c7   : > { %16892 = vmatpush3.bf16.msra.mxu0 %v16891_v43 }
0x14c8   : > { %16903 = vmatprep.subr.bf16.mxu0 %v17181_v1 }
0x158d   : > { %v11563_v57 = vpop.f32.mrb[0].mxu1 }
0x158e   : > { %v11567_v29 = vadd.f32 %v11563_v57, %v11413_v54  ;;  %v15750_v62 = vpop.f32.mrb[1].mxu1  ;;  %v13247_v54 = vld [vmem:[%s19219_s11 + $0x1f8] sm:$0xff] }
0x1591   : > { %v11717_v59 = vpop.f32.mrb[112].mxu0  ;;  %v11793_v63 = vpop.f32.mrb[2].mxu1 }
0x1592   : > { %v11721_v11 = vadd.f32 %v11717_v59, %v11567_v29  ;;  %15785 = vmatmul.mubr.msk.f32.vlgmr.msra.gmra.mrb[4].mxu1 %vm10343_vm6, %v11793_v63  ;;  %v15768_v2 = vpop.f32.mrb[113].mxu0  ;;  %v15775_v7 = vpop.f32.mrb[3].mxu1 }
0x1593   : > { %16896 = vmatpush3.bf16.msk.msra.mxu1 %vm18783_vm4, %v18787_v5  ;;  %15809 = vmatprep.mubr.msk.f32.mxu1 %vm17182_vm15, %v17183_v13 }
0x1594   : > { %16897 = vmatprep.subr.bf16.mxu1 %v17181_v1 }
0x1595   : > { %v11947_v51 = vpop.f32.mrb[114].mxu0 }
0x1596   : > { %15803 = vmatmul.mubr.msk.f32.vlgmr.msra.gmra.mrb[116].mxu0 %vm10343_vm6, %v11947_v51  ;;  %15810 = vmatmul.mubr.msk.f32.vlgmr.msra.gmra.mrb[6].mxu1 %vm10181_vm5, %v13217_v19  ;;  %v15793_v56 = vpop.f32.mrb[115].mxu0 }
0x1597   : > { %16906 = vmatpush3.bf16.msk.msra.mxu0 %vm18783_vm4, %v18787_v5  ;;  %15827 = vmatprep.mubr.msk.f32.mxu0 %vm17182_vm15, %v17183_v13 }
0x1598   : > { %16899 = vmatpush3.bf16.msra.mxu1 %v16898_v30  ;;  %16907 = vmatprep.subr.bf16.mxu0 %v17181_v1 }
0x1599   : > { %16900 = vmatprep.subr.bf16.mxu1 %v17181_v1  ;;  %15820 = vmatprep.mubr.msk.f32.mxu1 %vm17182_vm15, %v17183_v13 }
0x159a   : > { %15828 = vmatmul.mubr.msk.f32.vlgmr.msra.gmra.mrb[118].mxu0 %vm10181_vm5, %v13225_v49 }
0x159b   : > { %15838 = vmatprep.mubr.msk.f32.mxu0 %vm17182_vm15, %v17183_v13  ;;  %16909 = vmatpush3.bf16.msra.mxu0 %v16908_v9 }
0x159c   : > { %16902 = vmatpush3.bf16.msra.mxu1 %v16901_v4  ;;  %16910 = vmatprep.subr.bf16.mxu0 %v17181_v1 }
0x159d   : > { %16913 = vmatprep.subr.bf16.mxu1 %v17181_v1 }
0x159f   : > { %16912 = vmatpush3.bf16.msra.mxu0 %v16911_v20 }
0x15a0   : > { %16923 = vmatprep.subr.bf16.mxu0 %v17181_v1 }
0x1665   : > { %v11871_v27 = vpop.f32.mrb[4].mxu1 }
0x1666   : > { %v11875_v28 = vadd.f32 %v11871_v27, %v11721_v11  ;;  %v15786_v34 = vpop.f32.mrb[5].mxu1 }
0x1669   : > { %v12025_v35 = vpop.f32.mrb[116].mxu0  ;;  %v12101_v40 = vpop.f32.mrb[6].mxu1 }
0x166a   : > { %v12029_v47 = vadd.f32 %v12025_v35, %v11875_v28  ;;  %15821 = vmatmul.mubr.msk.f32.vlgmr.msra.gmra.mrb[8].mxu1 %vm10343_vm6, %v12101_v40  ;;  %v15804_v53 = vpop.f32.mrb[117].mxu0  ;;  %v15811_v61 = vpop.f32.mrb[7].mxu1 }
0x166b   : > { %16916 = vmatpush3.bf16.msk.msra.mxu1 %vm18783_vm4, %v18787_v5  ;;  %15845 = vmatprep.mubr.msk.f32.mxu1 %vm17182_vm15, %v17183_v13 }
0x166c   : > { %16917 = vmatprep.subr.bf16.mxu1 %v17181_v1 }
0x166d   : > { %v12255_v26 = vpop.f32.mrb[118].mxu0 }
0x166e   : > { %15839 = vmatmul.mubr.msk.f32.vlgmr.msra.gmra.mrb[120].mxu0 %vm10343_vm6, %v12255_v26  ;;  %15846 = vmatmul.mubr.msk.f32.vlgmr.msra.gmra.mrb[10].mxu1 %vm10181_vm5, %v13233_v10  ;;  %v15829_v36 = vpop.f32.mrb[119].mxu0 }
0x166f   : > { %16926 = vmatpush3.bf16.msk.msra.mxu0 %vm18783_vm4, %v18787_v5  ;;  %15863 = vmatprep.mubr.msk.f32.mxu0 %vm17182_vm15, %v17183_v13  ;;  %v13239_v5 = vld [vmem:[%s19219_s11 + $0x1d8] sm:$0xff] }
0x1670   : > { %16919 = vmatpush3.bf16.msra.mxu1 %v16918_v3  ;;  %16927 = vmatprep.subr.bf16.mxu0 %v17181_v1  ;;  %v16921_v16 = vpack.c.bf16 %v13239_v5, %v13238_v37 }
0x1671   : > { %16920 = vmatprep.subr.bf16.mxu1 %v17181_v1  ;;  %15856 = vmatprep.mubr.msk.f32.mxu1 %vm17182_vm15, %v17183_v13 }
0x1672   : > { %15864 = vmatmul.mubr.msk.f32.vlgmr.msra.gmra.mrb[122].mxu0 %vm10181_vm5, %v13241_v52 }
0x1673   : > { %15874 = vmatprep.mubr.msk.f32.mxu0 %vm17182_vm15, %v17183_v13  ;;  %16929 = vmatpush3.bf16.msra.mxu0 %v16928_v24  ;;  %v13246_v13 = vld [vmem:[%s19219_s11 + $0x1f0] sm:$0xff] }
0x1674   : > { %16922 = vmatpush3.bf16.msra.mxu1 %v16921_v16  ;;  %16930 = vmatprep.subr.bf16.mxu0 %v17181_v1  ;;  %v16931_v25 = vpack.c.bf16 %v13247_v54, %v13246_v13 }
0x1677   : > { %16932 = vmatpush3.bf16.msra.mxu0 %v16931_v25 }
0x173d   : > { %v12179_v55 = vpop.f32.mrb[8].mxu1 }
0x173e   : > { %v12183_v45 = vadd.f32 %v12179_v55, %v12029_v47  ;;  %v15822_v48 = vpop.f32.mrb[9].mxu1 }
0x1741   : > { %v12333_v21 = vpop.f32.mrb[120].mxu0  ;;  %v12409_v50 = vpop.f32.mrb[10].mxu1 }
0x1742   : > { %v12337_v0 = vadd.f32 %v12333_v21, %v12183_v45  ;;  %15857 = vmatmul.mubr.msk.f32.vlgmr.msra.gmra.mrb[12].mxu1 %vm10343_vm6, %v12409_v50  ;;  %v15840_v17 = vpop.f32.mrb[121].mxu0  ;;  %v15847_v31 = vpop.f32.mrb[11].mxu1 }
0x1745   : > { %v12563_v44 = vpop.f32.mrb[122].mxu0 }
0x1746   : > { %15875 = vmatmul.mubr.msk.f32.vlgmr.msra.gmra.mrb[124].mxu0 %vm10343_vm6, %v12563_v44  ;;  %v15865_v12 = vpop.f32.mrb[123].mxu0 }
0x1815   : > { %v12487_v33 = vpop.f32.mrb[12].mxu1 }
0x1816   : > { %v12491_v38 = vadd.f32 %v12487_v33, %v12337_v0  ;;  %v15858_v1 = vpop.f32.mrb[13].mxu1 }
0x1819   : > { %v12641_v23 = vpop.f32.mrb[124].mxu0 }
0x181a   : > { %v12645_v43 = vadd.f32 %v12641_v23, %v12491_v38  ;;  %v15876_v57 = vpop.f32.mrb[125].mxu0 }
0x181c   : > { %v12653_v29 = vadd.f32 %v13249_v58, %v12645_v43 }
0x181e   : > { %12655 = vst.msk [vmem:[%s455_s24] sm:$0xf] %vm12654_vm7, %v12653_v29 }
0x181f PF: > { %s26_s27 = sadd.s32 1, %s17176_s27  }
0x1820   : > { %p23_p3 = scmp.ge.s32.totalorder %s26_s27, 4  }
0x1822   :  { %25 = sbr.rel (!%p23_p3) target bundleno = 4 (0x4), region = 227 }
0x1829   :  { %12675 = vsyncpa [#allocation4], 1 }
0x182a   :  { %12677 = vsyncpa [#allocation4 + $0x1], 1 }

</bundles_post_ra>
